<compile_context>
chip_gen: v5e
topology: v5e:2x2
jax: 0.10.0
libtpu: 0.0.40
codegen_flags: <defaults>
</compile_context>

<pallas_src>
import functools

import numpy as np
import jax
import jax.numpy as jnp
from jax.experimental import pallas as pl
from jax.experimental.pallas import tpu as pltpu

# Static problem geometry (images 16x16x3, TR((24, 8, 8), 2)).
H = W = 16                # input spatial
C_IN = 3                  # input channels
C1 = 32                   # resnet50_F feature channels (representative)
C2 = 24                   # cnn_C output channels
S2 = 8                    # cnn_C output spatial (stride 2)
N_OUT = 2                 # TR head outputs

LANES_IN = (W + 2) * C_IN     # 54  : one padded input row, (w, c) flattened
LANES_1 = W * C1              # 512 : one conv1 output row, (w, c) flattened
LANES_2 = S2 * C2             # 192 : one conv2 output row, (w, c) flattened


# ---------------------------------------------------------------------------
# Fused kernel: conv1 + ReLU -> conv2 + ReLU -> TR head, all VMEM-resident.
# ---------------------------------------------------------------------------
def _fused_kernel(xe_ref, xo_ref, w1_ref, b1_ref, w2_ref, b2_ref,
                  wtr_ref, btr_ref, out_ref, odd_ref, *, tb):
    f32 = jnp.float32

    def banded(terms, w_ref, bias, relu):
        acc = jnp.dot(terms[0], w_ref[0], preferred_element_type=f32)
        for i in range(1, len(terms)):
            acc = acc + jnp.dot(terms[i], w_ref[i], preferred_element_type=f32)
        acc = acc + bias
        return jnp.maximum(acc, 0.0) if relu else acc

    def in_rows(ref, lo):                       # 8 padded rows per image
        return ref[:, lo:lo + 8, :].reshape(tb * 8, LANES_IN)

    # xe holds padded rows 0,2,...,16; xo holds padded rows 1,3,...,17.
    xe0, xe1 = in_rows(xe_ref, 0), in_rows(xe_ref, 1)
    xo0, xo1 = in_rows(xo_ref, 0), in_rows(xo_ref, 1)
    b1 = b1_ref[...]                            # (1, 512) f32

    # conv1 (3x3, 3->32, s1, p1) + bias + ReLU, split by output-row parity so
    # conv2's stride-2 row access below is a contiguous slice.
    y1_even = banded([xe0, xo0, xe1], w1_ref, b1, relu=True)   # rows ho=0,2,..,14
    y1_odd = banded([xo0, xe1, xo1], w1_ref, b1, relu=True)    # rows ho=1,3,..,15

    # Odd rows go into a VMEM scratch with one leading zero row per image
    # (the conv2 top-padding row).  Never touches HBM.
    odd_ref[:, 0:1, :] = jnp.zeros((tb, 1, LANES_1), jnp.bfloat16)
    odd_ref[:, 1:9, :] = y1_odd.reshape(tb, 8, LANES_1).astype(jnp.bfloat16)
    y1e = y1_even.astype(jnp.bfloat16)

    # conv2 (3x3, 32->24, s2, p1) + bias + ReLU.  Column stride and width
    # padding are folded into the banded weights; row selection is contiguous.
    t0 = odd_ref[:, 0:8, :].reshape(tb * 8, LANES_1)   # rows 2*ho-1 (zero at ho=0)
    t2 = odd_ref[:, 1:9, :].reshape(tb * 8, LANES_1)   # rows 2*ho+1
    y2 = banded([t0, y1e, t2], w2_ref, b2_ref[...], relu=True)   # (tb*8, 192)

    # TR head: contract the (24, 8, 8) feature tensor to 2 logits.  Weights are
    # pre-permuted to NHWC order and sliced per output row h -> no transposes.
    y2b = y2.astype(jnp.bfloat16).reshape(tb, S2, LANES_2)
    out = jnp.dot(y2b[:, 0, :], wtr_ref[0], preferred_element_type=f32)
    for h in range(1, S2):
        out = out + jnp.dot(y2b[:, h, :], wtr_ref[h], preferred_element_type=f32)
    out_ref[...] = (out + btr_ref[...]).astype(out_ref.dtype)


# ---------------------------------------------------------------------------
# One-time parameter packing (plain numpy, outside jit).
# ---------------------------------------------------------------------------
def pack_params(params):
    w1 = np.asarray(params["w_feat"], np.float32)   # (32, 3, 3, 3)  (co, ci, kh, kw)
    w2 = np.asarray(params["w_cnnc"], np.float32)   # (24, 32, 3, 3)
    wtr = np.asarray(params["w_tr"], np.float32)    # (1536, 2), NCHW-flat rows

    # conv1 banded weights: W1[i][(wo+j)*3 + ci, wo*32 + co] = w1[co, ci, i, j]
    w1b = np.zeros((3, LANES_IN, LANES_1), np.float32)
    for i in range(3):
        for j in range(3):
            blk = w1[:, :, i, j].T                  # (ci=3, co=32)
            for wo in range(W):
                w1b[i, (wo + j) * C_IN:(wo + j + 1) * C_IN,
                    wo * C1:(wo + 1) * C1] = blk

    # conv2 banded weights (stride 2 + width padding folded in):
    # W2[i][w_in*32 + ci, wo*24 + co] = w2[co, ci, i, j],  w_in = 2*wo + j - 1
    w2b = np.zeros((3, LANES_1, LANES_2), np.float32)
    for i in range(3):
        for j in range(3):
            blk = w2[:, :, i, j].T                  # (ci=32, co=24)
            for wo in range(S2):
                w_in = 2 * wo + j - 1
                if 0 <= w_in < W:
                    w2b[i, w_in * C1:(w_in + 1) * C1,
                        wo * C2:(wo + 1) * C2] = blk

    # TR rows: NCHW-flat (co, ho, wo) -> NHWC-flat (ho, wo, co), split per ho.
    wtrb = wtr.reshape(C2, S2, S2, N_OUT).transpose(1, 2, 0, 3)
    wtrb = wtrb.reshape(S2, LANES_2, N_OUT)

    return {
        "w1": jnp.asarray(w1b, jnp.bfloat16),
        "b1": jnp.asarray(np.tile(np.asarray(params["b_feat"], np.float32), W)
                          .reshape(1, LANES_1)),
        "w2": jnp.asarray(w2b, jnp.bfloat16),
        "b2": jnp.asarray(np.tile(np.asarray(params["b_cnnc"], np.float32), S2)
                          .reshape(1, LANES_2)),
        "wtr": jnp.asarray(wtrb, jnp.bfloat16),
        "btr": jnp.asarray(np.asarray(params["b_tr"], np.float32)
                           .reshape(1, N_OUT)),
    }


# ---------------------------------------------------------------------------
# Forward pass.
# ---------------------------------------------------------------------------
def res_tr_forward(images_nchw, packed):
    b = images_nchw.shape[0]
    # transfer_img(fourier) output is discarded by the reference forward -> skip.
    x = jnp.transpose(images_nchw, (0, 2, 3, 1))             # NCHW -> NHWC
    xp = jnp.pad(x, ((0, 0), (1, 1), (1, 1), (0, 0)))        # (B, 18, 18, 3)
    xp = xp.reshape(b, H + 2, LANES_IN).astype(jnp.bfloat16)
    x_even = xp[:, 0::2, :]                                  # (B, 9, 54)
    x_odd = xp[:, 1::2, :]                                   # (B, 9, 54)

    if b % 64 == 0:
        tb = 64
    elif b % 8 == 0:
        tb = 8
    else:
        tb = b
    grid = (b // tb,)
    kernel = functools.partial(_fused_kernel, tb=tb)

    return pl.pallas_call(
        kernel,
        out_shape=jax.ShapeDtypeStruct((b, N_OUT), jnp.float32),
        grid=grid,
        in_specs=[
            pl.BlockSpec((tb, (H + 2) // 2, LANES_IN), lambda i: (i, 0, 0)),
            pl.BlockSpec((tb, (H + 2) // 2, LANES_IN), lambda i: (i, 0, 0)),
            pl.BlockSpec((3, LANES_IN, LANES_1), lambda i: (0, 0, 0)),
            pl.BlockSpec((1, LANES_1), lambda i: (0, 0)),
            pl.BlockSpec((3, LANES_1, LANES_2), lambda i: (0, 0, 0)),
            pl.BlockSpec((1, LANES_2), lambda i: (0, 0)),
            pl.BlockSpec((S2, LANES_2, N_OUT), lambda i: (0, 0, 0)),
            pl.BlockSpec((1, N_OUT), lambda i: (0, 0)),
        ],
        out_specs=pl.BlockSpec((tb, N_OUT), lambda i: (i, 0)),
        scratch_shapes=[pltpu.VMEM((tb, (H + 2) // 2, LANES_1), jnp.bfloat16)],
        compiler_params=pltpu.CompilerParams(
            dimension_semantics=("parallel",)),
    )(x_even, x_odd, packed["w1"], packed["b1"], packed["w2"], packed["b2"],
      packed["wtr"], packed["btr"])


# ---------------------------------------------------------------------------
# Pure-JAX reference (f32) for a correctness check.
# ---------------------------------------------------------------------------
def reference_forward(images_nchw, params):
    hi = jax.lax.Precision.HIGHEST
    x = jnp.transpose(images_nchw, (0, 2, 3, 1))
    k1 = jnp.transpose(params["w_feat"], (2, 3, 1, 0))
    y = jax.lax.conv_general_dilated(
        x, k1, (1, 1), ((1, 1), (1, 1)),
        dimension_numbers=("NHWC", "HWIO", "NHWC"), precision=hi)
    y = jnp.maximum(y + params["b_feat"], 0.0)
    k2 = jnp.transpose(params["w_cnnc"], (2, 3, 1, 0))
    y = jax.lax.conv_general_dilated(
        y, k2, (2, 2), ((1, 1), (1, 1)),
        dimension_numbers=("NHWC", "HWIO", "NHWC"), precision=hi)
    y = jnp.maximum(y + params["b_cnnc"], 0.0)
    y = jnp.transpose(y, (0, 3, 1, 2)).reshape(y.shape[0], -1)   # NCHW flatten
    return jnp.matmul(y, params["w_tr"], precision=hi) + params["b_tr"]


def init_params(key):
    ks = jax.random.split(key, 6)

    def he(k, shape, fan_in):
        return jax.random.normal(k, shape, jnp.float32) * jnp.sqrt(2.0 / fan_in)

    return {
        "w_feat": he(ks[0], (C1, C_IN, 3, 3), C_IN * 9),
        "b_feat": 0.1 * jax.random.normal(ks[1], (C1,), jnp.float32),
        "w_cnnc": he(ks[2], (C2, C1, 3, 3), C1 * 9),
        "b_cnnc": 0.1 * jax.random.normal(ks[3], (C2,), jnp.float32),
        "w_tr": he(ks[4], (C2 * S2 * S2, N_OUT), C2 * S2 * S2),
        "b_tr": 0.1 * jax.random.normal(ks[5], (N_OUT,), jnp.float32),
    }


if __name__ == "__main__":
    key = jax.random.PRNGKey(0)
    kp, kx = jax.random.split(key)
    params = init_params(kp)
    packed = pack_params(params)

    batch = 2
    images = jax.random.normal(kx, (batch, C_IN, H, W), jnp.float32)   # NCHW

    fwd = jax.jit(res_tr_forward)
    out = jax.block_until_ready(fwd(images, packed))
    assert out.shape == (batch, N_OUT), out.shape
    assert bool(jnp.all(jnp.isfinite(out)))

    ref = jax.block_until_ready(reference_forward(images, params))
    err = float(jnp.max(jnp.abs(out - ref)))
    assert err < 0.15, f"max |pallas - reference| = {err}"

    print("KERNEL_OK")
</pallas_src>

<mosaic_0001>
module attributes {stable_mosaic.version = 11 : i64} {
  func.func @_fused_kernel(%arg0: i32, %arg1: memref<2x9x54xbf16, #tpu.memory_space<vmem>>, %arg2: memref<2x9x54xbf16, #tpu.memory_space<vmem>>, %arg3: memref<3x54x512xbf16, #tpu.memory_space<vmem>>, %arg4: memref<1x512xf32, #tpu.memory_space<vmem>>, %arg5: memref<3x512x192xbf16, #tpu.memory_space<vmem>>, %arg6: memref<1x192xf32, #tpu.memory_space<vmem>>, %arg7: memref<8x192x2xbf16, #tpu.memory_space<vmem>>, %arg8: memref<1x2xf32, #tpu.memory_space<vmem>>, %arg9: memref<2x2xf32, #tpu.memory_space<vmem>>, %arg10: memref<2x9x512xbf16, #tpu.memory_space<vmem>>) attributes {dimension_semantics = [#tpu.dimension_semantics<parallel>], iteration_bounds = array<i64: 1>, scalar_prefetch = 0 : i64, scratch_operands = 1 : i64, tpu.core_type = #tpu.core_type<tc>, window_params = [{transform_indices = @transform_0, window_bounds = array<i64: 2, 9, 54>}, {transform_indices = @transform_1, window_bounds = array<i64: 2, 9, 54>}, {pipeline_mode = #tpu.pipeline_mode<synchronous>, transform_indices = @transform_2, window_bounds = array<i64: 3, 54, 512>}, {pipeline_mode = #tpu.pipeline_mode<synchronous>, transform_indices = @transform_3, window_bounds = array<i64: 1, 512>}, {pipeline_mode = #tpu.pipeline_mode<synchronous>, transform_indices = @transform_4, window_bounds = array<i64: 3, 512, 192>}, {pipeline_mode = #tpu.pipeline_mode<synchronous>, transform_indices = @transform_5, window_bounds = array<i64: 1, 192>}, {pipeline_mode = #tpu.pipeline_mode<synchronous>, transform_indices = @transform_6, window_bounds = array<i64: 8, 192, 2>}, {pipeline_mode = #tpu.pipeline_mode<synchronous>, transform_indices = @transform_7, window_bounds = array<i64: 1, 2>}, {transform_indices = @transform_8, window_bounds = array<i64: 2, 2>}]} {
    %c0 = arith.constant 0 : index
    %c0_0 = arith.constant 0 : index
    %c0_1 = arith.constant 0 : index
    %0 = vector.load %arg1[%c0, %c0_0, %c0_1] : memref<2x9x54xbf16, #tpu.memory_space<vmem>>, vector<2x8x54xbf16>
    %1 = vector.shape_cast %0 : vector<2x8x54xbf16> to vector<16x54xbf16>
    %c0_2 = arith.constant 0 : index
    %c1 = arith.constant 1 : index
    %c0_3 = arith.constant 0 : index
    %2 = vector.load %arg1[%c0_2, %c1, %c0_3] : memref<2x9x54xbf16, #tpu.memory_space<vmem>>, vector<2x8x54xbf16>
    %3 = vector.shape_cast %2 : vector<2x8x54xbf16> to vector<16x54xbf16>
    %c0_4 = arith.constant 0 : index
    %c0_5 = arith.constant 0 : index
    %c0_6 = arith.constant 0 : index
    %4 = vector.load %arg2[%c0_4, %c0_5, %c0_6] : memref<2x9x54xbf16, #tpu.memory_space<vmem>>, vector<2x8x54xbf16>
    %5 = vector.shape_cast %4 : vector<2x8x54xbf16> to vector<16x54xbf16>
    %c0_7 = arith.constant 0 : index
    %c1_8 = arith.constant 1 : index
    %c0_9 = arith.constant 0 : index
    %6 = vector.load %arg2[%c0_7, %c1_8, %c0_9] : memref<2x9x54xbf16, #tpu.memory_space<vmem>>, vector<2x8x54xbf16>
    %7 = vector.shape_cast %6 : vector<2x8x54xbf16> to vector<16x54xbf16>
    %c0_10 = arith.constant 0 : index
    %c0_11 = arith.constant 0 : index
    %8 = vector.load %arg4[%c0_10, %c0_11] : memref<1x512xf32, #tpu.memory_space<vmem>>, vector<1x512xf32>
    %c0_12 = arith.constant 0 : index
    %c0_13 = arith.constant 0 : index
    %c0_14 = arith.constant 0 : index
    %9 = vector.load %arg3[%c0_12, %c0_13, %c0_14] : memref<3x54x512xbf16, #tpu.memory_space<vmem>>, vector<1x54x512xbf16>
    %10 = vector.shape_cast %9 : vector<1x54x512xbf16> to vector<54x512xbf16>
    %cst = arith.constant dense<0.000000e+00> : vector<16x512xf32>
    %11 = tpu.matmul %1, %10, %cst {dimension_numbers = #tpu.dot_dimension_numbers<[1], [0], [0], [1], [0, 0, 1, 1], [], []>} : vector<16x54xbf16>, vector<54x512xbf16>, vector<16x512xf32> -> vector<16x512xf32>
    %c1_15 = arith.constant 1 : index
    %c0_16 = arith.constant 0 : index
    %c0_17 = arith.constant 0 : index
    %12 = vector.load %arg3[%c1_15, %c0_16, %c0_17] : memref<3x54x512xbf16, #tpu.memory_space<vmem>>, vector<1x54x512xbf16>
    %13 = vector.shape_cast %12 : vector<1x54x512xbf16> to vector<54x512xbf16>
    %cst_18 = arith.constant dense<0.000000e+00> : vector<16x512xf32>
    %14 = tpu.matmul %5, %13, %cst_18 {dimension_numbers = #tpu.dot_dimension_numbers<[1], [0], [0], [1], [0, 0, 1, 1], [], []>} : vector<16x54xbf16>, vector<54x512xbf16>, vector<16x512xf32> -> vector<16x512xf32>
    %15 = arith.addf %11, %14 : vector<16x512xf32>
    %c2 = arith.constant 2 : index
    %c0_19 = arith.constant 0 : index
    %c0_20 = arith.constant 0 : index
    %16 = vector.load %arg3[%c2, %c0_19, %c0_20] : memref<3x54x512xbf16, #tpu.memory_space<vmem>>, vector<1x54x512xbf16>
    %17 = vector.shape_cast %16 : vector<1x54x512xbf16> to vector<54x512xbf16>
    %cst_21 = arith.constant dense<0.000000e+00> : vector<16x512xf32>
    %18 = tpu.matmul %3, %17, %cst_21 {dimension_numbers = #tpu.dot_dimension_numbers<[1], [0], [0], [1], [0, 0, 1, 1], [], []>} : vector<16x54xbf16>, vector<54x512xbf16>, vector<16x512xf32> -> vector<16x512xf32>
    %19 = arith.addf %15, %18 : vector<16x512xf32>
    %20 = vector.broadcast %8 : vector<1x512xf32> to vector<16x512xf32>
    %21 = arith.addf %19, %20 : vector<16x512xf32>
    %cst_22 = arith.constant 0.000000e+00 : f32
    %22 = vector.broadcast %cst_22 : f32 to vector<16x512xf32>
    %23 = arith.maximumf %21, %22 : vector<16x512xf32>
    %c0_23 = arith.constant 0 : index
    %c0_24 = arith.constant 0 : index
    %c0_25 = arith.constant 0 : index
    %24 = vector.load %arg3[%c0_23, %c0_24, %c0_25] : memref<3x54x512xbf16, #tpu.memory_space<vmem>>, vector<1x54x512xbf16>
    %25 = vector.shape_cast %24 : vector<1x54x512xbf16> to vector<54x512xbf16>
    %cst_26 = arith.constant dense<0.000000e+00> : vector<16x512xf32>
    %26 = tpu.matmul %5, %25, %cst_26 {dimension_numbers = #tpu.dot_dimension_numbers<[1], [0], [0], [1], [0, 0, 1, 1], [], []>} : vector<16x54xbf16>, vector<54x512xbf16>, vector<16x512xf32> -> vector<16x512xf32>
    %c1_27 = arith.constant 1 : index
    %c0_28 = arith.constant 0 : index
    %c0_29 = arith.constant 0 : index
    %27 = vector.load %arg3[%c1_27, %c0_28, %c0_29] : memref<3x54x512xbf16, #tpu.memory_space<vmem>>, vector<1x54x512xbf16>
    %28 = vector.shape_cast %27 : vector<1x54x512xbf16> to vector<54x512xbf16>
    %cst_30 = arith.constant dense<0.000000e+00> : vector<16x512xf32>
    %29 = tpu.matmul %3, %28, %cst_30 {dimension_numbers = #tpu.dot_dimension_numbers<[1], [0], [0], [1], [0, 0, 1, 1], [], []>} : vector<16x54xbf16>, vector<54x512xbf16>, vector<16x512xf32> -> vector<16x512xf32>
    %30 = arith.addf %26, %29 : vector<16x512xf32>
    %c2_31 = arith.constant 2 : index
    %c0_32 = arith.constant 0 : index
    %c0_33 = arith.constant 0 : index
    %31 = vector.load %arg3[%c2_31, %c0_32, %c0_33] : memref<3x54x512xbf16, #tpu.memory_space<vmem>>, vector<1x54x512xbf16>
    %32 = vector.shape_cast %31 : vector<1x54x512xbf16> to vector<54x512xbf16>
    %cst_34 = arith.constant dense<0.000000e+00> : vector<16x512xf32>
    %33 = tpu.matmul %7, %32, %cst_34 {dimension_numbers = #tpu.dot_dimension_numbers<[1], [0], [0], [1], [0, 0, 1, 1], [], []>} : vector<16x54xbf16>, vector<54x512xbf16>, vector<16x512xf32> -> vector<16x512xf32>
    %34 = arith.addf %30, %33 : vector<16x512xf32>
    %35 = vector.broadcast %8 : vector<1x512xf32> to vector<16x512xf32>
    %36 = arith.addf %34, %35 : vector<16x512xf32>
    %cst_35 = arith.constant 0.000000e+00 : f32
    %37 = vector.broadcast %cst_35 : f32 to vector<16x512xf32>
    %38 = arith.maximumf %36, %37 : vector<16x512xf32>
    %cst_36 = arith.constant 0.000000e+00 : bf16
    %39 = vector.broadcast %cst_36 : bf16 to vector<2x1x512xbf16>
    %c0_37 = arith.constant 0 : index
    %c0_38 = arith.constant 0 : index
    %c0_39 = arith.constant 0 : index
    %40 = vector.load %arg10[%c0_37, %c0_38, %c0_39] : memref<2x9x512xbf16, #tpu.memory_space<vmem>>, vector<2x1x512xbf16>
    tpu.vector_store %arg10[%c0_37, %c0_38, %c0_39], %39 {strides = array<i32>} : memref<2x9x512xbf16, #tpu.memory_space<vmem>>, vector<2x1x512xbf16>,
    %41 = vector.shape_cast %38 : vector<16x512xf32> to vector<2x8x512xf32>
    %42 = arith.truncf %41 : vector<2x8x512xf32> to vector<2x8x512xbf16>
    %c0_40 = arith.constant 0 : index
    %c1_41 = arith.constant 1 : index
    %c0_42 = arith.constant 0 : index
    %43 = vector.load %arg10[%c0_40, %c1_41, %c0_42] : memref<2x9x512xbf16, #tpu.memory_space<vmem>>, vector<2x8x512xbf16>
    tpu.vector_store %arg10[%c0_40, %c1_41, %c0_42], %42 {strides = array<i32>} : memref<2x9x512xbf16, #tpu.memory_space<vmem>>, vector<2x8x512xbf16>,
    %44 = arith.truncf %23 : vector<16x512xf32> to vector<16x512xbf16>
    %c0_43 = arith.constant 0 : index
    %c0_44 = arith.constant 0 : index
    %c0_45 = arith.constant 0 : index
    %45 = vector.load %arg10[%c0_43, %c0_44, %c0_45] : memref<2x9x512xbf16, #tpu.memory_space<vmem>>, vector<2x8x512xbf16>
    %46 = vector.shape_cast %45 : vector<2x8x512xbf16> to vector<16x512xbf16>
    %c0_46 = arith.constant 0 : index
    %c1_47 = arith.constant 1 : index
    %c0_48 = arith.constant 0 : index
    %47 = vector.load %arg10[%c0_46, %c1_47, %c0_48] : memref<2x9x512xbf16, #tpu.memory_space<vmem>>, vector<2x8x512xbf16>
    %48 = vector.shape_cast %47 : vector<2x8x512xbf16> to vector<16x512xbf16>
    %c0_49 = arith.constant 0 : index
    %c0_50 = arith.constant 0 : index
    %49 = vector.load %arg6[%c0_49, %c0_50] : memref<1x192xf32, #tpu.memory_space<vmem>>, vector<1x192xf32>
    %c0_51 = arith.constant 0 : index
    %c0_52 = arith.constant 0 : index
    %c0_53 = arith.constant 0 : index
    %50 = vector.load %arg5[%c0_51, %c0_52, %c0_53] : memref<3x512x192xbf16, #tpu.memory_space<vmem>>, vector<1x512x192xbf16>
    %51 = vector.shape_cast %50 : vector<1x512x192xbf16> to vector<512x192xbf16>
    %cst_54 = arith.constant dense<0.000000e+00> : vector<16x192xf32>
    %52 = tpu.matmul %46, %51, %cst_54 {dimension_numbers = #tpu.dot_dimension_numbers<[1], [0], [0], [1], [0, 0, 1, 1], [], []>} : vector<16x512xbf16>, vector<512x192xbf16>, vector<16x192xf32> -> vector<16x192xf32>
    %c1_55 = arith.constant 1 : index
    %c0_56 = arith.constant 0 : index
    %c0_57 = arith.constant 0 : index
    %53 = vector.load %arg5[%c1_55, %c0_56, %c0_57] : memref<3x512x192xbf16, #tpu.memory_space<vmem>>, vector<1x512x192xbf16>
    %54 = vector.shape_cast %53 : vector<1x512x192xbf16> to vector<512x192xbf16>
    %cst_58 = arith.constant dense<0.000000e+00> : vector<16x192xf32>
    %55 = tpu.matmul %44, %54, %cst_58 {dimension_numbers = #tpu.dot_dimension_numbers<[1], [0], [0], [1], [0, 0, 1, 1], [], []>} : vector<16x512xbf16>, vector<512x192xbf16>, vector<16x192xf32> -> vector<16x192xf32>
    %56 = arith.addf %52, %55 : vector<16x192xf32>
    %c2_59 = arith.constant 2 : index
    %c0_60 = arith.constant 0 : index
    %c0_61 = arith.constant 0 : index
    %57 = vector.load %arg5[%c2_59, %c0_60, %c0_61] : memref<3x512x192xbf16, #tpu.memory_space<vmem>>, vector<1x512x192xbf16>
    %58 = vector.shape_cast %57 : vector<1x512x192xbf16> to vector<512x192xbf16>
    %cst_62 = arith.constant dense<0.000000e+00> : vector<16x192xf32>
    %59 = tpu.matmul %48, %58, %cst_62 {dimension_numbers = #tpu.dot_dimension_numbers<[1], [0], [0], [1], [0, 0, 1, 1], [], []>} : vector<16x512xbf16>, vector<512x192xbf16>, vector<16x192xf32> -> vector<16x192xf32>
    %60 = arith.addf %56, %59 : vector<16x192xf32>
    %61 = vector.broadcast %49 : vector<1x192xf32> to vector<16x192xf32>
    %62 = arith.addf %60, %61 : vector<16x192xf32>
    %cst_63 = arith.constant 0.000000e+00 : f32
    %63 = vector.broadcast %cst_63 : f32 to vector<16x192xf32>
    %64 = arith.maximumf %62, %63 : vector<16x192xf32>
    %65 = arith.truncf %64 : vector<16x192xf32> to vector<16x192xbf16>
    %66 = vector.shape_cast %65 : vector<16x192xbf16> to vector<2x8x192xbf16>
    %67 = vector.extract_strided_slice %66 {offsets = [0, 0, 0], sizes = [2, 1, 192], strides = [1, 1, 1]} : vector<2x8x192xbf16> to vector<2x1x192xbf16>
    %68 = vector.shape_cast %67 : vector<2x1x192xbf16> to vector<2x192xbf16>
    %c0_64 = arith.constant 0 : index
    %c0_65 = arith.constant 0 : index
    %c0_66 = arith.constant 0 : index
    %69 = vector.load %arg7[%c0_64, %c0_65, %c0_66] : memref<8x192x2xbf16, #tpu.memory_space<vmem>>, vector<1x192x2xbf16>
    %70 = vector.shape_cast %69 : vector<1x192x2xbf16> to vector<192x2xbf16>
    %cst_67 = arith.constant dense<0.000000e+00> : vector<2x2xf32>
    %71 = tpu.matmul %68, %70, %cst_67 {dimension_numbers = #tpu.dot_dimension_numbers<[1], [0], [0], [1], [0, 0, 1, 1], [], []>} : vector<2x192xbf16>, vector<192x2xbf16>, vector<2x2xf32> -> vector<2x2xf32>
    %72 = vector.extract_strided_slice %66 {offsets = [0, 1, 0], sizes = [2, 1, 192], strides = [1, 1, 1]} : vector<2x8x192xbf16> to vector<2x1x192xbf16>
    %73 = vector.shape_cast %72 : vector<2x1x192xbf16> to vector<2x192xbf16>
    %c1_68 = arith.constant 1 : index
    %c0_69 = arith.constant 0 : index
    %c0_70 = arith.constant 0 : index
    %74 = vector.load %arg7[%c1_68, %c0_69, %c0_70] : memref<8x192x2xbf16, #tpu.memory_space<vmem>>, vector<1x192x2xbf16>
    %75 = vector.shape_cast %74 : vector<1x192x2xbf16> to vector<192x2xbf16>
    %cst_71 = arith.constant dense<0.000000e+00> : vector<2x2xf32>
    %76 = tpu.matmul %73, %75, %cst_71 {dimension_numbers = #tpu.dot_dimension_numbers<[1], [0], [0], [1], [0, 0, 1, 1], [], []>} : vector<2x192xbf16>, vector<192x2xbf16>, vector<2x2xf32> -> vector<2x2xf32>
    %77 = arith.addf %71, %76 : vector<2x2xf32>
    %78 = vector.extract_strided_slice %66 {offsets = [0, 2, 0], sizes = [2, 1, 192], strides = [1, 1, 1]} : vector<2x8x192xbf16> to vector<2x1x192xbf16>
    %79 = vector.shape_cast %78 : vector<2x1x192xbf16> to vector<2x192xbf16>
    %c2_72 = arith.constant 2 : index
    %c0_73 = arith.constant 0 : index
    %c0_74 = arith.constant 0 : index
    %80 = vector.load %arg7[%c2_72, %c0_73, %c0_74] : memref<8x192x2xbf16, #tpu.memory_space<vmem>>, vector<1x192x2xbf16>
    %81 = vector.shape_cast %80 : vector<1x192x2xbf16> to vector<192x2xbf16>
    %cst_75 = arith.constant dense<0.000000e+00> : vector<2x2xf32>
    %82 = tpu.matmul %79, %81, %cst_75 {dimension_numbers = #tpu.dot_dimension_numbers<[1], [0], [0], [1], [0, 0, 1, 1], [], []>} : vector<2x192xbf16>, vector<192x2xbf16>, vector<2x2xf32> -> vector<2x2xf32>
    %83 = arith.addf %77, %82 : vector<2x2xf32>
    %84 = vector.extract_strided_slice %66 {offsets = [0, 3, 0], sizes = [2, 1, 192], strides = [1, 1, 1]} : vector<2x8x192xbf16> to vector<2x1x192xbf16>
    %85 = vector.shape_cast %84 : vector<2x1x192xbf16> to vector<2x192xbf16>
    %c3 = arith.constant 3 : index
    %c0_76 = arith.constant 0 : index
    %c0_77 = arith.constant 0 : index
    %86 = vector.load %arg7[%c3, %c0_76, %c0_77] : memref<8x192x2xbf16, #tpu.memory_space<vmem>>, vector<1x192x2xbf16>
    %87 = vector.shape_cast %86 : vector<1x192x2xbf16> to vector<192x2xbf16>
    %cst_78 = arith.constant dense<0.000000e+00> : vector<2x2xf32>
    %88 = tpu.matmul %85, %87, %cst_78 {dimension_numbers = #tpu.dot_dimension_numbers<[1], [0], [0], [1], [0, 0, 1, 1], [], []>} : vector<2x192xbf16>, vector<192x2xbf16>, vector<2x2xf32> -> vector<2x2xf32>
    %89 = arith.addf %83, %88 : vector<2x2xf32>
    %90 = vector.extract_strided_slice %66 {offsets = [0, 4, 0], sizes = [2, 1, 192], strides = [1, 1, 1]} : vector<2x8x192xbf16> to vector<2x1x192xbf16>
    %91 = vector.shape_cast %90 : vector<2x1x192xbf16> to vector<2x192xbf16>
    %c4 = arith.constant 4 : index
    %c0_79 = arith.constant 0 : index
    %c0_80 = arith.constant 0 : index
    %92 = vector.load %arg7[%c4, %c0_79, %c0_80] : memref<8x192x2xbf16, #tpu.memory_space<vmem>>, vector<1x192x2xbf16>
    %93 = vector.shape_cast %92 : vector<1x192x2xbf16> to vector<192x2xbf16>
    %cst_81 = arith.constant dense<0.000000e+00> : vector<2x2xf32>
    %94 = tpu.matmul %91, %93, %cst_81 {dimension_numbers = #tpu.dot_dimension_numbers<[1], [0], [0], [1], [0, 0, 1, 1], [], []>} : vector<2x192xbf16>, vector<192x2xbf16>, vector<2x2xf32> -> vector<2x2xf32>
    %95 = arith.addf %89, %94 : vector<2x2xf32>
    %96 = vector.extract_strided_slice %66 {offsets = [0, 5, 0], sizes = [2, 1, 192], strides = [1, 1, 1]} : vector<2x8x192xbf16> to vector<2x1x192xbf16>
    %97 = vector.shape_cast %96 : vector<2x1x192xbf16> to vector<2x192xbf16>
    %c5 = arith.constant 5 : index
    %c0_82 = arith.constant 0 : index
    %c0_83 = arith.constant 0 : index
    %98 = vector.load %arg7[%c5, %c0_82, %c0_83] : memref<8x192x2xbf16, #tpu.memory_space<vmem>>, vector<1x192x2xbf16>
    %99 = vector.shape_cast %98 : vector<1x192x2xbf16> to vector<192x2xbf16>
    %cst_84 = arith.constant dense<0.000000e+00> : vector<2x2xf32>
    %100 = tpu.matmul %97, %99, %cst_84 {dimension_numbers = #tpu.dot_dimension_numbers<[1], [0], [0], [1], [0, 0, 1, 1], [], []>} : vector<2x192xbf16>, vector<192x2xbf16>, vector<2x2xf32> -> vector<2x2xf32>
    %101 = arith.addf %95, %100 : vector<2x2xf32>
    %102 = vector.extract_strided_slice %66 {offsets = [0, 6, 0], sizes = [2, 1, 192], strides = [1, 1, 1]} : vector<2x8x192xbf16> to vector<2x1x192xbf16>
    %103 = vector.shape_cast %102 : vector<2x1x192xbf16> to vector<2x192xbf16>
    %c6 = arith.constant 6 : index
    %c0_85 = arith.constant 0 : index
    %c0_86 = arith.constant 0 : index
    %104 = vector.load %arg7[%c6, %c0_85, %c0_86] : memref<8x192x2xbf16, #tpu.memory_space<vmem>>, vector<1x192x2xbf16>
    %105 = vector.shape_cast %104 : vector<1x192x2xbf16> to vector<192x2xbf16>
    %cst_87 = arith.constant dense<0.000000e+00> : vector<2x2xf32>
    %106 = tpu.matmul %103, %105, %cst_87 {dimension_numbers = #tpu.dot_dimension_numbers<[1], [0], [0], [1], [0, 0, 1, 1], [], []>} : vector<2x192xbf16>, vector<192x2xbf16>, vector<2x2xf32> -> vector<2x2xf32>
    %107 = arith.addf %101, %106 : vector<2x2xf32>
    %108 = vector.extract_strided_slice %66 {offsets = [0, 7, 0], sizes = [2, 1, 192], strides = [1, 1, 1]} : vector<2x8x192xbf16> to vector<2x1x192xbf16>
    %109 = vector.shape_cast %108 : vector<2x1x192xbf16> to vector<2x192xbf16>
    %c7 = arith.constant 7 : index
    %c0_88 = arith.constant 0 : index
    %c0_89 = arith.constant 0 : index
    %110 = vector.load %arg7[%c7, %c0_88, %c0_89] : memref<8x192x2xbf16, #tpu.memory_space<vmem>>, vector<1x192x2xbf16>
    %111 = vector.shape_cast %110 : vector<1x192x2xbf16> to vector<192x2xbf16>
    %cst_90 = arith.constant dense<0.000000e+00> : vector<2x2xf32>
    %112 = tpu.matmul %109, %111, %cst_90 {dimension_numbers = #tpu.dot_dimension_numbers<[1], [0], [0], [1], [0, 0, 1, 1], [], []>} : vector<2x192xbf16>, vector<192x2xbf16>, vector<2x2xf32> -> vector<2x2xf32>
    %113 = arith.addf %107, %112 : vector<2x2xf32>
    %c0_91 = arith.constant 0 : index
    %c0_92 = arith.constant 0 : index
    %114 = vector.load %arg8[%c0_91, %c0_92] : memref<1x2xf32, #tpu.memory_space<vmem>>, vector<1x2xf32>
    %115 = vector.broadcast %114 : vector<1x2xf32> to vector<2x2xf32>
    %116 = arith.addf %113, %115 : vector<2x2xf32>
    %c0_93 = arith.constant 0 : index
    %c0_94 = arith.constant 0 : index
    %117 = vector.load %arg9[%c0_93, %c0_94] : memref<2x2xf32, #tpu.memory_space<vmem>>, vector<2x2xf32>
    tpu.vector_store %arg9[%c0_93, %c0_94], %116 {strides = array<i32>} : memref<2x2xf32, #tpu.memory_space<vmem>>, vector<2x2xf32>,
    return
  }
  func.func @transform_0(%arg0: i32) -> (i32, i32, i32) {
    %c0_i32 = arith.constant 0 : i32
    %c0_i32_0 = arith.constant 0 : i32
    %c0_i32_1 = arith.constant 0 : i32
    return %arg0, %c0_i32, %c0_i32_0 : i32, i32, i32
  }
  func.func @transform_1(%arg0: i32) -> (i32, i32, i32) {
    %c0_i32 = arith.constant 0 : i32
    %c0_i32_0 = arith.constant 0 : i32
    %c0_i32_1 = arith.constant 0 : i32
    return %arg0, %c0_i32, %c0_i32_0 : i32, i32, i32
  }
  func.func @transform_2(%arg0: i32) -> (i32, i32, i32) {
    %c0_i32 = arith.constant 0 : i32
    %c0_i32_0 = arith.constant 0 : i32
    %c0_i32_1 = arith.constant 0 : i32
    %c0_i32_2 = arith.constant 0 : i32
    return %c0_i32, %c0_i32_0, %c0_i32_1 : i32, i32, i32
  }
  func.func @transform_3(%arg0: i32) -> (i32, i32) {
    %c0_i32 = arith.constant 0 : i32
    %c0_i32_0 = arith.constant 0 : i32
    %c0_i32_1 = arith.constant 0 : i32
    return %c0_i32, %c0_i32_0 : i32, i32
  }
  func.func @transform_4(%arg0: i32) -> (i32, i32, i32) {
    %c0_i32 = arith.constant 0 : i32
    %c0_i32_0 = arith.constant 0 : i32
    %c0_i32_1 = arith.constant 0 : i32
    %c0_i32_2 = arith.constant 0 : i32
    return %c0_i32, %c0_i32_0, %c0_i32_1 : i32, i32, i32
  }
  func.func @transform_5(%arg0: i32) -> (i32, i32) {
    %c0_i32 = arith.constant 0 : i32
    %c0_i32_0 = arith.constant 0 : i32
    %c0_i32_1 = arith.constant 0 : i32
    return %c0_i32, %c0_i32_0 : i32, i32
  }
  func.func @transform_6(%arg0: i32) -> (i32, i32, i32) {
    %c0_i32 = arith.constant 0 : i32
    %c0_i32_0 = arith.constant 0 : i32
    %c0_i32_1 = arith.constant 0 : i32
    %c0_i32_2 = arith.constant 0 : i32
    return %c0_i32, %c0_i32_0, %c0_i32_1 : i32, i32, i32
  }
  func.func @transform_7(%arg0: i32) -> (i32, i32) {
    %c0_i32 = arith.constant 0 : i32
    %c0_i32_0 = arith.constant 0 : i32
    %c0_i32_1 = arith.constant 0 : i32
    return %c0_i32, %c0_i32_0 : i32, i32
  }
  func.func @transform_8(%arg0: i32) -> (i32, i32) {
    %c0_i32 = arith.constant 0 : i32
    %c0_i32_0 = arith.constant 0 : i32
    return %arg0, %c0_i32 : i32, i32
  }
}

</mosaic_0001>

<bundles_post_ra>
// kernel: res_tr_forward.1
= control target key start
LH: loop header
LB: loop body
LE: loop exit
PB: predicated region body
PF: predicated region fallthrough
CT: control target
= control target key end

     0   :  { %vm207_vm0 = vcmask 1042432   ;;  %vm203_vm1 = vcmask 441344   ;;  %vm35_vm2 = vsmask.f32 3328  ;;  %vm36_vm3 = vsmask.f32 7440  ;;  %s8153_s0 = inlined_call_operand.vmem [shape: bf16[2,9,54], index: 0, kind: input, shape index: {}]   ;;  %s8154_s1 = inlined_call_operand.vmem [shape: bf16[2,9,54], index: 1, kind: input, shape index: {}]   ;;  %s8155_s2 = inlined_call_operand.vmem [shape: bf16[3,54,512], index: 2, kind: input, shape index: {}]   ;;  %s8156_s3 = inlined_call_operand.vmem [shape: f32[1,512], index: 3, kind: input, shape index: {}]   ;;  %s8157_s4 = inlined_call_operand.vmem [shape: bf16[3,512,192], index: 4, kind: input, shape index: {}]   ;;  %s8158_s5 = inlined_call_operand.vmem [shape: f32[1,192], index: 5, kind: input, shape index: {}]   ;;  %s8159_s6 = inlined_call_operand.vmem [shape: bf16[8,192,2], index: 6, kind: input, shape index: {}]   ;;  %s8160_s7 = inlined_call_operand.vmem [shape: f32[1,2], index: 7, kind: input, shape index: {}]   ;;  %s8161_s8 = inlined_call_operand.hbm [shape: f32[2,2], index: 8, kind: output, shape index: {}]  }
   0x1   :  { %v3652_v0 = vld [vmem:[%s8155_s2 + $0xd0] sm:$0x77]  ;;  %v3653_v1 = vld [vmem:[%s8155_s2 + $0xd8] sm:$0x77]  ;;  %v111_v5 = vld [vmem:[%s8155_s2 + $0x60] sm:$0x77] }
   0x2   :  { %v171_v2 = vunpack.c.l.b16 %v3652_v0  ;;  %v172_v3 = vunpack.c.h.b16 %v3652_v0  ;;  %v173_v4 = vunpack.c.l.b16 %v3653_v1  ;;  %v319_v6 = vunpack.c.l.b16 %v111_v5  ;;  %v3692_v7 = vld [vmem:[%s8155_s2 + $0xb0] sm:$0xf]  ;;  %v5344_v8 = vld [vmem:[%s8155_s2 + $0xbc] sm:$0xf0]  ;;  %v5342_v12 = vld [vmem:[%s8155_s2 + $0xb4] sm:$0xf] }
   0x3   :  { %v3694_v13 = vld [vmem:[%s8155_s2 + $0xc0] sm:$0xf0]  ;;  %v3700_v14 = vld [vmem:[%s8155_s2 + $0xb8] sm:$0xf]  ;;  %v5345_v16 = vld [vmem:[%s8155_s2 + $0xc4] sm:$0xf0]  ;;  %v5771_v23 = vor.u32 %v5344_v8, %v3692_v7  ;;  %v174_v35 = vunpack.c.h.b16 %v3653_v1  ;;  %v320_v36 = vunpack.c.h.b16 %v111_v5 }
   0x4   :  { %v187_v9 = vpack.c.b16 %v171_v2, %v171_v2  ;;  %v188_v10 = vpack.c.b16 %v172_v3, %v172_v3  ;;  %v189_v11 = vpack.c.b16 %v173_v4, %v173_v4  ;;  %v335_v15 = vpack.c.b16 %v319_v6, %v319_v6  ;;  %v3748_v17 = vld [vmem:[%s8155_s2 + $0x40] sm:$0xf]  ;;  %v5332_v18 = vld [vmem:[%s8155_s2 + $0x4c] sm:$0xf0]  ;;  %v5338_v29 = vld [vmem:[%s8155_s2 + $0x94] sm:$0xf] }
   0x5   :  { %v5773_v24 = vor.u32 %v5342_v12, %v3694_v13  ;;  %v3676_v25 = vld [vmem:[%s8155_s2 + $0x90] sm:$0xf]  ;;  %v5340_v26 = vld [vmem:[%s8155_s2 + $0x9c] sm:$0xf0]  ;;  %v5783_v27 = vor.u32 %v5345_v16, %v3700_v14  ;;  %v5785_v28 = vor.u32 %v5332_v18, %v3748_v17  ;;  %v3678_v30 = vld [vmem:[%s8155_s2 + $0xa0] sm:$0xf0]  ;;  %v190_v49 = vpack.c.b16 %v174_v35, %v174_v35 }
   0x6   :  { %v5758_v19 = vsel %vm207_vm0, %v187_v9, 0  ;;  %v5761_v20 = vsel %vm207_vm0, %v188_v10, 0  ;;  %v5764_v21 = vsel %vm207_vm0, %v189_v11, 0  ;;  %v5769_v22 = vsel %vm207_vm0, %v335_v15, 0  ;;  %v3684_v31 = vld [vmem:[%s8155_s2 + $0x98] sm:$0xf]  ;;  %vm6029_vm4 = vmor %vm35_vm2, %vm36_vm3 }
   0x7   :  { %224 = vmatpush.bf16.msra.mxu3 %v5758_v19  ;;  %238 = vmatpush.bf16.msra.mxu1 %v5761_v20  ;;  %v5341_v32 = vld [vmem:[%s8155_s2 + $0xa4] sm:$0xf0]  ;;  %v3732_v33 = vld [vmem:[%s8155_s2 + $0x20] sm:$0xf]  ;;  %v5328_v34 = vld [vmem:[%s8155_s2 + $0x2c] sm:$0xf0]  ;;  %v5810_v38 = vor.u32 %v5340_v26, %v3676_v25  ;;  %v5812_v39 = vor.u32 %v5338_v29, %v3678_v30  ;;  %v336_v50 = vpack.c.b16 %v320_v36, %v320_v36 }
   0x8   :  { %252 = vmatpush.bf16.msra.mxu2 %v5764_v21  ;;  %370 = vmatpush.bf16.msra.mxu0 %v5769_v22  ;;  %v3660_v37 = vld [vmem:[%s8155_s2 + $0x70] sm:$0xf]  ;;  %v5336_v40 = vld [vmem:[%s8155_s2 + $0x7c] sm:$0xf0]  ;;  %v5334_v41 = vld [vmem:[%s8155_s2 + $0x74] sm:$0xf]  ;;  %v5825_v43 = vor.u32 %v5341_v32, %v3684_v31  ;;  %v5827_v44 = vor.u32 %v5328_v34, %v3732_v33 }
   0x9   :  { %v3662_v42 = vld [vmem:[%s8155_s2 + $0x80] sm:$0xf0]  ;;  %v3668_v45 = vld [vmem:[%s8155_s2 + $0x78] sm:$0xf]  ;;  %v5337_v46 = vld [vmem:[%s8155_s2 + $0x84] sm:$0xf0]  ;;  %v5855_v55 = vor.u32 %v5336_v40, %v3660_v37 }
   0xa   :  { %v3716_v47 = vld [vmem:[%s8155_s2] sm:$0xf]  ;;  %v5324_v48 = vld [vmem:[%s8155_s2 + $0xc] sm:$0xf0]  ;;  %v5844_v51 = vld [vmem:[%s8155_s2 + $0x68] sm:$0x77]  ;;  %v5857_v56 = vor.u32 %v5334_v41, %v3662_v42  ;;  %v5867_v59 = vor.u32 %v5337_v46, %v3668_v45 }
   0xb   :  { %225 = vmatpush.bf16.msra.mxu3 %v5771_v23  ;;  %239 = vmatpush.bf16.msra.mxu1 %v5773_v24  ;;  %v5849_v52 = vld [vmem:[%s8155_s2 + $0x140] sm:$0x77]  ;;  %v321_v53 = vunpack.c.l.b16 %v5844_v51  ;;  %v5321_v58 = vld [vmem:[%s8154_s1 + $0x4] sm:$0xf0]  ;;  %v5869_v60 = vor.u32 %v5324_v48, %v3716_v47  ;;  %v5878_v63 = vsel %vm207_vm0, %v190_v49, 0  ;;  %v5881_v0 = vsel %vm207_vm0, %v336_v50, 0 }
   0xc   :  { %253 = vmatpush.bf16.msra.mxu2 %v5783_v27  ;;  %371 = vmatpush.bf16.msra.mxu0 %v5785_v28  ;;  %v478_v54 = vunpack.c.l.b16 %v5849_v52  ;;  %v3656_v57 = vld [vmem:[%s8154_s1] sm:$0xf]  ;;  %v5320_v62 = vld [vmem:[%s8153_s0 + $0x4] sm:$0xf0]  ;;  %v5343_v3 = vld [vmem:[%s8155_s2 + $0xbc] sm:$0xf]  ;;  %v322_v29 = vunpack.c.h.b16 %v5844_v51  ;;  %v479_v33 = vunpack.c.h.b16 %v5849_v52 }
   0xd   :  { %v3712_v61 = vld [vmem:[%s8153_s0] sm:$0xf]  ;;  %v337_v1 = vpack.c.b16 %v321_v53, %v321_v53  ;;  %v5886_v4 = vor.u32 %v5321_v58, %v3656_v57  ;;  %v3702_v5 = vld [vmem:[%s8155_s2 + $0xc8] sm:$0xf0]  ;;  %v5330_v6 = vld [vmem:[%s8155_s2 + $0x44] sm:$0xf] }
   0xe   :  { %v494_v2 = vpack.c.b16 %v478_v54, %v478_v54  ;;  %v3750_v7 = vld [vmem:[%s8155_s2 + $0x50] sm:$0xf0]  ;;  %v5899_v8 = vor.u32 %v5320_v62, %v3712_v61  ;;  %v3756_v9 = vld [vmem:[%s8155_s2 + $0x48] sm:$0xf]  ;;  %v5333_v10 = vld [vmem:[%s8155_s2 + $0x54] sm:$0xf0]  ;;  %v5929_v17 = vor.u32 %v5343_v3, %v3702_v5  ;;  %v338_v5 = vpack.c.b16 %v322_v29, %v322_v29 }
   0xf   :  { %226 = vmatpush.bf16.msra.mxu3 %v5810_v38  ;;  %240 = vmatpush.bf16.msra.mxu1 %v5812_v39  ;;  %v3814_v11 = vld [vmem:[%s8155_s2 + $0x120] sm:$0xf]  ;;  %v5356_v12 = vld [vmem:[%s8155_s2 + $0x12c] sm:$0xf0]  ;;  %v5339_v13 = vld [vmem:[%s8155_s2 + $0x9c] sm:$0xf]  ;;  %v5931_v18 = vor.u32 %v5330_v6, %v3750_v7  ;;  %v5958_v34 = vor.u32 %v5333_v10, %v3756_v9  ;;  %v495_v6 = vpack.c.b16 %v479_v33, %v479_v33 }
  0x10   :  { %254 = vmatpush.bf16.msra.mxu2 %v5825_v43  ;;  %372 = vmatpush.bf16.msra.mxu0 %v5827_v44  ;;  %v3686_v14 = vld [vmem:[%s8155_s2 + $0xa8] sm:$0xf0]  ;;  %v5924_v15 = vsel %vm207_vm0, %v337_v1, 0  ;;  %v5927_v16 = vsel %vm207_vm0, %v494_v2, 0  ;;  %v5326_v25 = vld [vmem:[%s8155_s2 + $0x24] sm:$0xf]  ;;  %v5960_v35 = vor.u32 %v5356_v12, %v3814_v11 }
  0x11   :  { %v3734_v26 = vld [vmem:[%s8155_s2 + $0x30] sm:$0xf0]  ;;  %v31_v30 = vld [vmem:[%s8153_s0] sm:$0xf]  ;;  %v32_v31 = vld [vmem:[%s8153_s0 + $0x8] sm:$0xf]  ;;  %v5962_v36 = vor.u32 %v5339_v13, %v3686_v14 }
  0x12   :  { %v33_v32 = vld [vmem:[%s8153_s0 + $0x4] sm:$0x1]  ;;  %v3740_v37 = vld [vmem:[%s8155_s2 + $0x28] sm:$0xf]  ;;  %v5329_v40 = vld [vmem:[%s8155_s2 + $0x34] sm:$0xf0]  ;;  %v5997_v54 = vor.u32 %v5326_v25, %v3734_v26 }
  0x13   :  { %227 = vmatpush.bf16.msra.mxu3 %v5855_v55  ;;  %241 = vmatpush.bf16.msra.mxu1 %v5857_v56  ;;  %v3798_v41 = vld [vmem:[%s8155_s2 + $0x100] sm:$0xf]  ;;  %v5352_v42 = vld [vmem:[%s8155_s2 + $0x10c] sm:$0xf0]  ;;  %v34_v45 = vld [vmem:[%s8153_s0 + $0xc] sm:$0x1]  ;;  %v6005_v9 = vor.u32 %v5329_v40, %v3740_v37 }
  0x14   :  { %255 = vmatpush.bf16.msra.mxu2 %v5867_v59  ;;  %373 = vmatpush.bf16.msra.mxu0 %v5869_v60  ;;  %v5335_v46 = vld [vmem:[%s8155_s2 + $0x7c] sm:$0xf]  ;;  %v3670_v47 = vld [vmem:[%s8155_s2 + $0x88] sm:$0xf0]  ;;  %v5322_v48 = vld [vmem:[%s8155_s2 + $0x4] sm:$0xf]  ;;  %v6007_v10 = vor.u32 %v5352_v42, %v3798_v41 }
  0x15   :  { %v39_v49 = vshrl.u32 %v31_v30, 16  ;;  %v42_v50 = vshll.u32 %v31_v30, 16  ;;  %v48_v51 = vshll.u32 %v33_v32, 16  ;;  %v53_v52 = vshrl.u32 %v32_v31, 16  ;;  %v5993_v53 = vld [vmem:[%s8155_s2 + $0x148] sm:$0x77] }
  0x16   :  { %3706 = vmatmul.msk.bf16.vlgmr.msra.gmra.mxu3 %vm203_vm1, %v5886_v4  ;;  %3707 = vmatmul.msk.bf16.vlgmr.msra.gmra.mxu1 %vm203_vm1, %v5886_v4  ;;  %v3718_v57 = vld [vmem:[%s8155_s2 + $0x10] sm:$0xf0]  ;;  %v56_v58 = vshll.u32 %v32_v31, 16  ;;  %v62_v61 = vshll.u32 %v34_v45, 16  ;;  %v480_v7 = vunpack.c.l.b16 %v5993_v53  ;;  %v3724_v11 = vld [vmem:[%s8155_s2 + $0x8] sm:$0xf]  ;;  %v6017_v25 = vor.u32 %v5335_v46, %v3670_v47 }
  0x17   :  { %266 = vmatpush.bf16.msrb.mxu3 %v5878_v63  ;;  %384 = vmatpush.bf16.msrb.mxu1 %v5881_v0  ;;  %v41_v62 = vrot.slane %v39_v49, 4  ;;  %v44_v1 = vrot.slane %v42_v50, 5  ;;  %v55_v2 = vrot.slane %v53_v52, 4  ;;  %v5325_v12 = vld [vmem:[%s8155_s2 + $0x14] sm:$0xf0]  ;;  %v50_v14 = vrot.slane %v48_v51, 5 }
  0x18   :  { %3708 = vmatmul.msk.bf16.vlgmr.msra.gmra.mxu2 %vm203_vm1, %v5886_v4  ;;  %3762 = vmatmul.msk.bf16.vlgmr.msra.gmra.mxu0 %vm203_vm1, %v5899_v8  ;;  %v58_v3 = vrot.slane %v56_v58, 5  ;;  %v6019_v26 = vor.u32 %v5322_v48, %v3718_v57  ;;  %v3782_v29 = vld [vmem:[%s8155_s2 + $0xe0] sm:$0xf]  ;;  %v5348_v30 = vld [vmem:[%s8155_s2 + $0xec] sm:$0xf0]  ;;  %v64_v33 = vrot.slane %v62_v61, 5  ;;  %v496_v40 = vpack.c.b16 %v480_v7, %v480_v7 }
  0x19   :  { %398 = vmatpush.bf16.msrb.mxu2 %v5924_v15  ;;  %529 = vmatpush.bf16.msrb.mxu0 %v5927_v16  ;;  %v45_v13 = vor.u32 %v44_v1, %v41_v62  ;;  %v6034_v42 = vsel %vm207_vm0, %v338_v5, 0  ;;  %v6037_v45 = vsel %vm207_vm0, %v495_v6, 0  ;;  %v6041_v46 = vor.u32 %v5325_v12, %v3724_v11  ;;  %v5331_v49 = vld [vmem:[%s8155_s2 + $0x4c] sm:$0xf]  ;;  %v3758_v52 = vld [vmem:[%s8155_s2 + $0x58] sm:$0xf0] }
  0x1a   :  { %v59_v32 = vor.u32 %v58_v3, %v55_v2  ;;  %v6043_v47 = vor.u32 %v5348_v30, %v3782_v29  ;;  %v5354_v57 = vld [vmem:[%s8155_s2 + $0x124] sm:$0xf]  ;;  %v3816_v58 = vld [vmem:[%s8155_s2 + $0x130] sm:$0xf0]  ;;  %v6066_v62 = vsel %vm207_vm0, %v496_v40, 0  ;;  %v6078_v5 = vor.u32 %v5331_v49, %v3758_v52 }
  0x1b   :  { %267 = vmatpush.bf16.msrb.mxu3 %v5929_v17  ;;  %385 = vmatpush.bf16.msrb.mxu1 %v5931_v18  ;;  %v46_v37 = vrot.slane %v45_v13, 4  ;;  %v3822_v1 = vld [vmem:[%s8155_s2 + $0x128] sm:$0xf]  ;;  %v5357_v2 = vld [vmem:[%s8155_s2 + $0x134] sm:$0xf0]  ;;  %v6080_v6 = vor.u32 %v5354_v57, %v3816_v58 }
  0x1c   :  { %v60_v41 = vrot.slane %v59_v32, 4  ;;  %v5327_v7 = vld [vmem:[%s8155_s2 + $0x2c] sm:$0xf] }
  0x1d   :  { %399 = vmatpush.bf16.msrb.mxu2 %v5958_v34  ;;  %530 = vmatpush.bf16.msrb.mxu0 %v5960_v35  ;;  %v51_v48 = vsel %vm6029_vm4, %v46_v37, %v50_v14 }
  0x1e   :  { %v65_v50 = vsel %vm6029_vm4, %v60_v41, %v64_v33  ;;  %v437_v51 = vunpack.c.l.b16 %v51_v48 }
  0x1f   :  { %268 = vmatpush.bf16.msrb.mxu3 %v5962_v36  ;;  %386 = vmatpush.bf16.msrb.mxu1 %v5997_v54  ;;  %v438_v61 = vunpack.c.l.b16 %v65_v50 }
  0x21   :  { %400 = vmatpush.bf16.msrb.mxu2 %v6005_v9  ;;  %531 = vmatpush.bf16.msrb.mxu0 %v6007_v10  ;;  %v6076_v3 = vpack.c.b16 %v438_v61, %v437_v51 }
  0x23   :  { %269 = vmatpush.bf16.msrb.mxu3 %v6017_v25  ;;  %387 = vmatpush.bf16.msrb.mxu1 %v6019_v26 }
  0x25   :  { %401 = vmatpush.bf16.msrb.mxu2 %v6041_v46  ;;  %532 = vmatpush.bf16.msrb.mxu0 %v6043_v47 }
  0x27   :  { %412 = vmatpush.bf16.msra.mxu3 %v6034_v42  ;;  %543 = vmatpush.bf16.msra.mxu1 %v6037_v45 }
  0x28   :  { %13 = vsyncpa [#allocation4], 0  ;;  %v6086_v11 = vor.u32 %v5357_v2, %v3822_v1  ;;  %v3742_v12 = vld [vmem:[%s8155_s2 + $0x38] sm:$0xf0]  ;;  %v5350_v13 = vld [vmem:[%s8155_s2 + $0x104] sm:$0xf]  ;;  %3709 = vmatmul.msk.bf16.vlgmr.msrb.gmra.mxu3 %vm203_vm1, %v5886_v4  ;;  %3763 = vmatmul.msk.bf16.vlgmr.msrb.gmra.mxu1 %vm203_vm1, %v5899_v8  ;;  %v481_v30 = vunpack.c.h.b16 %v5993_v53 }
  0x29   :  { %557 = vmatpush.bf16.msra.mxu2 %v6066_v62  ;;  %618 = vmatpush.bf16.msra.mxu0 %v5758_v19  ;;  %v3800_v14 = vld [vmem:[%s8155_s2 + $0x110] sm:$0xf0]  ;;  %v3806_v19 = vld [vmem:[%s8155_s2 + $0x108] sm:$0xf]  ;;  %v5353_v29 = vld [vmem:[%s8155_s2 + $0x114] sm:$0xf0]  ;;  %v6115_v32 = vor.u32 %v5327_v7, %v3742_v12 }
  0x2a   :  { %3764 = vmatmul.msk.bf16.vlgmr.msrb.gmra.mxu2 %vm203_vm1, %v5899_v8  ;;  %3828 = vmatmul.msk.bf16.vlgmr.msrb.gmra.mxu0 %vm203_vm1, %v6076_v3  ;;  %v6117_v33 = vor.u32 %v5350_v13, %v3800_v14  ;;  %v5323_v37 = vld [vmem:[%s8155_s2 + $0xc] sm:$0xf]  ;;  %v6123_v53 = vor.u32 %v5353_v29, %v3806_v19  ;;  %v3726_v40 = vld [vmem:[%s8155_s2 + $0x18] sm:$0xf0]  ;;  %v5346_v41 = vld [vmem:[%s8155_s2 + $0xe4] sm:$0xf]  ;;  %v497_v50 = vpack.c.b16 %v481_v30, %v481_v30 }
  0x2b   :  { %413 = vmatpush.bf16.msra.mxu3 %v6078_v5  ;;  %544 = vmatpush.bf16.msra.mxu1 %v6080_v6  ;;  %v3784_v48 = vld [vmem:[%s8155_s2 + $0xf0] sm:$0xf0]  ;;  %v3790_v49 = vld [vmem:[%s8155_s2 + $0xe8] sm:$0xf]  ;;  %v6143_v51 = vor.u32 %v5323_v37, %v3726_v40  ;;  %v5355_v61 = vld [vmem:[%s8155_s2 + $0x12c] sm:$0xf] }
  0x2c   :  { %v6145_v52 = vor.u32 %v5346_v41, %v3784_v48  ;;  %v6152_v58 = vsel %vm207_vm0, %v497_v50, 0  ;;  %v3824_v1 = vld [vmem:[%s8155_s2 + $0x138] sm:$0xf0]  ;;  %v5351_v2 = vld [vmem:[%s8155_s2 + $0x10c] sm:$0xf]  ;;  %vm812_vm5 = vcmask 1040384  }
  0x2d   :  { %558 = vmatpush.bf16.msra.mxu2 %v6086_v11  ;;  %619 = vmatpush.bf16.msra.mxu0 %v5771_v23  ;;  %v5349_v23 = vld [vmem:[%s8155_s2 + $0xf4] sm:$0xf0]  ;;  %v3808_v7 = vld [vmem:[%s8155_s2 + $0x118] sm:$0xf0]  ;;  %v5435_v30 = vld [vmem:[%s8157_s4 + $0x244] sm:$0xf0] }
  0x2e   :  { %v6148_v57 = vor.u32 %v5349_v23, %v3790_v49  ;;  %v6177_v12 = vor.u32 %v5351_v2, %v3808_v7  ;;  %v5433_v40 = vld [vmem:[%s8157_s4 + $0x234] sm:$0xf0]  ;;  %v4014_v48 = vld [vmem:[%s8157_s4 + $0x2d0] sm:$0xf]  ;;  %v3926_v50 = vld [vmem:[%s8157_s4 + $0x220] sm:$0xf] }
  0x2f   :  { %414 = vmatpush.bf16.msra.mxu3 %v6115_v32  ;;  %545 = vmatpush.bf16.msra.mxu1 %v6117_v33  ;;  %v5453_v49 = vld [vmem:[%s8157_s4 + $0x2d4] sm:$0xf0]  ;;  %v3918_v2 = vld [vmem:[%s8157_s4 + $0x210] sm:$0xf]  ;;  %vm813_vm6 = vsmask.f32 256 }
  0x30   :  { %v4015_v23 = vor.u32 %v5453_v49, %v4014_v48  ;;  %v5434_v48 = vld [vmem:[%s8157_s4 + $0x244] sm:$0xf]  ;;  %v3944_v49 = vld [vmem:[%s8157_s4 + $0x248] sm:$0xf0]  ;;  %vm815_vm7 = vcmask 1044484   ;;  %vm814_vm8 = vmand %vm812_vm5, %vm813_vm6  ;;  %vm875_vm12 = vcmask 1043456  }
  0x31   :  { %559 = vmatpush.bf16.msra.mxu2 %v6123_v53  ;;  %620 = vmatpush.bf16.msra.mxu0 %v5810_v38  ;;  %v6164_v38 = vor.u32 %v5355_v61, %v3824_v1  ;;  %v4094_v1 = vld [vmem:[%s8157_s4 + $0x370] sm:$0xf]  ;;  %vm816_vm9 = vsmask.f32 4352  ;;  %vm876_vm13 = vsmask.f32 7938 }
  0x32   :  { %vm817_vm10 = vmand %vm815_vm7, %vm816_vm9  ;;  %vm879_vm14 = vsmask.f32 7954  ;;  %vm878_vm15 = vcmask 1047556   ;;  %v5550_v31 = vld [vmem:[%s8157_s4 + $0x5e4] sm:$0xf]  ;;  %vm2584_vm3 = vcmask 1041409  }
  0x33   :  { %415 = vmatpush.bf16.msra.mxu3 %v6143_v51  ;;  %546 = vmatpush.bf16.msra.mxu1 %v6145_v52  ;;  %vm6810_vm11 = vmor %vm817_vm10, %vm814_vm8  ;;  %s5678_s25 = smov [#allocation3]   ;;  %s3631_s28 = sshll.u32 %s8161_s8, 4  ;;  %vm3622_vm5 = vcmask 9216   ;;  %s3632_s28 = int_to_ptr.hbm [resolvable:$true] %s3631_s28 }
  0x34   :  { %vm7055_vm0 = vmand %vm875_vm12, %vm876_vm13  ;;  %s3629_s26 = sshll.u32 %s5678_s25, 4  ;;  %s3630_s26 = int_to_ptr.vmem [resolvable:$true] %s3629_s26 }
  0x35   :  { %560 = vmatpush.bf16.msra.mxu2 %v6148_v57  ;;  %621 = vmatpush.bf16.msra.mxu0 %v5855_v55  ;;  %v66_v55 = vld [vmem:[%s8154_s1] sm:$0xf] }
  0x37   :  { %571 = vmatpush.bf16.msrb.mxu3 %v6152_v58  ;;  %632 = vmatpush.bf16.msrb.mxu1 %v5761_v20  ;;  %v5347_v20 = vld [vmem:[%s8155_s2 + $0xec] sm:$0xf] }
  0x38   :  { %3765 = vmatmul.msk.bf16.vlgmr.msra.gmra.mxu3 %vm203_vm1, %v5899_v8  ;;  %3829 = vmatmul.msk.bf16.vlgmr.msra.gmra.mxu1 %vm203_vm1, %v6076_v3  ;;  %v67_v8 = vld [vmem:[%s8154_s1 + $0x8] sm:$0xf] }
  0x39   :  { %646 = vmatpush.bf16.msrb.mxu2 %v5764_v21  ;;  %674 = vmatpush.bf16.msrb.mxu0 %v5769_v22  ;;  %v3792_v21 = vld [vmem:[%s8155_s2 + $0xf8] sm:$0xf0]  ;;  %v85_v13 = vshrl.u32 %v67_v8, 16  ;;  %v88_v14 = vshll.u32 %v67_v8, 16  ;;  %v4086_v8 = vld [vmem:[%s8157_s4 + $0x360] sm:$0xf] }
  0x3a   :  { %3830 = vmatmul.msk.bf16.vlgmr.msra.gmra.mxu2 %vm203_vm1, %v6076_v3  ;;  %3832 = vmatmul.msk.bf16.vlgmr.msra.gmra.mxu0 %vm203_vm1, %v6076_v3  ;;  %v6197_v22 = vor.u32 %v5347_v20, %v3792_v21  ;;  %v3998_v21 = vld [vmem:[%s8157_s4 + $0x2b0] sm:$0xf] }
  0x3b   :  { %572 = vmatpush.bf16.msrb.mxu3 %v6164_v38  ;;  %633 = vmatpush.bf16.msrb.mxu1 %v5773_v24  ;;  %v71_v24 = vshrl.u32 %v66_v55, 16  ;;  %v87_v29 = vrot.slane %v85_v13, 4  ;;  %v3910_v13 = vld [vmem:[%s8157_s4 + $0x200] sm:$0xf] }
  0x3d   :  { %647 = vmatpush.bf16.msrb.mxu2 %v5783_v27  ;;  %675 = vmatpush.bf16.msrb.mxu0 %v5785_v28  ;;  %v74_v27 = vshll.u32 %v66_v55, 16  ;;  %v73_v28 = vrot.slane %v71_v24, 4  ;;  %v5471_v24 = vld [vmem:[%s8157_s4 + $0x364] sm:$0xf0] }
  0x3f   :  { %573 = vmatpush.bf16.msrb.mxu3 %v6177_v12  ;;  %634 = vmatpush.bf16.msrb.mxu1 %v5812_v39  ;;  %v76_v19 = vrot.slane %v74_v27, 5  ;;  %v90_v39 = vrot.slane %v88_v14, 5  ;;  %v4087_v27 = vor.u32 %v5471_v24, %v4086_v8  ;;  %v5427_v14 = vld [vmem:[%s8157_s4 + $0x204] sm:$0xf0]  ;;  %v5461_v8 = vld [vmem:[%s8157_s4 + $0x314] sm:$0xf0] }
  0x41   :  { %648 = vmatpush.bf16.msrb.mxu2 %v5825_v43  ;;  %676 = vmatpush.bf16.msrb.mxu0 %v5827_v44  ;;  %v68_v43 = vld [vmem:[%s8154_s1 + $0x4] sm:$0x1]  ;;  %v69_v44 = vld [vmem:[%s8154_s1 + $0xc] sm:$0x1] }
  0x43   :  { %574 = vmatpush.bf16.msrb.mxu3 %v6197_v22  ;;  %635 = vmatpush.bf16.msrb.mxu1 %v5857_v56  ;;  %v77_v56 = vor.u32 %v76_v19, %v73_v28  ;;  %v3911_v28 = vor.u32 %v5427_v14, %v3910_v13  ;;  %v3990_v19 = vld [vmem:[%s8157_s4 + $0x2a0] sm:$0xf]  ;;  %v4016_v13 = vld [vmem:[%s8157_s4 + $0x2d8] sm:$0xf0]  ;;  %v4126_v14 = vld [vmem:[%s8157_s4 + $0x3b0] sm:$0xf] }
  0x45   :  { %649 = vmatpush.bf16.msrb.mxu2 %v5867_v59  ;;  %677 = vmatpush.bf16.msrb.mxu0 %v5869_v60  ;;  %v80_v59 = vshll.u32 %v68_v43, 16  ;;  %v94_v60 = vshll.u32 %v69_v44, 16  ;;  %v3968_v44 = vld [vmem:[%s8157_s4 + $0x278] sm:$0xf0] }
  0x47   :  { %660 = vmatpush.bf16.msra.mxu3 %v5878_v63  ;;  %688 = vmatpush.bf16.msra.mxu1 %v5881_v0  ;;  %v91_v63 = vor.u32 %v90_v39, %v87_v29  ;;  %v78_v0 = vrot.slane %v77_v56, 4  ;;  %v5447_v29 = vld [vmem:[%s8157_s4 + $0x2a4] sm:$0xf0]  ;;  %v5440_v39 = vld [vmem:[%s8157_s4 + $0x274] sm:$0xf] }
  0x48   :  { %3831 = vmatmul.msk.bf16.vlgmr.msrb.gmra.mxu3 %vm203_vm1, %v6076_v3  ;;  %3833 = vmatmul.msk.bf16.vlgmr.msrb.gmra.mxu1 %vm203_vm1, %v6076_v3  ;;  %v3991_v43 = vor.u32 %v5447_v29, %v3990_v19  ;;  %v4078_v56 = vld [vmem:[%s8157_s4 + $0x350] sm:$0xf]  ;;  %v5481_v19 = vld [vmem:[%s8157_s4 + $0x3b4] sm:$0xf0] }
  0x49   :  { %702 = vmatpush.bf16.msra.mxu2 %v5924_v15  ;;  %736 = vmatpush.bf16.msra.mxu0 %v5927_v16  ;;  %v82_v15 = vrot.slane %v80_v59, 5  ;;  %v92_v16 = vrot.slane %v91_v63, 4  ;;  %v3971_v59 = vor.u32 %v5440_v39, %v3968_v44  ;;  %v5469_v63 = vld [vmem:[%s8157_s4 + $0x354] sm:$0xf0]  ;;  %v4127_v29 = vor.u32 %v5481_v19, %v4126_v14  ;;  %v5430_v39 = vld [vmem:[%s8157_s4 + $0x224] sm:$0xf] }
  0x4a   :  { %3834 = vmatmul.msk.bf16.vlgmr.msrb.gmra.mxu2 %vm203_vm1, %v6076_v3  ;;  %3836 = vmatmul.msk.bf16.vlgmr.msrb.gmra.mxu0 %vm203_vm1, %v5886_v4  ;;  %v5486_v14 = vld [vmem:[%s8157_s4 + $0x3e4] sm:$0xf] }
  0x4b   :  { %661 = vmatpush.bf16.msra.mxu3 %v5929_v17  ;;  %689 = vmatpush.bf16.msra.mxu1 %v5931_v18  ;;  %v96_v17 = vrot.slane %v94_v60, 5  ;;  %v83_v18 = vsel %vm6029_vm4, %v78_v0, %v82_v15  ;;  %v4158_v60 = vld [vmem:[%s8157_s4 + $0x3f0] sm:$0xf]  ;;  %v4079_v0 = vor.u32 %v5469_v63, %v4078_v56  ;;  %v5489_v15 = vld [vmem:[%s8157_s4 + $0x3f4] sm:$0xf0] }
  0x4c   :  { %v4038_v56 = vld [vmem:[%s8157_s4 + $0x300] sm:$0xf]  ;;  %v5450_v63 = vld [vmem:[%s8157_s4 + $0x2c4] sm:$0xf] }
  0x4d   :  { %703 = vmatpush.bf16.msra.mxu2 %v5958_v34  ;;  %737 = vmatpush.bf16.msra.mxu0 %v5960_v35  ;;  %v97_v34 = vsel %vm6029_vm4, %v92_v16, %v96_v17  ;;  %v4159_v16 = vor.u32 %v5489_v15, %v4158_v60  ;;  %v3982_v17 = vld [vmem:[%s8157_s4 + $0x290] sm:$0xf]  ;;  %v4008_v15 = vld [vmem:[%s8157_s4 + $0x2c8] sm:$0xf0] }
  0x4e   :  { %v727_v35 = vunpack.c.l.b16 %v97_v34  ;;  %v5438_v34 = vld [vmem:[%s8157_s4 + $0x264] sm:$0xf] }
  0x4f   :  { %662 = vmatpush.bf16.msra.mxu3 %v5962_v36  ;;  %690 = vmatpush.bf16.msra.mxu1 %v5997_v54  ;;  %v726_v36 = vunpack.c.l.b16 %v83_v18  ;;  %v5445_v18 = vld [vmem:[%s8157_s4 + $0x294] sm:$0xf0] }
  0x51   :  { %704 = vmatpush.bf16.msra.mxu2 %v6005_v9  ;;  %738 = vmatpush.bf16.msra.mxu0 %v6007_v10  ;;  %v728_v54 = vpack.c.b16 %v727_v35, %v726_v36  ;;  %v3966_v9 = vld [vmem:[%s8157_s4 + $0x270] sm:$0xf]  ;;  %v5441_v10 = vld [vmem:[%s8157_s4 + $0x274] sm:$0xf0]  ;;  %v3983_v36 = vor.u32 %v5445_v18, %v3982_v17  ;;  %v3960_v35 = vld [vmem:[%s8157_s4 + $0x268] sm:$0xf0] }
  0x52   :  { %v5479_v17 = vld [vmem:[%s8157_s4 + $0x3a4] sm:$0xf0] }
  0x53   :  { %663 = vmatpush.bf16.msra.mxu3 %v6017_v25  ;;  %691 = vmatpush.bf16.msra.mxu1 %v6019_v26  ;;  %v3967_v25 = vor.u32 %v5441_v10, %v3966_v9  ;;  %v3958_v26 = vld [vmem:[%s8157_s4 + $0x260] sm:$0xf]  ;;  %v5467_v9 = vld [vmem:[%s8157_s4 + $0x344] sm:$0xf0]  ;;  %v3963_v10 = vor.u32 %v5438_v34, %v3960_v35  ;;  %v4011_v34 = vor.u32 %v5450_v63, %v4008_v15  ;;  %v5472_v35 = vld [vmem:[%s8157_s4 + $0x374] sm:$0xf] }
  0x55   :  { %705 = vmatpush.bf16.msra.mxu2 %v6041_v46  ;;  %739 = vmatpush.bf16.msra.mxu0 %v6043_v47  ;;  %v5457_v46 = vld [vmem:[%s8157_s4 + $0x2f4] sm:$0xf0] }
  0x57   :  { %716 = vmatpush.bf16.msrb.mxu3 %v6034_v42  ;;  %750 = vmatpush.bf16.msrb.mxu1 %v6037_v45  ;;  %v5439_v42 = vld [vmem:[%s8157_s4 + $0x264] sm:$0xf0]  ;;  %v4030_v45 = vld [vmem:[%s8157_s4 + $0x2f0] sm:$0xf] }
  0x58   :  { %3835 = vmatmul.msk.bf16.vlgmr.msra.gmra.mxu3 %vm203_vm1, %v6076_v3  ;;  %3837 = vmatmul.msk.bf16.vlgmr.msra.gmra.mxu1 %vm203_vm1, %v5886_v4  ;;  %v3959_v47 = vor.u32 %v5439_v42, %v3958_v26  ;;  %v3950_v3 = vld [vmem:[%s8157_s4 + $0x250] sm:$0xf]  ;;  %v4150_v26 = vld [vmem:[%s8157_s4 + $0x3e0] sm:$0xf]  ;;  %v5487_v42 = vld [vmem:[%s8157_s4 + $0x3e4] sm:$0xf0] }
  0x59   :  { %764 = vmatpush.bf16.msrb.mxu2 %v6066_v62  ;;  %1424 = vmatpush.bf16.msrb.mxu0 %v3967_v25  ;;  %v4031_v62 = vor.u32 %v5457_v46, %v4030_v45  ;;  %v4151_v45 = vor.u32 %v5487_v42, %v4150_v26  ;;  %v3974_v46 = vld [vmem:[%s8157_s4 + $0x280] sm:$0xf]  ;;  %v3920_v26 = vld [vmem:[%s8157_s4 + $0x218] sm:$0xf0] }
  0x5a   :  { %3838 = vmatmul.msk.bf16.vlgmr.msra.gmra.mxu2 %vm203_vm1, %v5886_v4  ;;  %3840 = vmatmul.msk.bf16.vlgmr.msra.gmra.mxu0 %vm203_vm1, %v728_v54 }
  0x5b   :  { %717 = vmatpush.bf16.msrb.mxu3 %v6078_v5  ;;  %751 = vmatpush.bf16.msrb.mxu1 %v6080_v6  ;;  %v5437_v5 = vld [vmem:[%s8157_s4 + $0x254] sm:$0xf0] }
  0x5c   :  { %v3951_v6 = vor.u32 %v5437_v5, %v3950_v3  ;;  %v3952_v5 = vld [vmem:[%s8157_s4 + $0x258] sm:$0xf0] }
  0x5d   :  { %765 = vmatpush.bf16.msrb.mxu2 %v6086_v11  ;;  %1425 = vmatpush.bf16.msrb.mxu0 %v3959_v47  ;;  %v3942_v11 = vld [vmem:[%s8157_s4 + $0x240] sm:$0xf]  ;;  %v5443_v47 = vld [vmem:[%s8157_s4 + $0x284] sm:$0xf0] }
  0x5e   :  { %v3975_v3 = vor.u32 %v5443_v47, %v3974_v46  ;;  %v5448_v46 = vld [vmem:[%s8157_s4 + $0x2b4] sm:$0xf]  ;;  %v4000_v47 = vld [vmem:[%s8157_s4 + $0x2b8] sm:$0xf0] }
  0x5f   :  { %718 = vmatpush.bf16.msrb.mxu3 %v6115_v32  ;;  %752 = vmatpush.bf16.msrb.mxu1 %v6117_v33  ;;  %v3943_v32 = vor.u32 %v5435_v30, %v3942_v11  ;;  %v4022_v33 = vld [vmem:[%s8157_s4 + $0x2e0] sm:$0xf]  ;;  %v5465_v11 = vld [vmem:[%s8157_s4 + $0x334] sm:$0xf0] }
  0x61   :  { %766 = vmatpush.bf16.msrb.mxu2 %v6123_v53  ;;  %1426 = vmatpush.bf16.msrb.mxu0 %v3951_v6  ;;  %v3934_v53 = vld [vmem:[%s8157_s4 + $0x230] sm:$0xf] }
  0x62   :  { %v3935_v41 = vor.u32 %v5433_v40, %v3934_v53  ;;  %v4062_v6 = vld [vmem:[%s8157_s4 + $0x330] sm:$0xf]  ;;  %v5485_v40 = vld [vmem:[%s8157_s4 + $0x3d4] sm:$0xf0] }
  0x63   :  { %719 = vmatpush.bf16.msrb.mxu3 %v6143_v51  ;;  %753 = vmatpush.bf16.msrb.mxu1 %v6145_v52  ;;  %v5431_v51 = vld [vmem:[%s8157_s4 + $0x224] sm:$0xf0] }
  0x64   :  { %v3927_v52 = vor.u32 %v5431_v51, %v3926_v50  ;;  %v4054_v50 = vld [vmem:[%s8157_s4 + $0x320] sm:$0xf]  ;;  %v5463_v51 = vld [vmem:[%s8157_s4 + $0x324] sm:$0xf0] }
  0x65   :  { %767 = vmatpush.bf16.msrb.mxu2 %v6148_v57  ;;  %1427 = vmatpush.bf16.msrb.mxu0 %v3943_v32  ;;  %v4006_v57 = vld [vmem:[%s8157_s4 + $0x2c0] sm:$0xf]  ;;  %v4063_v32 = vor.u32 %v5465_v11, %v4062_v6  ;;  %v5470_v6 = vld [vmem:[%s8157_s4 + $0x364] sm:$0xf] }
  0x67   :  { %778 = vmatpush.bf16.msra.mxu3 %v6152_v58  ;;  %1438 = vmatpush.bf16.msra.mxu1 %v4031_v62  ;;  %v5451_v58 = vld [vmem:[%s8157_s4 + $0x2c4] sm:$0xf0]  ;;  %v5436_v62 = vld [vmem:[%s8157_s4 + $0x254] sm:$0xf] }
  0x68   :  { %3839 = vmatmul.msk.bf16.vlgmr.msrb.gmra.mxu3 %vm203_vm1, %v5886_v4  ;;  %3841 = vmatmul.msk.bf16.vlgmr.msrb.gmra.mxu1 %vm203_vm1, %v728_v54  ;;  %v5455_v4 = vld [vmem:[%s8157_s4 + $0x2e4] sm:$0xf0]  ;;  %v4007_v61 = vor.u32 %v5451_v58, %v4006_v57  ;;  %v3955_v30 = vor.u32 %v5436_v62, %v3952_v5  ;;  %v4055_v57 = vor.u32 %v5463_v51, %v4054_v50  ;;  %v4024_v58 = vld [vmem:[%s8157_s4 + $0x2e8] sm:$0xf0]  ;;  %v5477_v5 = vld [vmem:[%s8157_s4 + $0x394] sm:$0xf0] }
  0x69   :  { %v4023_v37 = vor.u32 %v5455_v4, %v4022_v33  ;;  %1428 = vmatpush.bf16.msrb.mxu0 %v3935_v41  ;;  %v5456_v33 = vld [vmem:[%s8157_s4 + $0x2f4] sm:$0xf]  ;;  %v4032_v4 = vld [vmem:[%s8157_s4 + $0x2f8] sm:$0xf0]  ;;  %v4003_v62 = vor.u32 %v5448_v46, %v4000_v47 }
  0x6a   :  { %3842 = vmatmul.msk.bf16.vlgmr.msrb.gmra.mxu2 %vm203_vm1, %v728_v54  ;;  %v4035_v53 = vor.u32 %v5456_v33, %v4032_v4  ;;  %v5426_v33 = vld [vmem:[%s8157_s4 + $0x204] sm:$0xf]  ;;  %v3912_v4 = vld [vmem:[%s8157_s4 + $0x208] sm:$0xf0]  ;;  %v5468_v50 = vld [vmem:[%s8157_s4 + $0x354] sm:$0xf] }
  0x6b   :  { %779 = vmatpush.bf16.msra.mxu3 %v6164_v38  ;;  %1439 = vmatpush.bf16.msra.mxu1 %v4023_v37  ;;  %v5473_v38 = vld [vmem:[%s8157_s4 + $0x374] sm:$0xf0]  ;;  %v4142_v37 = vld [vmem:[%s8157_s4 + $0x3d0] sm:$0xf] }
  0x6c   :  { %v4095_v7 = vor.u32 %v5473_v38, %v4094_v1  ;;  %v4143_v41 = vor.u32 %v5485_v40, %v4142_v37  ;;  %v5483_v1 = vld [vmem:[%s8157_s4 + $0x3c4] sm:$0xf0]  ;;  %v3915_v37 = vor.u32 %v5426_v33, %v3912_v4  ;;  %v3992_v40 = vld [vmem:[%s8157_s4 + $0x2a8] sm:$0xf0]  ;;  %v5460_v33 = vld [vmem:[%s8157_s4 + $0x314] sm:$0xf] }
  0x6d   :  { %1429 = vmatpush.bf16.msrb.mxu0 %v3927_v52  ;;  %v5454_v52 = vld [vmem:[%s8157_s4 + $0x2e4] sm:$0xf]  ;;  %v4048_v4 = vld [vmem:[%s8157_s4 + $0x318] sm:$0xf0] }
  0x6e   :  { %1452 = vmatpush.bf16.msra.mxu2 %v4095_v7  ;;  %v4027_v38 = vor.u32 %v5454_v52, %v4024_v58  ;;  %v5488_v58 = vld [vmem:[%s8157_s4 + $0x3f4] sm:$0xf] }
  0x6f   :  { %780 = vmatpush.bf16.msra.mxu3 %v6177_v12  ;;  %1440 = vmatpush.bf16.msra.mxu1 %v4015_v23  ;;  %v5429_v12 = vld [vmem:[%s8157_s4 + $0x214] sm:$0xf0]  ;;  %v3947_v23 = vor.u32 %v5434_v48, %v3944_v49  ;;  %v4102_v49 = vld [vmem:[%s8157_s4 + $0x380] sm:$0xf] }
  0x70   :  { %v3919_v20 = vor.u32 %v5429_v12, %v3918_v2  ;;  %v5432_v12 = vld [vmem:[%s8157_s4 + $0x234] sm:$0xf] }
  0x72   :  { %1430 = vmatpush.bf16.msrb.mxu0 %v3919_v20  ;;  %1453 = vmatpush.bf16.msra.mxu2 %v4087_v27  ;;  %v3936_v20 = vld [vmem:[%s8157_s4 + $0x238] sm:$0xf0]  ;;  %v5452_v27 = vld [vmem:[%s8157_s4 + $0x2d4] sm:$0xf] }
  0x73   :  { %781 = vmatpush.bf16.msra.mxu3 %v6197_v22  ;;  %1441 = vmatpush.bf16.msra.mxu1 %v4007_v61  ;;  %v5449_v22 = vld [vmem:[%s8157_s4 + $0x2b4] sm:$0xf0]  ;;  %v4134_v61 = vld [vmem:[%s8157_s4 + $0x3c0] sm:$0xf] }
  0x74   :  { %v3999_v55 = vor.u32 %v5449_v22, %v3998_v21  ;;  %v4135_v2 = vor.u32 %v5483_v1, %v4134_v61  ;;  %v3939_v22 = vor.u32 %v5432_v12, %v3936_v20  ;;  %v4160_v61 = vld [vmem:[%s8157_s4 + $0x3f8] sm:$0xf0]  ;;  %v5444_v20 = vld [vmem:[%s8157_s4 + $0x294] sm:$0xf] }
  0x76   :  { %1431 = vmatpush.bf16.msrb.mxu0 %v3911_v28  ;;  %1454 = vmatpush.bf16.msra.mxu2 %v4079_v0  ;;  %v4019_v28 = vor.u32 %v5452_v27, %v4016_v13  ;;  %v6605_v27 = vld [vmem:[%s8156_s3] sm:$0xf] }
  0x77   :  { %1442 = vmatpush.bf16.msra.mxu1 %v3999_v55  ;;  %1466 = vmatpush.bf16.msrb.mxu3 %v4159_v16  ;;  %v4046_v55 = vld [vmem:[%s8157_s4 + $0x310] sm:$0xf]  ;;  %v4118_v16 = vld [vmem:[%s8157_s4 + $0x3a0] sm:$0xf] }
  0x78   :  { %3843 = vmatmul.msk.bf16.vlgmr.msra.gmra.mxu3 %vm203_vm1, %v728_v54  ;;  %v4070_v54 = vld [vmem:[%s8157_s4 + $0x340] sm:$0xf]  ;;  %v4047_v24 = vor.u32 %v5461_v8, %v4046_v55  ;;  %v5466_v8 = vld [vmem:[%s8157_s4 + $0x344] sm:$0xf]  ;;  %vm7068_vm1 = vmand %vm878_vm15, %vm879_vm14 }
  0x79   :  { %v4071_v25 = vor.u32 %v5467_v9, %v4070_v54  ;;  %v4096_v54 = vld [vmem:[%s8157_s4 + $0x378] sm:$0xf0]  ;;  %vm7089_vm2 = vmor %vm7068_vm1, %vm7055_vm0 }
  0x7a   :  { %1480 = vmatpush.bf16.msra.mxu0 %v3971_v59  ;;  %v5459_v59 = vld [vmem:[%s8157_s4 + $0x304] sm:$0xf0] }
  0x7b   :  { %1443 = vmatpush.bf16.msra.mxu1 %v3991_v43  ;;  %1455 = vmatpush.bf16.msra.mxu2 %v4071_v25  ;;  %v3928_v43 = vld [vmem:[%s8157_s4 + $0x228] sm:$0xf0]  ;;  %v4039_v0 = vor.u32 %v5459_v59, %v4038_v56  ;;  %v5428_v25 = vld [vmem:[%s8157_s4 + $0x214] sm:$0xf]  ;;  %v6622_v56 = vperm.slane %v6605_v27, 0 }
  0x7c   :  { %1467 = vmatpush.bf16.msrb.mxu3 %v4151_v45  ;;  %v3931_v44 = vor.u32 %v5430_v39, %v3928_v43  ;;  %v3923_v45 = vor.u32 %v5428_v25, %v3920_v26  ;;  %v5442_v39 = vld [vmem:[%s8157_s4 + $0x284] sm:$0xf]  ;;  %v3976_v43 = vld [vmem:[%s8157_s4 + $0x288] sm:$0xf0] }
  0x7d   :  { %v3979_v63 = vor.u32 %v5442_v39, %v3976_v43  ;;  %v5462_v26 = vld [vmem:[%s8157_s4 + $0x324] sm:$0xf]  ;;  %v5476_v39 = vld [vmem:[%s8157_s4 + $0x394] sm:$0xf]  ;;  %v4112_v43 = vld [vmem:[%s8157_s4 + $0x398] sm:$0xf0] }
  0x7e   :  { %1481 = vmatpush.bf16.msra.mxu0 %v3963_v10  ;;  %v4099_v10 = vor.u32 %v5472_v35, %v4096_v54  ;;  %v4144_v35 = vld [vmem:[%s8157_s4 + $0x3d8] sm:$0xf0] }
  0x7f   :  { %1444 = vmatpush.bf16.msra.mxu1 %v3983_v36  ;;  %1456 = vmatpush.bf16.msra.mxu2 %v4063_v32  ;;  %v4119_v36 = vor.u32 %v5479_v17, %v4118_v16 }
  0x80   :  { %1468 = vmatpush.bf16.msrb.mxu3 %v4143_v41 }
  0x82   :  { %1482 = vmatpush.bf16.msra.mxu0 %v3955_v30  ;;  %v4088_v30 = vld [vmem:[%s8157_s4 + $0x368] sm:$0xf0] }
  0x83   :  { %1445 = vmatpush.bf16.msra.mxu1 %v3975_v3  ;;  %1457 = vmatpush.bf16.msra.mxu2 %v4055_v57  ;;  %v4110_v3 = vld [vmem:[%s8157_s4 + $0x390] sm:$0xf]  ;;  %v4091_v32 = vor.u32 %v5470_v6, %v4088_v30  ;;  %v4080_v57 = vld [vmem:[%s8157_s4 + $0x358] sm:$0xf0] }
  0x84   :  { %1469 = vmatpush.bf16.msrb.mxu3 %v4135_v2  ;;  %v4111_v11 = vor.u32 %v5477_v5, %v4110_v3  ;;  %v4163_v2 = vor.u32 %v5488_v58, %v4160_v61  ;;  %v5482_v3 = vld [vmem:[%s8157_s4 + $0x3c4] sm:$0xf]  ;;  %v4136_v5 = vld [vmem:[%s8157_s4 + $0x3c8] sm:$0xf0] }
  0x85   :  { %v4139_v6 = vor.u32 %v5482_v3, %v4136_v5  ;;  %v5458_v61 = vld [vmem:[%s8157_s4 + $0x304] sm:$0xf] }
  0x86   :  { %1483 = vmatpush.bf16.msra.mxu0 %v3947_v23  ;;  %v5475_v23 = vld [vmem:[%s8157_s4 + $0x384] sm:$0xf0] }
  0x87   :  { %1494 = vmatpush.bf16.msrb.mxu1 %v4035_v53  ;;  %1458 = vmatpush.bf16.msra.mxu2 %v4047_v24  ;;  %v5446_v53 = vld [vmem:[%s8157_s4 + $0x2a4] sm:$0xf]  ;;  %v4103_v52 = vor.u32 %v5475_v23, %v4102_v49  ;;  %v4072_v24 = vld [vmem:[%s8157_s4 + $0x348] sm:$0xf0]  ;;  %v5375_v23 = vld [vmem:[%s8157_s4 + $0x64] sm:$0xf0] }
  0x88   :  { %1470 = vmatpush.bf16.msrb.mxu3 %v4127_v29  ;;  %v3995_v48 = vor.u32 %v5446_v53, %v3992_v40  ;;  %v4075_v13 = vor.u32 %v5466_v8, %v4072_v24  ;;  %v4230_v40 = vld [vmem:[%s8157_s4 + $0x60] sm:$0xf]  ;;  %v5478_v8 = vld [vmem:[%s8157_s4 + $0x3a4] sm:$0xf]  ;;  %v6707_v24 = vperm.slane %v6605_v27, 1 }
  0x8a   :  { %1484 = vmatpush.bf16.msra.mxu0 %v3939_v22  ;;  %v3984_v22 = vld [vmem:[%s8157_s4 + $0x298] sm:$0xf0] }
  0x8b   :  { %1495 = vmatpush.bf16.msrb.mxu1 %v4027_v38  ;;  %1459 = vmatpush.bf16.msra.mxu2 %v4039_v0  ;;  %v4083_v38 = vor.u32 %v5468_v50, %v4080_v57  ;;  %v3987_v55 = vor.u32 %v5444_v20, %v3984_v22  ;;  %v5480_v50 = vld [vmem:[%s8157_s4 + $0x3b4] sm:$0xf]  ;;  %v4222_v20 = vld [vmem:[%s8157_s4 + $0x50] sm:$0xf] }
  0x8c   :  { %1471 = vmatpush.bf16.msrb.mxu3 %v4119_v36 }
  0x8e   :  { %1485 = vmatpush.bf16.msra.mxu0 %v3931_v44 }
  0x8f   :  { %1496 = vmatpush.bf16.msrb.mxu1 %v4019_v28  ;;  %1508 = vmatpush.bf16.msrb.mxu2 %v4099_v10  ;;  %v4152_v28 = vld [vmem:[%s8157_s4 + $0x3e8] sm:$0xf0] }
  0x90   :  { %1472 = vmatpush.bf16.msrb.mxu3 %v4111_v11  ;;  %v4155_v29 = vor.u32 %v5486_v14, %v4152_v28 }
  0x92   :  { %1486 = vmatpush.bf16.msra.mxu0 %v3923_v45  ;;  %v4238_v45 = vld [vmem:[%s8157_s4 + $0x70] sm:$0xf] }
  0x93   :  { %v6466_v7 = vpop.f32.mrf.mxu1  ;;  %1497 = vmatpush.bf16.msrb.mxu1 %v4011_v34  ;;  %1509 = vmatpush.bf16.msrb.mxu2 %v4091_v32  ;;  %v5484_v34 = vld [vmem:[%s8157_s4 + $0x3d4] sm:$0xf] }
  0x94   :  { %1473 = vmatpush.bf16.msrb.mxu3 %v4103_v52  ;;  %v4147_v25 = vor.u32 %v5484_v34, %v4144_v35  ;;  %v4128_v52 = vld [vmem:[%s8157_s4 + $0x3b8] sm:$0xf0] }
  0x95   :  { %v6474_v21 = vpop.f32.mrf.mxu0  ;;  %v4131_v58 = vor.u32 %v5480_v50, %v4128_v52  ;;  %v5389_v52 = vld [vmem:[%s8157_s4 + $0xd4] sm:$0xf0] }
  0x96   :  { %1487 = vmatpush.bf16.msra.mxu0 %v3915_v37 }
  0x97   :  { %1498 = vmatpush.bf16.msrb.mxu1 %v4003_v62  ;;  %1510 = vmatpush.bf16.msrb.mxu2 %v4083_v38  ;;  %v5377_v62 = vld [vmem:[%s8157_s4 + $0x74] sm:$0xf0]  ;;  %v4040_v38 = vld [vmem:[%s8157_s4 + $0x308] sm:$0xf0] }
  0x98   :  { %1522 = vmatpush.bf16.msra.mxu3 %v4163_v2  ;;  %v4239_v53 = vor.u32 %v5377_v62, %v4238_v45  ;;  %v4043_v22 = vor.u32 %v5458_v61, %v4040_v38  ;;  %v5409_v61 = vld [vmem:[%s8157_s4 + $0x174] sm:$0xf0] }
  0x99   :  { %v6509_v60 = vpop.f32.mrf.mxu3 }
  0x9a   :  { %v376_v19 = vadd.f32 %v6474_v21, %v6509_v60  ;;  %v5464_v21 = vld [vmem:[%s8157_s4 + $0x334] sm:$0xf]  ;;  %v4064_v60 = vld [vmem:[%s8157_s4 + $0x338] sm:$0xf0] }
  0x9b   :  { %v6520_v18 = vpop.f32.mrf.mxu2  ;;  %v6528_v9 = vpop.f32.mrf.mxu1  ;;  %1499 = vmatpush.bf16.msrb.mxu1 %v3995_v48  ;;  %1511 = vmatpush.bf16.msrb.mxu2 %v4075_v13  ;;  %v4067_v15 = vor.u32 %v5464_v21, %v4064_v60  ;;  %v4115_v21 = vor.u32 %v5476_v39, %v4112_v43  ;;  %v4278_v39 = vld [vmem:[%s8157_s4 + $0xc0] sm:$0xf]  ;;  %v5387_v43 = vld [vmem:[%s8157_s4 + $0xc4] sm:$0xf0] }
  0x9c   :  { %1523 = vmatpush.bf16.msra.mxu3 %v4155_v29 }
  0x9d   :  { %v6536_v42 = vpop.f32.mrf.mxu0 }
  0x9f   :  { %1500 = vmatpush.bf16.msrb.mxu1 %v3987_v55  ;;  %1512 = vmatpush.bf16.msrb.mxu2 %v4067_v15  ;;  %v5373_v55 = vld [vmem:[%s8157_s4 + $0x54] sm:$0xf0] }
  0xa0   :  { %1524 = vmatpush.bf16.msra.mxu3 %v4147_v25  ;;  %v4223_v29 = vor.u32 %v5373_v55, %v4222_v20  ;;  %v4104_v25 = vld [vmem:[%s8157_s4 + $0x388] sm:$0xf0] }
  0xa1   :  { %v231_v41 = vpop.f32.mrf.mxu3 }
  0xa2   :  { %v378_v16 = vadd.f32 %v6536_v42, %v231_v41  ;;  %v4056_v42 = vld [vmem:[%s8157_s4 + $0x328] sm:$0xf0]  ;;  %v4051_v41 = vor.u32 %v5460_v33, %v4048_v4  ;;  %v4294_v33 = vld [vmem:[%s8157_s4 + $0xe0] sm:$0xf]  ;;  %v5391_v4 = vld [vmem:[%s8157_s4 + $0xe4] sm:$0xf0] }
  0xa3   :  { %v6577_v51 = vpop.f32.mrf.mxu2  ;;  %1501 = vmatpush.bf16.msrb.mxu1 %v3979_v63  ;;  %v4059_v46 = vor.u32 %v5462_v26, %v4056_v42  ;;  %v4214_v63 = vld [vmem:[%s8157_s4 + $0x40] sm:$0xf]  ;;  %v4206_v26 = vld [vmem:[%s8157_s4 + $0x30] sm:$0xf]  ;;  %v5369_v42 = vld [vmem:[%s8157_s4 + $0x34] sm:$0xf0]  ;;  %v4295_v50 = vor.u32 %v5391_v4, %v4294_v33 }
  0xa4   :  { %1525 = vmatpush.bf16.msra.mxu3 %v4139_v6  ;;  %v825_v33 = vld [vmem:[#allocation2 + $0x20] sm:$0x11] }
  0xa5   :  { %v6588_v1 = vpop.f32.mrf.mxu1  ;;  %1513 = vmatpush.bf16.msrb.mxu2 %v4059_v46 }
  0xa6   :  { %v390_v2 = vadd.f32 %v6588_v1, %v6466_v7  ;;  %v4120_v7 = vld [vmem:[%s8157_s4 + $0x3a8] sm:$0xf0] }
  0xa7   :  { %v534_v12 = vpop.f32.mrf.mxu0  ;;  %v4123_v13 = vor.u32 %v5478_v8, %v4120_v7  ;;  %v819_v8 = vld [vmem:[#allocation2] sm:$0x11] }
  0xa8   :  { %v581_v44 = vadd.f32 %v534_v12, %v376_v19  ;;  %v4231_v12 = vor.u32 %v5375_v23, %v4230_v40  ;;  %1526 = vmatpush.bf16.msra.mxu3 %v4131_v58  ;;  %v4366_v58 = vld [vmem:[%s8157_s4 + $0x170] sm:$0xf] }
  0xa9   :  { %1514 = vmatpush.bf16.msrb.mxu2 %v4051_v41  ;;  %v5367_v41 = vld [vmem:[%s8157_s4 + $0x24] sm:$0xf0]  ;;  %v4367_v55 = vor.u32 %v5409_v61, %v4366_v58  ;;  %v4430_v58 = vld [vmem:[%s8157_s4 + $0x1f0] sm:$0xf]  ;;  %v5425_v61 = vld [vmem:[%s8157_s4 + $0x1f4] sm:$0xf0] }
  0xaa   :  { %v598_v54 = vadd.f32 %v6622_v56, %v581_v44 }
  0xab   :  { %v6624_v59 = vpop.f32.mrf.mxu3 }
  0xac   :  { %v606_v11 = vmax.f32 %v598_v54, 0.0  ;;  %1527 = vmatpush.bf16.msra.mxu3 %v4123_v13 }
  0xad   :  { %v6632_v0 = vpop.f32.mrf.mxu2  ;;  %v391_v17 = vpop.f32.mrf.mxu1  ;;  %1515 = vmatpush.bf16.msrb.mxu2 %v4043_v22 }
  0xae   :  { %v392_v28 = vadd.f32 %v391_v17, %v6528_v9  ;;  %v5371_v9 = vld [vmem:[%s8157_s4 + $0x44] sm:$0xf0]  ;;  %v404_v60 = vadd.f32 %v6632_v0, %v6520_v18  ;;  %v6728_v17 = vperm.slane %v6605_v27, 2  ;;  %v5474_v0 = vld [vmem:[%s8157_s4 + $0x384] sm:$0xf] }
  0xaf   :  { %v536_v36 = vpop.f32.mrf.mxu0  ;;  %v4215_v18 = vor.u32 %v5371_v9, %v4214_v63  ;;  %v4107_v45 = vor.u32 %v5474_v0, %v4104_v25  ;;  %v6840_v0 = vperm.slane %v6605_v27, 3  ;;  %v4270_v25 = vld [vmem:[%s8157_s4 + $0xb0] sm:$0xf]  ;;  %v5374_v27 = vld [vmem:[%s8157_s4 + $0x64] sm:$0xf] }
  0xb0   :  { %v585_v10 = vadd.f32 %v536_v36, %v378_v16  ;;  %v4302_v36 = vld [vmem:[%s8157_s4 + $0xf0] sm:$0xf]  ;;  %1528 = vmatpush.bf16.msra.mxu3 %v4115_v21  ;;  %v820_v21 = vsel %vm6810_vm11, 0, %v819_v8 }
  0xb1   :  { %821 = vst [vmem:[#allocation2] sm:$0x11] %v820_v21 }
  0xb2   :  { %v602_v47 = vadd.f32 %v6622_v56, %v585_v10  ;;  %v5393_v10 = vld [vmem:[%s8157_s4 + $0xf4] sm:$0xf0] }
  0xb3   :  { %v6661_v32 = vpop.f32.mrf.mxu3  ;;  %v4303_v5 = vor.u32 %v5393_v10, %v4302_v36  ;;  %v4279_v10 = vor.u32 %v5387_v43, %v4278_v39  ;;  %v4422_v39 = vld [vmem:[%s8157_s4 + $0x1e0] sm:$0xf]  ;;  %v5423_v43 = vld [vmem:[%s8157_s4 + $0x1e4] sm:$0xf0] }
  0xb4   :  { %v610_v30 = vmax.f32 %v602_v47, 0.0  ;;  %1529 = vmatpush.bf16.msra.mxu3 %v4107_v45 }
  0xb5   :  { %v405_v37 = vpop.f32.mrf.mxu2  ;;  %v548_v49 = vpop.f32.mrf.mxu1 }
  0xb6   :  { %v6672_v48 = vpack.c.bf16 %v610_v30, %v606_v11  ;;  %v582_v1 = vadd.f32 %v548_v49, %v390_v2  ;;  %v406_v62 = vadd.f32 %v405_v37, %v6577_v51  ;;  %v4198_v37 = vld [vmem:[%s8157_s4 + $0x20] sm:$0xf]  ;;  %v4286_v49 = vld [vmem:[%s8157_s4 + $0xd0] sm:$0xf] }
  0xb7   :  { %v6683_v57 = vpop.f32.mrf.mxu0  ;;  %v4199_v2 = vor.u32 %v5367_v41, %v4198_v37  ;;  %v4287_v13 = vor.u32 %v5389_v52, %v4286_v49  ;;  %v5383_v37 = vld [vmem:[%s8157_s4 + $0xa4] sm:$0xf0]  ;;  %v826_v41 = vsel %vm6810_vm11, 0, %v825_v33  ;;  %v5397_v33 = vld [vmem:[%s8157_s4 + $0x114] sm:$0xf0] }
  0xb8   :  { %1432 = vmatmul.bf16.vlgmr.msrb.gmra.mxu0 %v6672_v48  ;;  %v599_v15 = vadd.f32 %v6707_v24, %v582_v1  ;;  %827 = vst [vmem:[#allocation2 + $0x20] sm:$0x11] %v826_v41  ;;  %v4406_v41 = vld [vmem:[%s8157_s4 + $0x1c0] sm:$0xf] }
  0xb9   :  { %1876 = vmatpush.bf16.msrb.mxu0 %v4239_v53  ;;  %v4207_v53 = vor.u32 %v5369_v42, %v4206_v26  ;;  %v5385_v26 = vld [vmem:[%s8157_s4 + $0xb4] sm:$0xf0] }
  0xba   :  { %v607_v46 = vmax.f32 %v599_v15, 0.0  ;;  %v5363_v15 = vld [vmem:[%s8157_s4 + $0x4] sm:$0xf0] }
  0xbb   :  { %v6709_v14 = vpop.f32.mrf.mxu3 }
  0xbd   :  { %v562_v19 = vpop.f32.mrf.mxu2  ;;  %1877 = vmatpush.bf16.msrb.mxu0 %v4231_v12  ;;  %v550_v44 = vpop.f32.mrf.mxu1  ;;  %v5365_v12 = vld [vmem:[%s8157_s4 + $0x14] sm:$0xf0] }
  0xbe   :  { %v586_v16 = vadd.f32 %v550_v44, %v392_v28  ;;  %v583_v35 = vadd.f32 %v562_v19, %v404_v60  ;;  %v4358_v28 = vld [vmem:[%s8157_s4 + $0x160] sm:$0xf]  ;;  %v5407_v19 = vld [vmem:[%s8157_s4 + $0x164] sm:$0xf0] }
  0xbf   :  { %v6730_v34 = vpop.f32.mrf.mxu0  ;;  %v4182_v60 = vld [vmem:[%s8157_s4] sm:$0xf]  ;;  %v4359_v36 = vor.u32 %v5407_v19, %v4358_v28  ;;  %v4431_v28 = vor.u32 %v5425_v61, %v4430_v58 }
  0xc0   :  { %v603_v54 = vadd.f32 %v6707_v24, %v586_v16  ;;  %v600_v6 = vadd.f32 %v6728_v17, %v583_v35  ;;  %v418_v16 = vadd.f32 %v6709_v14, %v6624_v59  ;;  %v5376_v35 = vld [vmem:[%s8157_s4 + $0x74] sm:$0xf]  ;;  %v5405_v59 = vld [vmem:[%s8157_s4 + $0x154] sm:$0xf0]  ;;  %v4183_v42 = vor.u32 %v5363_v15, %v4182_v60  ;;  %v5370_v60 = vld [vmem:[%s8157_s4 + $0x44] sm:$0xf] }
  0xc1   :  { %1878 = vmatpush.bf16.msrb.mxu0 %v4223_v29  ;;  %v4582_v44 = vld [vmem:[%s8157_s4 + $0x4a0] sm:$0xf] }
  0xc2   :  { %v611_v47 = vmax.f32 %v603_v54, 0.0  ;;  %v608_v38 = vmax.f32 %v600_v6, 0.0  ;;  %v4240_v54 = vld [vmem:[%s8157_s4 + $0x78] sm:$0xf0] }
  0xc3   :  { %v6752_v3 = vpop.f32.mrf.mxu3  ;;  %v4243_v45 = vor.u32 %v5376_v35, %v4240_v54  ;;  %v4326_v35 = vld [vmem:[%s8157_s4 + $0x120] sm:$0xf]  ;;  %v5399_v54 = vld [vmem:[%s8157_s4 + $0x124] sm:$0xf0] }
  0xc4   :  { %v6755_v11 = vpack.c.bf16 %v611_v47, %v607_v46  ;;  %v420_v46 = vadd.f32 %v6752_v3, %v6661_v32  ;;  %v4342_v32 = vld [vmem:[%s8157_s4 + $0x140] sm:$0xf]  ;;  %v5403_v3 = vld [vmem:[%s8157_s4 + $0x144] sm:$0xf0] }
  0xc5   :  { %v564_v30 = vpop.f32.mrf.mxu2  ;;  %1879 = vmatpush.bf16.msrb.mxu0 %v4215_v18  ;;  %v6763_v51 = vpop.f32.mrf.mxu1  ;;  %v4350_v18 = vld [vmem:[%s8157_s4 + $0x150] sm:$0xf] }
  0xc6   :  { %v587_v40 = vadd.f32 %v564_v30, %v406_v62  ;;  %1446 = vmatmul.bf16.vlgmr.msra.gmra.mxu1 %v6755_v11  ;;  %v4351_v47 = vor.u32 %v5405_v59, %v4350_v18  ;;  %v4232_v62 = vld [vmem:[%s8157_s4 + $0x68] sm:$0xf0]  ;;  %v4271_v30 = vor.u32 %v5385_v26, %v4270_v25  ;;  %v5379_v18 = vld [vmem:[%s8157_s4 + $0x84] sm:$0xf0]  ;;  %v4423_v26 = vor.u32 %v5423_v43, %v4422_v39 }
  0xc7   :  { %1890 = vmatpush.bf16.msra.mxu1 %v4303_v5  ;;  %v6792_v22 = vpop.f32.mrf.mxu0 }
  0xc8   :  { %v604_v23 = vadd.f32 %v6728_v17, %v587_v40  ;;  %1488 = vmatmul.bf16.vlgmr.msra.gmra.mxu0 %v6672_v48  ;;  %v4190_v48 = vld [vmem:[%s8157_s4 + $0x10] sm:$0xf]  ;;  %v4262_v40 = vld [vmem:[%s8157_s4 + $0xa0] sm:$0xf]  ;;  %v680_v59 = vadd.f32 %v6792_v22, %v6683_v57  ;;  %v5421_v57 = vld [vmem:[%s8157_s4 + $0x1d4] sm:$0xf0] }
  0xc9   :  { %1880 = vmatpush.bf16.msrb.mxu0 %v4207_v53  ;;  %v4191_v63 = vor.u32 %v5365_v12, %v4190_v48  ;;  %v4263_v48 = vor.u32 %v5383_v37, %v4262_v40  ;;  %v4334_v12 = vld [vmem:[%s8157_s4 + $0x130] sm:$0xf]  ;;  %v4296_v37 = vld [vmem:[%s8157_s4 + $0xe8] sm:$0xf0] }
  0xca   :  { %v612_v20 = vmax.f32 %v604_v23, 0.0 }
  0xcb   :  { %v576_v1 = vpop.f32.mrf.mxu3  ;;  %1891 = vmatpush.bf16.msra.mxu1 %v4295_v50  ;;  %v4235_v50 = vor.u32 %v5374_v27, %v4232_v62 }
  0xcc   :  { %v6794_v7 = vpack.c.bf16 %v612_v20, %v608_v38  ;;  %v584_v14 = vadd.f32 %v576_v1, %v418_v16  ;;  %v4343_v38 = vor.u32 %v5403_v3, %v4342_v32  ;;  %v5401_v20 = vld [vmem:[%s8157_s4 + $0x134] sm:$0xf0]  ;;  %v4254_v1 = vld [vmem:[%s8157_s4 + $0x90] sm:$0xf]  ;;  %v5390_v3 = vld [vmem:[%s8157_s4 + $0xe4] sm:$0xf] }
  0xcd   :  { %v6802_v29 = vpop.f32.mrf.mxu2  ;;  %1881 = vmatpush.bf16.msrb.mxu0 %v4199_v2  ;;  %v6815_v9 = vpop.f32.mrf.mxu1  ;;  %v5372_v2 = vld [vmem:[%s8157_s4 + $0x54] sm:$0xf]  ;;  %v4335_v21 = vor.u32 %v5401_v20, %v4334_v12  ;;  %v5395_v12 = vld [vmem:[%s8157_s4 + $0x104] sm:$0xf0] }
  0xce   :  { %1460 = vmatmul.bf16.vlgmr.msra.gmra.mxu2 %v6794_v7  ;;  %v601_v4 = vadd.f32 %v6840_v0, %v584_v14 }
  0xcf   :  { %1904 = vmatpush.bf16.msra.mxu2 %v4367_v55  ;;  %1892 = vmatpush.bf16.msra.mxu1 %v4287_v13  ;;  %v6856_v5 = vpop.f32.mrf.mxu0  ;;  %v5381_v13 = vld [vmem:[%s8157_s4 + $0x94] sm:$0xf0] }
  0xd0   :  { %v609_v55 = vmax.f32 %v601_v4, 0.0  ;;  %v4255_v16 = vor.u32 %v5381_v13, %v4254_v1  ;;  %v822_v4 = vld [vmem:[#allocation2 + $0x8] sm:$0x11]  ;;  %v4368_v1 = vld [vmem:[%s8157_s4 + $0x178] sm:$0xf0]  ;;  %v682_v13 = vadd.f32 %v6856_v5, %v6730_v34 }
  0xd1   :  { %1882 = vmatpush.bf16.msrb.mxu0 %v4191_v63  ;;  %v4398_v34 = vld [vmem:[%s8157_s4 + $0x1b0] sm:$0xf]  ;;  %v5417_v5 = vld [vmem:[%s8157_s4 + $0x1b4] sm:$0xf0] }
  0xd3   :  { %1905 = vmatpush.bf16.msra.mxu2 %v4359_v36  ;;  %v578_v6 = vpop.f32.mrf.mxu3  ;;  %1893 = vmatpush.bf16.msra.mxu1 %v4279_v10  ;;  %v4216_v36 = vld [vmem:[%s8157_s4 + $0x48] sm:$0xf0]  ;;  %v4246_v10 = vld [vmem:[%s8157_s4 + $0x80] sm:$0xf] }
  0xd4   :  { %v588_v53 = vadd.f32 %v578_v6, %v420_v46  ;;  %v4414_v46 = vld [vmem:[%s8157_s4 + $0x1d0] sm:$0xf]  ;;  %v4219_v22 = vor.u32 %v5370_v60, %v4216_v36  ;;  %v4247_v62 = vor.u32 %v5379_v18, %v4246_v10  ;;  %v4208_v6 = vld [vmem:[%s8157_s4 + $0x38] sm:$0xf0] }
  0xd5   :  { %1883 = vmatpush.bf16.msrb.mxu0 %v4183_v42  ;;  %v6873_v49 = vpop.f32.mrf.mxu2  ;;  %v6875_v23 = vpop.f32.mrf.mxu1  ;;  %v5392_v42 = vld [vmem:[%s8157_s4 + $0xf4] sm:$0xf]  ;;  %v4415_v40 = vor.u32 %v5421_v57, %v4414_v46  ;;  %v4399_v46 = vor.u32 %v5417_v5, %v4398_v34  ;;  %v4280_v57 = vld [vmem:[%s8157_s4 + $0xc8] sm:$0xf0] }
  0xd6   :  { %v605_v52 = vadd.f32 %v6840_v0, %v588_v53  ;;  %1502 = vmatmul.bf16.vlgmr.msrb.gmra.mxu1 %v6755_v11  ;;  %v4224_v11 = vld [vmem:[%s8157_s4 + $0x58] sm:$0xf0]  ;;  %v694_v20 = vadd.f32 %v6875_v23, %v6763_v51  ;;  %v5388_v51 = vld [vmem:[%s8157_s4 + $0xd4] sm:$0xf]  ;;  %v4344_v34 = vld [vmem:[%s8157_s4 + $0x148] sm:$0xf0] }
  0xd7   :  { %1906 = vmatpush.bf16.msra.mxu2 %v4351_v47  ;;  %1894 = vmatpush.bf16.msra.mxu1 %v4271_v30  ;;  %v4227_v63 = vor.u32 %v5372_v2, %v4224_v11  ;;  %v741_v14 = vpop.f32.mrf.mxu0  ;;  %v5368_v47 = vld [vmem:[%s8157_s4 + $0x34] sm:$0xf]  ;;  %v4318_v30 = vld [vmem:[%s8157_s4 + $0x110] sm:$0xf]  ;;  %v4310_v11 = vld [vmem:[%s8157_s4 + $0x100] sm:$0xf] }
  0xd8   :  { %v613_v8 = vmax.f32 %v605_v52, 0.0  ;;  %v788_v53 = vadd.f32 %v741_v14, %v680_v59  ;;  %v5419_v52 = vld [vmem:[%s8157_s4 + $0x1c4] sm:$0xf0]  ;;  %v4211_v58 = vor.u32 %v5368_v47, %v4208_v6  ;;  %v4319_v61 = vor.u32 %v5397_v33, %v4318_v30  ;;  %v4288_v23 = vld [vmem:[%s8157_s4 + $0xd8] sm:$0xf0] }
  0xd9   :  { %1932 = vmatpush.bf16.msra.mxu0 %v4243_v45  ;;  %v4304_v45 = vld [vmem:[%s8157_s4 + $0xf8] sm:$0xf0]  ;;  %v4407_v43 = vor.u32 %v5419_v52, %v4406_v41  ;;  %v4311_v60 = vor.u32 %v5395_v12, %v4310_v11  ;;  %v4291_v18 = vor.u32 %v5388_v51, %v4288_v23  ;;  %v5386_v59 = vld [vmem:[%s8157_s4 + $0xc4] sm:$0xf]  ;;  %v5415_v6 = vld [vmem:[%s8157_s4 + $0x1a4] sm:$0xf0] }
  0xda   :  { %v6903_v19 = vpack.c.bf16 %v613_v8, %v609_v55  ;;  %v4307_v32 = vor.u32 %v5392_v42, %v4304_v45  ;;  %v4299_v55 = vor.u32 %v5390_v3, %v4296_v37  ;;  %v5408_v8 = vld [vmem:[%s8157_s4 + $0x174] sm:$0xf]  ;;  %v5406_v14 = vld [vmem:[%s8157_s4 + $0x164] sm:$0xf] }
  0xdb   :  { %1907 = vmatpush.bf16.msra.mxu2 %v4343_v38  ;;  %v6914_v15 = vpop.f32.mrf.mxu3  ;;  %1895 = vmatpush.bf16.msra.mxu1 %v4263_v48  ;;  %v5366_v38 = vld [vmem:[%s8157_s4 + $0x24] sm:$0xf]  ;;  %v4200_v48 = vld [vmem:[%s8157_s4 + $0x28] sm:$0xf0]  ;;  %v4371_v36 = vor.u32 %v5408_v8, %v4368_v1  ;;  %v5404_v52 = vld [vmem:[%s8157_s4 + $0x154] sm:$0xf] }
  0xdc   :  { %1474 = vmatmul.bf16.vlgmr.msrb.gmra.mxu3 %v6903_v19  ;;  %v882_v1 = vld [vmem:[#allocation2] sm:$0xff] }
  0xdd   :  { %1933 = vmatpush.bf16.msra.mxu0 %v4235_v50  ;;  %v6935_v25 = vpop.f32.mrf.mxu1  ;;  %1918 = vmatpush.bf16.msrb.mxu3 %v4431_v28  ;;  %v6952_v27 = vpop.f32.mrf.mxu2  ;;  %v823_v50 = vsel %vm6810_vm11, 0, %v822_v4  ;;  %v796_v28 = vadd.f32 %v788_v53, %v6622_v56  ;;  %v5362_v4 = vld [vmem:[%s8157_s4 + $0x4] sm:$0xf]  ;;  %v4184_v53 = vld [vmem:[%s8157_s4 + $0x8] sm:$0xf0] }
  0xde   :  { %1516 = vmatmul.bf16.vlgmr.msrb.gmra.mxu2 %v6794_v7  ;;  %v4327_v7 = vor.u32 %v5399_v54, %v4326_v35  ;;  %824 = vst [vmem:[#allocation2 + $0x8] sm:$0x11] %v823_v50  ;;  %v5364_v35 = vld [vmem:[%s8157_s4 + $0x14] sm:$0xf]  ;;  %v4192_v54 = vld [vmem:[%s8157_s4 + $0x18] sm:$0xf0]  ;;  %v4283_v50 = vor.u32 %v5386_v59, %v4280_v57  ;;  %v4187_v8 = vor.u32 %v5362_v4, %v4184_v53 }
  0xdf   :  { %1908 = vmatpush.bf16.msra.mxu2 %v4335_v21  ;;  %1896 = vmatpush.bf16.msra.mxu1 %v4255_v16  ;;  %v4203_v21 = vor.u32 %v5366_v38, %v4200_v48  ;;  %v743_v16 = vpop.f32.mrf.mxu0  ;;  %v804_v42 = vmax.f32 %v796_v28, 0.0  ;;  %v4195_v30 = vor.u32 %v5364_v35, %v4192_v54  ;;  %v4272_v38 = vld [vmem:[%s8157_s4 + $0xb8] sm:$0xf0]  ;;  %v5378_v41 = vld [vmem:[%s8157_s4 + $0x84] sm:$0xf] }
  0xe1   :  { %1934 = vmatpush.bf16.msra.mxu0 %v4227_v63  ;;  %1919 = vmatpush.bf16.msrb.mxu3 %v4423_v26  ;;  %v4360_v26 = vld [vmem:[%s8157_s4 + $0x168] sm:$0xf0] }
  0xe2   :  { %v4363_v3 = vor.u32 %v5406_v14, %v4360_v26  ;;  %v5424_v14 = vld [vmem:[%s8157_s4 + $0x1f4] sm:$0xf]  ;;  %v4432_v26 = vld [vmem:[%s8157_s4 + $0x1f8] sm:$0xf0] }
  0xe3   :  { %1909 = vmatpush.bf16.msra.mxu2 %v4327_v7  ;;  %v6980_v2 = vpop.f32.mrf.mxu3  ;;  %1897 = vmatpush.bf16.msra.mxu1 %v4247_v62  ;;  %v792_v7 = vadd.f32 %v743_v16, %v682_v13  ;;  %v4390_v62 = vld [vmem:[%s8157_s4 + $0x1a0] sm:$0xf]  ;;  %v888_v13 = vld [vmem:[#allocation2 + $0x10] sm:$0x11]  ;;  %v4435_v53 = vor.u32 %v5424_v14, %v4432_v26 }
  0xe5   :  { %1935 = vmatpush.bf16.msra.mxu0 %v4219_v22  ;;  %v755_v39 = vpop.f32.mrf.mxu1  ;;  %1920 = vmatpush.bf16.msrb.mxu3 %v4415_v40  ;;  %v7030_v45 = vpop.f32.mrf.mxu2  ;;  %v828_v22 = vld [vmem:[#allocation2 + $0x28] sm:$0x11]  ;;  %v696_v40 = vadd.f32 %v6935_v25, %v6815_v9  ;;  %v800_v48 = vadd.f32 %v792_v7, %v6622_v56 }
  0xe6   :  { %v789_v63 = vadd.f32 %v755_v39, %v694_v20  ;;  %v829_v33 = vsel %vm6810_vm11, 0, %v828_v22  ;;  %v4382_v20 = vld [vmem:[%s8157_s4 + $0x190] sm:$0xf]  ;;  %v5495_v56 = vld [vmem:[%s8157_s4 + $0x424] sm:$0xf0] }
  0xe7   :  { %1946 = vmatpush.bf16.msrb.mxu1 %v4307_v32  ;;  %1910 = vmatpush.bf16.msra.mxu2 %v4319_v61  ;;  %830 = vst [vmem:[#allocation2 + $0x28] sm:$0x11] %v829_v33  ;;  %v4391_v61 = vor.u32 %v5415_v6, %v4390_v62  ;;  %v808_v16 = vmax.f32 %v800_v48, 0.0  ;;  %v4336_v62 = vld [vmem:[%s8157_s4 + $0x138] sm:$0xf0] }
  0xe8   :  { %v797_v10 = vadd.f32 %v789_v63, %v6707_v24  ;;  %v5402_v63 = vld [vmem:[%s8157_s4 + $0x144] sm:$0xf]  ;;  %v4256_v33 = vld [vmem:[%s8157_s4 + $0x98] sm:$0xf0] }
  0xe9   :  { %1936 = vmatpush.bf16.msra.mxu0 %v4211_v58  ;;  %1921 = vmatpush.bf16.msrb.mxu3 %v4407_v43  ;;  %v4352_v58 = vld [vmem:[%s8157_s4 + $0x158] sm:$0xf0] }
  0xea   :  { %v805_v47 = vmax.f32 %v797_v10, 0.0  ;;  %v4355_v28 = vor.u32 %v5404_v52, %v4352_v58  ;;  %v5411_v10 = vld [vmem:[%s8157_s4 + $0x184] sm:$0xf0] }
  0xeb   :  { %1947 = vmatpush.bf16.msrb.mxu1 %v4299_v55  ;;  %1911 = vmatpush.bf16.msra.mxu2 %v4311_v60  ;;  %v7043_v32 = vpop.f32.mrf.mxu3  ;;  %v5413_v55 = vld [vmem:[%s8157_s4 + $0x194] sm:$0xf0]  ;;  %v4374_v60 = vld [vmem:[%s8157_s4 + $0x180] sm:$0xf] }
  0xec   :  { %v831_v37 = vpack.c.bf16 %v805_v47, %v804_v42  ;;  %1530 = vmatmul.bf16.vlgmr.msra.gmra.mxu3 %v6903_v19  ;;  %v5384_v19 = vld [vmem:[%s8157_s4 + $0xb4] sm:$0xf]  ;;  %v4383_v5 = vor.u32 %v5413_v55, %v4382_v20  ;;  %v4347_v42 = vor.u32 %v5402_v63, %v4344_v34  ;;  %v4375_v6 = vor.u32 %v5411_v10, %v4374_v60  ;;  %v4408_v60 = vld [vmem:[%s8157_s4 + $0x1c8] sm:$0xf0]  ;;  %v4622_v10 = vld [vmem:[%s8157_s4 + $0x4f0] sm:$0xf] }
  0xed   :  { %1937 = vmatpush.bf16.msra.mxu0 %v4203_v21  ;;  %v757_v25 = vpop.f32.mrf.mxu1  ;;  %1922 = vmatpush.bf16.msrb.mxu3 %v4399_v46  ;;  %v4275_v23 = vor.u32 %v5384_v19, %v4272_v38  ;;  %v5382_v21 = vld [vmem:[%s8157_s4 + $0xa4] sm:$0xf]  ;;  %v5400_v47 = vld [vmem:[%s8157_s4 + $0x134] sm:$0xf]  ;;  %v722_v48 = vadd.f32 %v7043_v32, %v6914_v15  ;;  %v710_v34 = vadd.f32 %v7030_v45, %v6873_v49  ;;  %v4558_v49 = vld [vmem:[%s8157_s4 + $0x470] sm:$0xf] }
  0xee   :  { %v836_v11 = vshrl.u32 %v831_v37, 16  ;;  %v793_v12 = vadd.f32 %v757_v25, %v696_v40  ;;  %v839_v43 = vshll.u32 %v831_v37, 16  ;;  %v5422_v40 = vld [vmem:[%s8157_s4 + $0x1e4] sm:$0xf]  ;;  %v4424_v37 = vld [vmem:[%s8157_s4 + $0x1e8] sm:$0xf0] }
  0xef   :  { %1960 = vmatpush.bf16.msrb.mxu2 %v4371_v36  ;;  %1948 = vmatpush.bf16.msrb.mxu1 %v4291_v18  ;;  %v769_v18 = vpop.f32.mrf.mxu2  ;;  %v5398_v25 = vld [vmem:[%s8157_s4 + $0x124] sm:$0xf]  ;;  %v900_v38 = vld [vmem:[#allocation2 + $0x30] sm:$0x11]  ;;  %v4427_v20 = vor.u32 %v5422_v40, %v4424_v37  ;;  %v5505_v45 = vld [vmem:[%s8157_s4 + $0x474] sm:$0xf0] }
  0xf0   :  { %v838_v39 = vrot.slane %v836_v11, 7  ;;  %v801_v51 = vadd.f32 %v793_v12, %v6707_v24  ;;  %v4264_v24 = vld [vmem:[%s8157_s4 + $0xa8] sm:$0xf0]  ;;  %v894_v19 = vld [vmem:[#allocation2 + $0x20] sm:$0xff] }
  0xf1   :  { %1938 = vmatpush.bf16.msra.mxu0 %v4195_v30  ;;  %1923 = vmatpush.bf16.msrb.mxu3 %v4391_v61  ;;  %v4267_v7 = vor.u32 %v5382_v21, %v4264_v24  ;;  %v5380_v30 = vld [vmem:[%s8157_s4 + $0x94] sm:$0xf]  ;;  %v4328_v61 = vld [vmem:[%s8157_s4 + $0x128] sm:$0xf0]  ;;  %v5418_v24 = vld [vmem:[%s8157_s4 + $0x1c4] sm:$0xf] }
  0xf2   :  { %v841_v36 = vor.u32 %v839_v43, %v838_v39  ;;  %v849_v35 = vrot.slane %v838_v39, 4  ;;  %v809_v54 = vmax.f32 %v801_v51, 0.0  ;;  %v4259_v9 = vor.u32 %v5380_v30, %v4256_v33  ;;  %v5396_v51 = vld [vmem:[%s8157_s4 + $0x114] sm:$0xf] }
  0xf3   :  { %1961 = vmatpush.bf16.msrb.mxu2 %v4363_v3  ;;  %1949 = vmatpush.bf16.msrb.mxu1 %v4283_v50  ;;  %v7112_v59 = vpop.f32.mrf.mxu3  ;;  %v708_v3 = vadd.f32 %v6952_v27, %v6802_v29  ;;  %v4248_v50 = vld [vmem:[%s8157_s4 + $0x88] sm:$0xf0]  ;;  %v4339_v29 = vor.u32 %v5400_v47, %v4336_v62  ;;  %v4411_v47 = vor.u32 %v5418_v24, %v4408_v60  ;;  %v5412_v24 = vld [vmem:[%s8157_s4 + $0x194] sm:$0xf]  ;;  %v4384_v60 = vld [vmem:[%s8157_s4 + $0x198] sm:$0xf0] }
  0xf4   :  { %v7122_v46 = vsel %vm7089_vm2, %v841_v36, %v882_v1  ;;  %v889_v57 = vsel %vm6810_vm11, %v849_v35, %v888_v13  ;;  %v833_v22 = vpack.c.bf16 %v809_v54, %v808_v16  ;;  %v5420_v1 = vld [vmem:[%s8157_s4 + $0x1d4] sm:$0xf]  ;;  %v4416_v13 = vld [vmem:[%s8157_s4 + $0x1d8] sm:$0xf0]  ;;  %v724_v14 = vadd.f32 %v7112_v59, %v6980_v2  ;;  %v5394_v59 = vld [vmem:[%s8157_s4 + $0x104] sm:$0xf] }
  0xf5   :  { %1939 = vmatpush.bf16.msra.mxu0 %v4187_v8  ;;  %884 = vst [vmem:[#allocation2] sm:$0xff] %v7122_v46  ;;  %1924 = vmatpush.bf16.msrb.mxu3 %v4383_v5  ;;  %v790_v27 = vadd.f32 %v769_v18, %v708_v3  ;;  %v4251_v8 = vor.u32 %v5378_v41, %v4248_v50  ;;  %v5521_v18 = vld [vmem:[%s8157_s4 + $0x4f4] sm:$0xf0]  ;;  %v5416_v2 = vld [vmem:[%s8157_s4 + $0x1b4] sm:$0xf] }
  0xf6   :  { %890 = vst [vmem:[#allocation2 + $0x10] sm:$0x11] %v889_v57  ;;  %v852_v4 = vshrl.u32 %v833_v22, 16  ;;  %v855_v58 = vshll.u32 %v833_v22, 16  ;;  %v4419_v21 = vor.u32 %v5420_v1, %v4416_v13  ;;  %v5503_v57 = vld [vmem:[%s8157_s4 + $0x464] sm:$0xf0]  ;;  %v4559_v3 = vor.u32 %v5505_v45, %v4558_v49 }
  0xf7   :  { %1962 = vmatpush.bf16.msrb.mxu2 %v4355_v28  ;;  %1950 = vmatpush.bf16.msrb.mxu1 %v4275_v23  ;;  %v4331_v28 = vor.u32 %v5398_v25, %v4328_v61  ;;  %v798_v39 = vadd.f32 %v790_v27, %v6728_v17  ;;  %v4320_v23 = vld [vmem:[%s8157_s4 + $0x118] sm:$0xf0]  ;;  %v771_v63 = vpop.f32.mrf.mxu2  ;;  %v4614_v22 = vld [vmem:[%s8157_s4 + $0x4e0] sm:$0xf]  ;;  %v4312_v62 = vld [vmem:[%s8157_s4 + $0x108] sm:$0xf0] }
  0xf8   :  { %v854_v52 = vrot.slane %v852_v4, 7  ;;  %v4323_v16 = vor.u32 %v5396_v51, %v4320_v23  ;;  %v794_v35 = vadd.f32 %v771_v63, %v710_v34  ;;  %v4400_v4 = vld [vmem:[%s8157_s4 + $0x1b8] sm:$0xf0]  ;;  %v885_v61 = vld [vmem:[#allocation2 + $0x8] sm:$0xff]  ;;  %v4542_v13 = vld [vmem:[%s8157_s4 + $0x450] sm:$0xf] }
  0xf9   :  { %1925 = vmatpush.bf16.msrb.mxu3 %v4375_v6  ;;  %v806_v36 = vmax.f32 %v798_v39, 0.0  ;;  %v4606_v39 = vld [vmem:[%s8157_s4 + $0x4d0] sm:$0xf]  ;;  %v4534_v63 = vld [vmem:[%s8157_s4 + $0x440] sm:$0xf] }
  0xfa   :  { %v857_v11 = vor.u32 %v855_v58, %v854_v52  ;;  %v865_v12 = vrot.slane %v854_v52, 4  ;;  %v4315_v58 = vor.u32 %v5394_v59, %v4312_v62  ;;  %v5499_v34 = vld [vmem:[%s8157_s4 + $0x444] sm:$0xf0]  ;;  %v5497_v59 = vld [vmem:[%s8157_s4 + $0x434] sm:$0xf0] }
  0xfb   :  { %1963 = vmatpush.bf16.msrb.mxu2 %v4347_v42  ;;  %1951 = vmatpush.bf16.msrb.mxu1 %v4267_v7  ;;  %v783_v55 = vpop.f32.mrf.mxu3  ;;  %v4550_v42 = vld [vmem:[%s8157_s4 + $0x460] sm:$0xf]  ;;  %v5519_v7 = vld [vmem:[%s8157_s4 + $0x4e4] sm:$0xf0] }
  0xfc   :  { %v7170_v15 = vsel %vm7089_vm2, %v857_v11, %v894_v19  ;;  %v901_v32 = vsel %vm6810_vm11, %v865_v12, %v900_v38  ;;  %v791_v43 = vadd.f32 %v783_v55, %v722_v48  ;;  %v4166_v30 = vld [vmem:[#allocation2] sm:$0xf]  ;;  %v5358_v33 = vld [vmem:[#allocation2 + $0x4] sm:$0xf]  ;;  %v4403_v38 = vor.u32 %v5416_v2, %v4400_v4  ;;  %v891_v48 = vld [vmem:[#allocation2 + $0x18] sm:$0x11] }
  0xfd   :  { %1974 = vmatpush.bf16.msra.mxu3 %v4435_v53  ;;  %896 = vst [vmem:[#allocation2 + $0x20] sm:$0xff] %v7170_v15  ;;  %v802_v53 = vadd.f32 %v794_v35, %v6728_v17  ;;  %v4551_v17 = vor.u32 %v5503_v57, %v4550_v42  ;;  %v4615_v11 = vor.u32 %v5519_v7, %v4614_v22  ;;  %v5414_v12 = vld [vmem:[%s8157_s4 + $0x1a4] sm:$0xf]  ;;  %v4526_v57 = vld [vmem:[%s8157_s4 + $0x430] sm:$0xf]  ;;  %v947_v62 = vshrl.u32 %v7170_v15, 16 }
  0xfe   :  { %902 = vst [vmem:[#allocation2 + $0x30] sm:$0x11] %v901_v32  ;;  %v799_v5 = vadd.f32 %v791_v43, %v6840_v0  ;;  %v5517_v32 = vld [vmem:[%s8157_s4 + $0x4d4] sm:$0xf0]  ;;  %v5410_v22 = vld [vmem:[%s8157_s4 + $0x184] sm:$0xf] }
  0xff   :  { %1964 = vmatpush.bf16.msrb.mxu2 %v4339_v29  ;;  %1952 = vmatpush.bf16.msrb.mxu1 %v4259_v9  ;;  %v4623_v29 = vor.u32 %v5521_v18, %v4622_v10  ;;  %v810_v55 = vmax.f32 %v802_v53, 0.0  ;;  %v4607_v35 = vor.u32 %v5517_v32, %v4606_v39  ;;  %v897_v10 = vld [vmem:[#allocation2 + $0x28] sm:$0xff]  ;;  %v903_v18 = vld [vmem:[#allocation2 + $0x38] sm:$0x11]  ;;  %v4678_v39 = vld [vmem:[%s8157_s4 + $0x560] sm:$0xf] }
 0x100   :  { %v807_v54 = vmax.f32 %v799_v5, 0.0  ;;  %v4598_v5 = vld [vmem:[%s8157_s4 + $0x4c0] sm:$0xf]  ;;  %v4376_v7 = vld [vmem:[%s8157_s4 + $0x188] sm:$0xf0] }
 0x101   :  { %1975 = vmatpush.bf16.msra.mxu3 %v4427_v20  ;;  %v4392_v20 = vld [vmem:[%s8157_s4 + $0x1a8] sm:$0xf0]  ;;  %v5535_v32 = vld [vmem:[%s8157_s4 + $0x564] sm:$0xf0] }
 0x102   :  { %v832_v26 = vpack.c.bf16 %v807_v54, %v806_v36  ;;  %v5515_v54 = vld [vmem:[%s8157_s4 + $0x4c4] sm:$0xf0] }
 0x103   :  { %1965 = vmatpush.bf16.msrb.mxu2 %v4331_v28  ;;  %1953 = vmatpush.bf16.msrb.mxu1 %v4251_v8  ;;  %v785_v6 = vpop.f32.mrf.mxu3  ;;  %v5501_v28 = vld [vmem:[%s8157_s4 + $0x454] sm:$0xf0]  ;;  %v4599_v42 = vor.u32 %v5515_v54, %v4598_v5  ;;  %v4502_v54 = vld [vmem:[%s8157_s4 + $0x400] sm:$0xf] }
 0x104   :  { %v843_v40 = vshrl.u32 %v832_v26, 16  ;;  %v795_v37 = vadd.f32 %v785_v6, %v724_v14  ;;  %v5360_v41 = vld [vmem:[#allocation2 + $0x1c] sm:$0xf0]  ;;  %v4168_v50 = vld [vmem:[#allocation2 + $0x20] sm:$0xf0]  ;;  %v846_v25 = vshll.u32 %v832_v26, 16  ;;  %v4543_v36 = vor.u32 %v5501_v28, %v4542_v13 }
 0x105   :  { %1976 = vmatpush.bf16.msra.mxu3 %v4419_v21  ;;  %v7229_v27 = vor.u32 %v5360_v41, %v4166_v30  ;;  %v7231_v52 = vor.u32 %v5358_v33, %v4168_v50  ;;  %v4395_v21 = vor.u32 %v5414_v12, %v4392_v20  ;;  %v4387_v14 = vor.u32 %v5412_v24, %v4384_v60  ;;  %v4590_v30 = vld [vmem:[%s8157_s4 + $0x4b0] sm:$0xf]  ;;  %v5513_v33 = vld [vmem:[%s8157_s4 + $0x4b4] sm:$0xf0]  ;;  %v4518_v41 = vld [vmem:[%s8157_s4 + $0x420] sm:$0xf] }
 0x106   :  { %v845_v9 = vrot.slane %v843_v40, 7  ;;  %v803_v19 = vadd.f32 %v795_v37, %v6840_v0  ;;  %v4535_v26 = vor.u32 %v5499_v34, %v4534_v63  ;;  %v950_v6 = vshll.u32 %v7170_v15, 16  ;;  %v916_v15 = vld [vmem:[#allocation2 + $0x30] sm:$0x11]  ;;  %v5553_v12 = vld [vmem:[%s8157_s4 + $0x5f4] sm:$0xf0] }
 0x107   :  { %1966 = vmatpush.bf16.msrb.mxu2 %v4323_v16  ;;  %1884 = vmatmul.bf16.vlgmr.msrb.gmra.mxu0 %v7229_v27  ;;  %v4379_v40 = vor.u32 %v5410_v22, %v4376_v7  ;;  %v922_v37 = vshll.u32 %v7122_v46, 16  ;;  %v4527_v50 = vor.u32 %v5497_v59, %v4526_v57  ;;  %v4510_v20 = vld [vmem:[%s8157_s4 + $0x410] sm:$0xf]  ;;  %v5504_v57 = vld [vmem:[%s8157_s4 + $0x474] sm:$0xf] }
 0x108   :  { %1898 = vmatmul.bf16.vlgmr.msra.gmra.mxu1 %v7231_v52  ;;  %v848_v8 = vor.u32 %v846_v25, %v845_v9  ;;  %v850_v0 = vrot.slane %v845_v9, 4  ;;  %v811_v1 = vmax.f32 %v803_v19, 0.0  ;;  %2389 = vmatpush.bf16.msrb.mxu0 %v4559_v3  ;;  %v919_v3 = vshrl.u32 %v7122_v46, 16  ;;  %v5511_v46 = vld [vmem:[%s8157_s4 + $0x4a4] sm:$0xf0] }
 0x109   :  { %1977 = vmatpush.bf16.msra.mxu3 %v4411_v47  ;;  %2403 = vmatpush.bf16.msra.mxu1 %v4623_v29  ;;  %v4591_v29 = vor.u32 %v5513_v33, %v4590_v30  ;;  %v952_v9 = vrot.slane %v950_v6, 5  ;;  %v4686_v25 = vld [vmem:[%s8157_s4 + $0x570] sm:$0xf]  ;;  %v956_v19 = vshll.u32 %v916_v15, 16  ;;  %v4560_v22 = vld [vmem:[%s8157_s4 + $0x478] sm:$0xf0] }
 0x10a   :  { %v7256_v43 = vsel %vm7089_vm2, %v848_v8, %v885_v61  ;;  %v892_v51 = vsel %vm6810_vm11, %v850_v0, %v891_v48  ;;  %v834_v23 = vpack.c.bf16 %v811_v1, %v810_v55  ;;  %v914_v61 = vld [vmem:[#allocation2 + $0x10] sm:$0x11]  ;;  %v5493_v55 = vld [vmem:[%s8157_s4 + $0x414] sm:$0xf0]  ;;  %v4519_v8 = vor.u32 %v5495_v56, %v4518_v41  ;;  %v4624_v59 = vld [vmem:[%s8157_s4 + $0x4f8] sm:$0xf0] }
 0x10b   :  { %1967 = vmatpush.bf16.msrb.mxu2 %v4315_v58  ;;  %887 = vst [vmem:[#allocation2 + $0x8] sm:$0xff] %v7256_v43  ;;  %v949_v58 = vrot.slane %v947_v62, 4  ;;  %v4750_v48 = vld [vmem:[%s8157_s4 + $0x5f0] sm:$0xf]  ;;  %v4583_v0 = vor.u32 %v5511_v46, %v4582_v44  ;;  %v928_v1 = vshll.u32 %v914_v61, 16  ;;  %v4563_v41 = vor.u32 %v5504_v57, %v4560_v22 }
 0x10c   :  { %893 = vst [vmem:[#allocation2 + $0x18] sm:$0x11] %v892_v51  ;;  %v859_v16 = vshrl.u32 %v834_v23, 16  ;;  %2390 = vmatpush.bf16.msrb.mxu0 %v4551_v17  ;;  %v862_v45 = vshll.u32 %v834_v23, 16  ;;  %v921_v17 = vrot.slane %v919_v3, 4  ;;  %v958_v23 = vrot.slane %v956_v19, 5 }
 0x10d   :  { %1978 = vmatpush.bf16.msra.mxu3 %v4403_v38  ;;  %2404 = vmatpush.bf16.msra.mxu1 %v4615_v11  ;;  %v5537_v38 = vld [vmem:[%s8157_s4 + $0x574] sm:$0xf0]  ;;  %v924_v11 = vrot.slane %v922_v37, 5  ;;  %v953_v13 = vor.u32 %v952_v9, %v949_v58  ;;  %v4742_v51 = vld [vmem:[%s8157_s4 + $0x5e0] sm:$0xf]  ;;  %v4751_v24 = vor.u32 %v5553_v12, %v4750_v48 }
 0x10e   :  { %v861_v49 = vrot.slane %v859_v16, 7  ;;  %v5520_v7 = vld [vmem:[%s8157_s4 + $0x4f4] sm:$0xf]  ;;  %v4670_v62 = vld [vmem:[%s8157_s4 + $0x550] sm:$0xf] }
 0x10f   :  { %v925_v60 = vor.u32 %v924_v11, %v921_v17  ;;  %v5533_v33 = vld [vmem:[%s8157_s4 + $0x554] sm:$0xf0]  ;;  %v4734_v3 = vld [vmem:[%s8157_s4 + $0x5d0] sm:$0xf]  ;;  %v4627_v56 = vor.u32 %v5520_v7, %v4624_v59  ;;  %v4552_v46 = vld [vmem:[%s8157_s4 + $0x468] sm:$0xf0] }
 0x110   :  { %v864_v47 = vor.u32 %v862_v45, %v861_v49  ;;  %v866_v2 = vrot.slane %v861_v49, 4  ;;  %2391 = vmatpush.bf16.msrb.mxu0 %v4543_v36  ;;  %v5491_v49 = vld [vmem:[%s8157_s4 + $0x404] sm:$0xf0]  ;;  %v4511_v45 = vor.u32 %v5493_v55, %v4510_v20  ;;  %v4671_v58 = vor.u32 %v5533_v33, %v4670_v62  ;;  %v4616_v61 = vld [vmem:[%s8157_s4 + $0x4e8] sm:$0xf0] }
 0x111   :  { %1979 = vmatpush.bf16.msra.mxu3 %v4395_v21  ;;  %2405 = vmatpush.bf16.msra.mxu1 %v4607_v35  ;;  %v4687_v21 = vor.u32 %v5537_v38, %v4686_v25  ;;  %v5551_v35 = vld [vmem:[%s8157_s4 + $0x5e4] sm:$0xf0]  ;;  %v926_v6 = vrot.slane %v925_v60, 4  ;;  %v5518_v25 = vld [vmem:[%s8157_s4 + $0x4e4] sm:$0xf] }
 0x112   :  { %v7302_v4 = vsel %vm7089_vm2, %v864_v47, %v897_v10  ;;  %v904_v53 = vsel %vm6810_vm11, %v866_v2, %v903_v18  ;;  %v4174_v28 = vld [vmem:[#allocation2 + $0x8] sm:$0xf]  ;;  %v5359_v34 = vld [vmem:[#allocation2 + $0xc] sm:$0xf]  ;;  %v4566_v18 = vld [vmem:[%s8157_s4 + $0x480] sm:$0xf]  ;;  %v4679_v47 = vor.u32 %v5535_v32, %v4678_v39  ;;  %v4743_v2 = vor.u32 %v5551_v35, %v4742_v51 }
 0x113   :  { %899 = vst [vmem:[#allocation2 + $0x28] sm:$0xff] %v7302_v4  ;;  %v4662_v19 = vld [vmem:[%s8157_s4 + $0x540] sm:$0xf]  ;;  %v5531_v17 = vld [vmem:[%s8157_s4 + $0x544] sm:$0xf0]  ;;  %v961_v51 = vshrl.u32 %v7302_v4, 16 }
 0x114   :  { %905 = vst [vmem:[#allocation2 + $0x38] sm:$0x11] %v904_v53  ;;  %2392 = vmatpush.bf16.msrb.mxu0 %v4535_v26  ;;  %v930_v26 = vrot.slane %v928_v1, 5  ;;  %v5549_v53 = vld [vmem:[%s8157_s4 + $0x5d4] sm:$0xf0]  ;;  %v933_v35 = vshrl.u32 %v7256_v43, 16 }
 0x115   :  { %1980 = vmatpush.bf16.msra.mxu3 %v4387_v14  ;;  %2406 = vmatpush.bf16.msra.mxu1 %v4599_v42  ;;  %v5507_v14 = vld [vmem:[%s8157_s4 + $0x484] sm:$0xf0]  ;;  %v954_v42 = vrot.slane %v953_v13, 4  ;;  %v4735_v9 = vor.u32 %v5549_v53, %v4734_v3  ;;  %v4726_v11 = vld [vmem:[%s8157_s4 + $0x5c0] sm:$0xf] }
 0x116   :  { %v4567_v15 = vor.u32 %v5507_v14, %v4566_v18  ;;  %v931_v37 = vsel %vm6029_vm4, %v926_v6, %v930_v26  ;;  %v5547_v12 = vld [vmem:[%s8157_s4 + $0x5c4] sm:$0xf0]  ;;  %v4544_v13 = vld [vmem:[%s8157_s4 + $0x458] sm:$0xf0]  ;;  %v4654_v32 = vld [vmem:[%s8157_s4 + $0x530] sm:$0xf] }
 0x117   :  { %1940 = vmatmul.bf16.vlgmr.msra.gmra.mxu0 %v7229_v27  ;;  %v4574_v27 = vld [vmem:[%s8157_s4 + $0x490] sm:$0xf]  ;;  %v959_v30 = vsel %vm6029_vm4, %v954_v42, %v958_v23  ;;  %v2053_v38 = vunpack.c.l.b16 %v931_v37  ;;  %v2054_v48 = vunpack.c.h.b16 %v931_v37  ;;  %v4727_v1 = vor.u32 %v5547_v12, %v4726_v11  ;;  %v4608_v39 = vld [vmem:[%s8157_s4 + $0x4d8] sm:$0xf0]  ;;  %v4536_v60 = vld [vmem:[%s8157_s4 + $0x448] sm:$0xf0] }
 0x118   :  { %1954 = vmatmul.bf16.vlgmr.msrb.gmra.mxu1 %v7231_v52  ;;  %2393 = vmatpush.bf16.msrb.mxu0 %v4527_v50  ;;  %v5509_v52 = vld [vmem:[%s8157_s4 + $0x494] sm:$0xf0]  ;;  %v2057_v44 = vunpack.c.l.b16 %v959_v30  ;;  %v2058_v50 = vunpack.c.h.b16 %v959_v30  ;;  %v964_v23 = vshll.u32 %v7302_v4, 16  ;;  %v5498_v4 = vld [vmem:[%s8157_s4 + $0x444] sm:$0xf]  ;;  %v963_v42 = vrot.slane %v961_v51, 4 }
 0x119   :  { %1981 = vmatpush.bf16.msra.mxu3 %v4379_v40  ;;  %2407 = vmatpush.bf16.msra.mxu1 %v4591_v29  ;;  %v4575_v10 = vor.u32 %v5509_v52, %v4574_v27  ;;  %v4503_v40 = vor.u32 %v5491_v49, %v4502_v54  ;;  %v5502_v29 = vld [vmem:[%s8157_s4 + $0x464] sm:$0xf]  ;;  %v5500_v27 = vld [vmem:[%s8157_s4 + $0x454] sm:$0xf]  ;;  %v4663_v52 = vor.u32 %v5531_v17, %v4662_v19  ;;  %v936_v54 = vshll.u32 %v7256_v43, 16 }
 0x11a   :  { %v5361_v63 = vld [vmem:[#allocation2 + $0x24] sm:$0xf0]  ;;  %v4176_v5 = vld [vmem:[#allocation2 + $0x28] sm:$0xf0]  ;;  %v4555_v20 = vor.u32 %v5502_v29, %v4552_v46  ;;  %v7428_v55 = vpack.c.b16 %v2057_v44, %v2053_v38  ;;  %v5514_v49 = vld [vmem:[%s8157_s4 + $0x4c4] sm:$0xf]  ;;  %v4539_v22 = vor.u32 %v5498_v4, %v4536_v60 }
 0x11b   :  { %v7355_v16 = vor.u32 %v5361_v63, %v4174_v28  ;;  %v7357_v36 = vor.u32 %v5359_v34, %v4176_v5  ;;  %v5516_v28 = vld [vmem:[%s8157_s4 + $0x4d4] sm:$0xf]  ;;  %v5529_v63 = vld [vmem:[%s8157_s4 + $0x534] sm:$0xf0]  ;;  %v4718_v34 = vld [vmem:[%s8157_s4 + $0x5b0] sm:$0xf] }
 0x11c   :  { %2394 = vmatpush.bf16.msrb.mxu0 %v4519_v8  ;;  %v7430_v8 = vpack.c.b16 %v2058_v50, %v2054_v48  ;;  %v5545_v5 = vld [vmem:[%s8157_s4 + $0x5b4] sm:$0xf0]  ;;  %v4655_v18 = vor.u32 %v5529_v63, %v4654_v32  ;;  %v4646_v26 = vld [vmem:[%s8157_s4 + $0x520] sm:$0xf]  ;;  %v5527_v43 = vld [vmem:[%s8157_s4 + $0x524] sm:$0xf0] }
 0x11d   :  { %2408 = vmatpush.bf16.msra.mxu1 %v4583_v0  ;;  %1912 = vmatmul.bf16.vlgmr.msra.gmra.mxu2 %v7355_v16  ;;  %v4619_v0 = vor.u32 %v5518_v25, %v4616_v61  ;;  %v4719_v14 = vor.u32 %v5545_v5, %v4718_v34  ;;  %v966_v57 = vrot.slane %v964_v23, 5  ;;  %v4710_v7 = vld [vmem:[%s8157_s4 + $0x5a0] sm:$0xf]  ;;  %v5496_v62 = vld [vmem:[%s8157_s4 + $0x434] sm:$0xf]  ;;  %v935_v6 = vrot.slane %v933_v35, 4 }
 0x11e   :  { %1926 = vmatmul.bf16.vlgmr.msrb.gmra.mxu3 %v7357_v36  ;;  %2417 = vmatpush.bf16.msra.mxu2 %v4687_v21  ;;  %v4547_v21 = vor.u32 %v5500_v27, %v4544_v13  ;;  %v938_v30 = vrot.slane %v936_v54, 5  ;;  %v4528_v3 = vld [vmem:[%s8157_s4 + $0x438] sm:$0xf0]  ;;  %v5512_v53 = vld [vmem:[%s8157_s4 + $0x4b4] sm:$0xf] }
 0x11f   :  { %2431 = vmatpush.bf16.msrb.mxu3 %v4751_v24  ;;  %v4611_v24 = vor.u32 %v5516_v28, %v4608_v39  ;;  %v4702_v44 = vld [vmem:[%s8157_s4 + $0x590] sm:$0xf]  ;;  %v5541_v50 = vld [vmem:[%s8157_s4 + $0x594] sm:$0xf0]  ;;  %v5494_v29 = vld [vmem:[%s8157_s4 + $0x424] sm:$0xf]  ;;  %v4531_v46 = vor.u32 %v5496_v62, %v4528_v3 }
 0x120   :  { %2395 = vmatpush.bf16.msrb.mxu0 %v4511_v45  ;;  %v4600_v45 = vld [vmem:[%s8157_s4 + $0x4c8] sm:$0xf0]  ;;  %v5510_v25 = vld [vmem:[%s8157_s4 + $0x4a4] sm:$0xf]  ;;  %v939_v61 = vor.u32 %v938_v30, %v935_v6  ;;  %v4630_v48 = vld [vmem:[%s8157_s4 + $0x500] sm:$0xf]  ;;  %v4703_v12 = vor.u32 %v5541_v50, %v4702_v44 }
 0x121   :  { %2409 = vmatpush.bf16.msra.mxu1 %v4575_v10  ;;  %v917_v10 = vld [vmem:[#allocation2 + $0x38] sm:$0x11]  ;;  %v4603_v59 = vor.u32 %v5514_v49, %v4600_v45  ;;  %v4584_v38 = vld [vmem:[%s8157_s4 + $0x4a8] sm:$0xf0]  ;;  %v5523_v17 = vld [vmem:[%s8157_s4 + $0x504] sm:$0xf0] }
 0x122   :  { %2418 = vmatpush.bf16.msra.mxu2 %v4679_v47  ;;  %v5543_v47 = vld [vmem:[%s8157_s4 + $0x5a4] sm:$0xf0]  ;;  %v970_v33 = vshll.u32 %v917_v10, 16  ;;  %v4688_v13 = vld [vmem:[%s8157_s4 + $0x578] sm:$0xf0]  ;;  %v4587_v32 = vor.u32 %v5510_v25, %v4584_v38  ;;  %v940_v63 = vrot.slane %v939_v61, 4  ;;  %v4631_v4 = vor.u32 %v5523_v17, %v4630_v48 }
 0x123   :  { %2432 = vmatpush.bf16.msrb.mxu3 %v4743_v2  ;;  %v915_v2 = vld [vmem:[#allocation2 + $0x18] sm:$0x11]  ;;  %v4711_v37 = vor.u32 %v5543_v47, %v4710_v7  ;;  %v5552_v28 = vld [vmem:[%s8157_s4 + $0x5f4] sm:$0xf]  ;;  %v4504_v47 = vld [vmem:[%s8157_s4 + $0x408] sm:$0xf0] }
 0x124   :  { %2396 = vmatpush.bf16.msrb.mxu0 %v4503_v40  ;;  %v4592_v40 = vld [vmem:[%s8157_s4 + $0x4b8] sm:$0xf0]  ;;  %v972_v19 = vrot.slane %v970_v33, 5  ;;  %v5492_v23 = vld [vmem:[%s8157_s4 + $0x414] sm:$0xf] }
 0x125   :  { %2410 = vmatpush.bf16.msra.mxu1 %v4567_v15  ;;  %v4647_v15 = vor.u32 %v5527_v43, %v4646_v26  ;;  %v4752_v51 = vld [vmem:[%s8157_s4 + $0x5f8] sm:$0xf0]  ;;  %v5532_v3 = vld [vmem:[%s8157_s4 + $0x554] sm:$0xf]  ;;  %v4664_v50 = vld [vmem:[%s8157_s4 + $0x548] sm:$0xf0] }
 0x126   :  { %2419 = vmatpush.bf16.msra.mxu2 %v4671_v58  ;;  %v4595_v58 = vor.u32 %v5512_v53, %v4592_v40  ;;  %v4512_v5 = vld [vmem:[%s8157_s4 + $0x418] sm:$0xf0]  ;;  %v4755_v49 = vor.u32 %v5552_v28, %v4752_v51  ;;  %v5544_v48 = vld [vmem:[%s8157_s4 + $0x5b4] sm:$0xf] }
 0x127   :  { %2433 = vmatpush.bf16.msrb.mxu3 %v4735_v9  ;;  %2397 = vmatmul.bf16.vlgmr.msrb.gmra.mxu0 %v7428_v55  ;;  %v4520_v9 = vld [vmem:[%s8157_s4 + $0x428] sm:$0xf0]  ;;  %v4515_v26 = vor.u32 %v5492_v23, %v4512_v5  ;;  %v4656_v38 = vld [vmem:[%s8157_s4 + $0x538] sm:$0xf0]  ;;  %v5540_v51 = vld [vmem:[%s8157_s4 + $0x594] sm:$0xf] }
 0x128   :  { %2445 = vmatpush.bf16.msra.mxu0 %v4563_v41  ;;  %2411 = vmatmul.bf16.vlgmr.msra.gmra.mxu1 %v7430_v8  ;;  %v942_v41 = vshll.u32 %v915_v2, 16  ;;  %v4523_v39 = vor.u32 %v5494_v29, %v4520_v9  ;;  %v5506_v2 = vld [vmem:[%s8157_s4 + $0x484] sm:$0xf]  ;;  %v4720_v17 = vld [vmem:[%s8157_s4 + $0x5b8] sm:$0xf0] }
 0x129   :  { %2459 = vmatpush.bf16.msrb.mxu1 %v4627_v56  ;;  %v967_v56 = vor.u32 %v966_v57, %v963_v42  ;;  %v4744_v42 = vld [vmem:[%s8157_s4 + $0x5e8] sm:$0xf0]  ;;  %v5490_v57 = vld [vmem:[%s8157_s4 + $0x404] sm:$0xf]  ;;  %v4704_v23 = vld [vmem:[%s8157_s4 + $0x598] sm:$0xf0] }
 0x12a   :  { %2420 = vmatpush.bf16.msra.mxu2 %v4663_v52  ;;  %v944_v27 = vrot.slane %v942_v41, 5  ;;  %v4747_v33 = vor.u32 %v5550_v31, %v4744_v42  ;;  %v4507_v53 = vor.u32 %v5490_v57, %v4504_v47  ;;  %v5546_v29 = vld [vmem:[%s8157_s4 + $0x5c4] sm:$0xf]  ;;  %v4707_v5 = vor.u32 %v5540_v51, %v4704_v23  ;;  %v5557_v51 = vld [vmem:[%s8159_s6 + $0x18] sm:$0xff] }
 0x12b   :  { %2434 = vmatpush.bf16.msrb.mxu3 %v4727_v1  ;;  %v968_v52 = vrot.slane %v967_v56, 4  ;;  %v5536_v1 = vld [vmem:[%s8157_s4 + $0x574] sm:$0xf]  ;;  %v5530_v56 = vld [vmem:[%s8157_s4 + $0x544] sm:$0xf]  ;;  %v5565_v23 = vld [vmem:[%s8159_s6 + $0x58] sm:$0xff] }
 0x12c   :  { %2446 = vmatpush.bf16.msra.mxu0 %v4555_v20  ;;  %v4694_v20 = vld [vmem:[%s8157_s4 + $0x580] sm:$0xf]  ;;  %v945_v35 = vsel %vm6029_vm4, %v940_v63, %v944_v27  ;;  %v4691_v54 = vor.u32 %v5536_v1, %v4688_v13  ;;  %v4667_v25 = vor.u32 %v5530_v56, %v4664_v50  ;;  %v5571_v56 = vld [vmem:[%s8159_s6 + $0x88] sm:$0xff]  ;;  %v5577_v50 = vld [vmem:[%s8159_s6 + $0xb8] sm:$0xff] }
 0x12d   :  { %2460 = vmatpush.bf16.msrb.mxu1 %v4619_v0  ;;  %1968 = vmatmul.bf16.vlgmr.msrb.gmra.mxu2 %v7355_v16  ;;  %v4638_v16 = vld [vmem:[%s8157_s4 + $0x510] sm:$0xf]  ;;  %v5539_v0 = vld [vmem:[%s8157_s4 + $0x584] sm:$0xf0]  ;;  %v973_v34 = vsel %vm6029_vm4, %v968_v52, %v972_v19  ;;  %v2056_v7 = vunpack.c.h.b16 %v945_v35  ;;  %v5528_v19 = vld [vmem:[%s8157_s4 + $0x534] sm:$0xf] }
 0x12e   :  { %1982 = vmatmul.bf16.vlgmr.msra.gmra.mxu3 %v7357_v36  ;;  %2421 = vmatpush.bf16.msra.mxu2 %v4655_v18  ;;  %v5525_v36 = vld [vmem:[%s8157_s4 + $0x514] sm:$0xf0]  ;;  %v4695_v60 = vor.u32 %v5539_v0, %v4694_v20  ;;  %v2059_v45 = vunpack.c.l.b16 %v973_v34  ;;  %v2060_v10 = vunpack.c.h.b16 %v973_v34  ;;  %v5534_v18 = vld [vmem:[%s8157_s4 + $0x564] sm:$0xf]  ;;  %v4712_v0 = vld [vmem:[%s8157_s4 + $0x5a8] sm:$0xf0] }
 0x12f   :  { %2435 = vmatpush.bf16.msrb.mxu3 %v4719_v14  ;;  %v4639_v11 = vor.u32 %v5525_v36, %v4638_v16  ;;  %v4680_v14 = vld [vmem:[%s8157_s4 + $0x568] sm:$0xf0]  ;;  %v4736_v16 = vld [vmem:[%s8157_s4 + $0x5d8] sm:$0xf0]  ;;  %v5542_v20 = vld [vmem:[%s8157_s4 + $0x5a4] sm:$0xf] }
 0x130   :  { %2447 = vmatpush.bf16.msra.mxu0 %v4547_v21  ;;  %v5508_v21 = vld [vmem:[%s8157_s4 + $0x494] sm:$0xf]  ;;  %v4683_v62 = vor.u32 %v5534_v18, %v4680_v14  ;;  %v7590_v30 = vpack.c.b16 %v2060_v10, %v2056_v7  ;;  %v4715_v28 = vor.u32 %v5542_v20, %v4712_v0  ;;  %vm2663_vm4 = vcmask 523264  }
 0x131   :  { %2461 = vmatpush.bf16.msrb.mxu1 %v4611_v24  ;;  %v4576_v24 = vld [vmem:[%s8157_s4 + $0x498] sm:$0xf0] }
 0x132   :  { %2422 = vmatpush.bf16.msra.mxu2 %v4647_v15  ;;  %v4579_v43 = vor.u32 %v5508_v21, %v4576_v24  ;;  %v4672_v15 = vld [vmem:[%s8157_s4 + $0x558] sm:$0xf0]  ;;  %v5522_v21 = vld [vmem:[%s8157_s4 + $0x504] sm:$0xf] }
 0x133   :  { %2436 = vmatpush.bf16.msrb.mxu3 %v4711_v37  ;;  %v5548_v37 = vld [vmem:[%s8157_s4 + $0x5d4] sm:$0xf]  ;;  %v4675_v36 = vor.u32 %v5532_v3, %v4672_v15 }
 0x134   :  { %2448 = vmatpush.bf16.msra.mxu0 %v4539_v22  ;;  %v2055_v22 = vunpack.c.l.b16 %v945_v35  ;;  %v4739_v41 = vor.u32 %v5548_v37, %v4736_v16  ;;  %v4696_v35 = vld [vmem:[%s8157_s4 + $0x588] sm:$0xf0]  ;;  %v5572_v15 = vld [vmem:[%s8159_s6 + $0x90] sm:$0xff] }
 0x135   :  { %2462 = vmatpush.bf16.msrb.mxu1 %v4603_v59  ;;  %v4568_v59 = vld [vmem:[%s8157_s4 + $0x488] sm:$0xf0]  ;;  %v1433_v44 = vpop.f32.mrf.mxu0 }
 0x136   :  { %2423 = vmatpush.bf16.msra.mxu2 %v4639_v11  ;;  %v7588_v6 = vpack.c.b16 %v2059_v45, %v2055_v22  ;;  %v4571_v40 = vor.u32 %v5506_v2, %v4568_v59  ;;  %v4659_v11 = vor.u32 %v5528_v19, %v4656_v38  ;;  %v5559_v19 = vld [vmem:[%s8159_s6 + $0x28] sm:$0xff] }
 0x137   :  { %2437 = vmatpush.bf16.msrb.mxu3 %v4703_v12  ;;  %v4723_v12 = vor.u32 %v5544_v48, %v4720_v17  ;;  %v5575_v38 = vld [vmem:[%s8159_s6 + $0xa8] sm:$0xff] }
 0x138   :  { %2449 = vmatpush.bf16.msra.mxu0 %v4531_v46  ;;  %v4728_v46 = vld [vmem:[%s8157_s4 + $0x5c8] sm:$0xf0] }
 0x139   :  { %2463 = vmatpush.bf16.msrb.mxu1 %v4595_v58  ;;  %v4731_v61 = vor.u32 %v5546_v29, %v4728_v46  ;;  %v5570_v29 = vld [vmem:[%s8159_s6 + $0x80] sm:$0xff]  ;;  %v5560_v46 = vld [vmem:[%s8159_s6 + $0x30] sm:$0xff] }
 0x13a   :  { %2424 = vmatpush.bf16.msra.mxu2 %v4631_v4  ;;  %v4632_v4 = vld [vmem:[%s8157_s4 + $0x508] sm:$0xf0] }
 0x13b   :  { %2438 = vmatpush.bf16.msrb.mxu3 %v4695_v60  ;;  %v5538_v60 = vld [vmem:[%s8157_s4 + $0x584] sm:$0xf] }
 0x13c   :  { %2450 = vmatpush.bf16.msra.mxu0 %v4523_v39  ;;  %v5524_v39 = vld [vmem:[%s8157_s4 + $0x514] sm:$0xf] }
 0x13d   :  { %2464 = vmatpush.bf16.msrb.mxu1 %v4587_v32  ;;  %2425 = vmatmul.bf16.vlgmr.msra.gmra.mxu2 %v7588_v6  ;;  %v1435_v27 = vpop.f32.mrf.mxu0  ;;  %v4640_v32 = vld [vmem:[%s8157_s4 + $0x518] sm:$0xf0] }
 0x13e   :  { %2473 = vmatpush.bf16.msrb.mxu2 %v4691_v54  ;;  %2439 = vmatmul.bf16.vlgmr.msrb.gmra.mxu3 %v7590_v30  ;;  %v4643_v34 = vor.u32 %v5524_v39, %v4640_v32  ;;  %v4635_v54 = vor.u32 %v5522_v21, %v4632_v4  ;;  %v5564_v4 = vld [vmem:[%s8159_s6 + $0x50] sm:$0xff] }
 0x13f   :  { %2487 = vmatpush.bf16.msra.mxu3 %v4755_v49  ;;  %v4699_v49 = vor.u32 %v5538_v60, %v4696_v35  ;;  %v5583_v35 = vld [vmem:[%s8159_s6 + $0xe8] sm:$0xff] }
 0x140   :  { %2451 = vmatpush.bf16.msra.mxu0 %v4515_v26 }
 0x141   :  { %2465 = vmatpush.bf16.msrb.mxu1 %v4579_v43 }
 0x142   :  { %2474 = vmatpush.bf16.msrb.mxu2 %v4683_v62 }
 0x143   :  { %2488 = vmatpush.bf16.msra.mxu3 %v4747_v33  ;;  %v1447_v58 = vpop.f32.mrf.mxu1 }
 0x144   :  { %2452 = vmatpush.bf16.msra.mxu0 %v4507_v53  ;;  %v1448_v9 = vadd.f32 %v1447_v58, %v1433_v44  ;;  %v5561_v44 = vld [vmem:[%s8159_s6 + $0x38] sm:$0xff]  ;;  %v5576_v58 = vld [vmem:[%s8159_s6 + $0xb0] sm:$0xff] }
 0x145   :  { %2466 = vmatpush.bf16.msrb.mxu1 %v4571_v40  ;;  %v7674_v31 = vpop.f32.mrf.mxu0  ;;  %v5573_v40 = vld [vmem:[%s8159_s6 + $0x98] sm:$0xff] }
 0x146   :  { %2475 = vmatpush.bf16.msrb.mxu2 %v4675_v36 }
 0x147   :  { %2489 = vmatpush.bf16.msra.mxu3 %v4739_v41  ;;  %2453 = vmatmul.bf16.vlgmr.msra.gmra.mxu0 %v7428_v55  ;;  %v5526_v55 = vld [vmem:[%s8157_s4 + $0x524] sm:$0xf] }
 0x148   :  { %2467 = vmatmul.bf16.vlgmr.msrb.gmra.mxu1 %v7430_v8  ;;  %v4648_v8 = vld [vmem:[%s8157_s4 + $0x528] sm:$0xf0]  ;;  %2667 = vmatpush.bf16.msrb.mxu0 %v5573_v40  ;;  %v5554_v40 = vld [vmem:[%s8159_s6] sm:$0xff] }
 0x149   :  { %v4651_v13 = vor.u32 %v5526_v55, %v4648_v8  ;;  %2684 = vmatpush.bf16.msra.mxu1 %v5577_v50  ;;  %v5589_v50 = vld [vmem:[%s8159_s6 + $0x118] sm:$0xff] }
 0x14a   :  { %2476 = vmatpush.bf16.msrb.mxu2 %v4667_v25 }
 0x14b   :  { %2490 = vmatpush.bf16.msra.mxu3 %v4731_v61  ;;  %v1449_v52 = vpop.f32.mrf.mxu1  ;;  %v5569_v61 = vld [vmem:[%s8159_s6 + $0x78] sm:$0xff] }
 0x14c   :  { %v1450_v1 = vadd.f32 %v1449_v52, %v1435_v27  ;;  %2668 = vmatpush.bf16.msrb.mxu0 %v5572_v15  ;;  %v5558_v27 = vld [vmem:[%s8159_s6 + $0x20] sm:$0xff] }
 0x14d   :  { %v7682_v7 = vpop.f32.mrf.mxu0  ;;  %2685 = vmatpush.bf16.msra.mxu1 %v5576_v58  ;;  %v5566_v52 = vld [vmem:[%s8159_s6 + $0x60] sm:$0xff] }
 0x14e   :  { %2477 = vmatpush.bf16.msrb.mxu2 %v4659_v11  ;;  %v5568_v11 = vld [vmem:[%s8159_s6 + $0x70] sm:$0xff] }
 0x14f   :  { %2491 = vmatpush.bf16.msra.mxu3 %v4723_v12  ;;  %v5567_v12 = vld [vmem:[%s8159_s6 + $0x68] sm:$0xff] }
 0x150   :  { %2669 = vmatpush.bf16.msrb.mxu0 %v5571_v56 }
 0x151   :  { %v1461_v63 = vpop.f32.mrf.mxu2  ;;  %2686 = vmatpush.bf16.msra.mxu1 %v5575_v38 }
 0x152   :  { %2478 = vmatpush.bf16.msrb.mxu2 %v4651_v13  ;;  %v1462_v24 = vadd.f32 %v1461_v63, %v1448_v9  ;;  %v5585_v13 = vld [vmem:[%s8159_s6 + $0xf8] sm:$0xff]  ;;  %v5584_v63 = vld [vmem:[%s8159_s6 + $0xf0] sm:$0xff] }
 0x153   :  { %2492 = vmatpush.bf16.msra.mxu3 %v4715_v28  ;;  %v7676_v42 = vpop.f32.mrf.mxu1  ;;  %v5597_v28 = vld [vmem:[%s8159_s6 + $0x158] sm:$0xff] }
 0x154   :  { %2670 = vmatpush.bf16.msrb.mxu0 %v5570_v29  ;;  %v1504_v60 = vadd.f32 %v7676_v42, %v7674_v31  ;;  %v5582_v42 = vld [vmem:[%s8159_s6 + $0xe0] sm:$0xff]  ;;  %v5601_v29 = vld [vmem:[%s8159_s6 + $0x178] sm:$0xff] }
 0x156   :  { %2479 = vmatpush.bf16.msrb.mxu2 %v4643_v34  ;;  %v5596_v34 = vld [vmem:[%s8159_s6 + $0x150] sm:$0xff] }
 0x157   :  { %2493 = vmatpush.bf16.msra.mxu3 %v4707_v5 }
 0x158   :  { %2671 = vmatpush.bf16.msrb.mxu0 %v5569_v61 }
 0x159   :  { %v1463_v45 = vpop.f32.mrf.mxu2 }
 0x15a   :  { %2480 = vmatpush.bf16.msrb.mxu2 %v4635_v54  ;;  %v1464_v10 = vadd.f32 %v1463_v45, %v1450_v1  ;;  %v5574_v1 = vld [vmem:[%s8159_s6 + $0xa0] sm:$0xff]  ;;  %v5595_v54 = vld [vmem:[%s8159_s6 + $0x148] sm:$0xff] }
 0x15b   :  { %2494 = vmatpush.bf16.msra.mxu3 %v4699_v49  ;;  %v7684_v47 = vpop.f32.mrf.mxu1  ;;  %2687 = vmatpush.bf16.msra.mxu1 %v5574_v1 }
 0x15c   :  { %2672 = vmatpush.bf16.msrb.mxu0 %v5568_v11 }
 0x15d   :  { %2481 = vmatmul.bf16.vlgmr.msrb.gmra.mxu2 %v7588_v6 }
 0x15e   :  { %2495 = vmatmul.bf16.vlgmr.msra.gmra.mxu3 %v7590_v30  ;;  %2775 = vmatpush.bf16.msra.mxu2 %v5561_v44 }
 0x15f   :  { %v1475_v18 = vpop.f32.mrf.mxu3  ;;  %2910 = vmatpush.bf16.msrb.mxu1 %v5585_v13  ;;  %2792 = vmatpush.bf16.msrb.mxu3 %v5565_v23 }
 0x160   :  { %v7670_v14 = vadd.f32 %v1475_v18, %v1462_v24  ;;  %2673 = vmatpush.bf16.msrb.mxu0 %v5567_v12  ;;  %v5556_v24 = vld [vmem:[%s8159_s6 + $0x10] sm:$0xff]  ;;  %v5563_v18 = vld [vmem:[%s8159_s6 + $0x48] sm:$0xff] }
 0x161   :  { %v7678_v57 = vpop.f32.mrf.mxu2  ;;  %v5588_v12 = vld [vmem:[%s8159_s6 + $0x110] sm:$0xff] }
 0x162   :  { %2776 = vmatpush.bf16.msra.mxu2 %v5560_v46  ;;  %v1518_v49 = vadd.f32 %v7678_v57, %v1504_v60  ;;  %v1506_v46 = vadd.f32 %v7684_v47, %v7682_v7 }
 0x163   :  { %2911 = vmatpush.bf16.msrb.mxu1 %v5584_v63  ;;  %2793 = vmatpush.bf16.msrb.mxu3 %v5564_v4 }
 0x164   :  { %2674 = vmatpush.bf16.msrb.mxu0 %v5566_v52 }
 0x166   :  { %2777 = vmatpush.bf16.msra.mxu2 %v5559_v19 }
 0x167   :  { %v1477_v26 = vpop.f32.mrf.mxu3  ;;  %2912 = vmatpush.bf16.msrb.mxu1 %v5583_v35  ;;  %2794 = vmatpush.bf16.msrb.mxu3 %v5563_v18 }
 0x168   :  { %v7672_v43 = vadd.f32 %v1477_v26, %v1464_v10  ;;  %3046 = vmatpush.bf16.msra.mxu0 %v5597_v28  ;;  %v5555_v10 = vld [vmem:[%s8159_s6 + $0x8] sm:$0xff] }
 0x169   :  { %v7686_v2 = vpop.f32.mrf.mxu2 }
 0x16a   :  { %2778 = vmatpush.bf16.msra.mxu2 %v5558_v27  ;;  %v1520_v38 = vadd.f32 %v7686_v2, %v1506_v46 }
 0x16b   :  { %2913 = vmatpush.bf16.msrb.mxu1 %v5582_v42 }
 0x16c   :  { %3047 = vmatpush.bf16.msra.mxu0 %v5596_v34 }
 0x16e   :  { %2779 = vmatpush.bf16.msra.mxu2 %v5557_v51 }
 0x16f   :  { %v7680_v22 = vpop.f32.mrf.mxu3 }
 0x170   :  { %3048 = vmatpush.bf16.msra.mxu0 %v5595_v54  ;;  %v1532_v26 = vadd.f32 %v7680_v22, %v1518_v49  ;;  %v5562_v22 = vld [vmem:[%s8159_s6 + $0x40] sm:$0xff] }
 0x171   :  { %2795 = vmatpush.bf16.msrb.mxu3 %v5562_v22 }
 0x172   :  { %2780 = vmatpush.bf16.msra.mxu2 %v5556_v24 }
 0x175   :  { %2927 = vmatpush.bf16.msra.mxu3 %v5589_v50 }
 0x176   :  { %2781 = vmatpush.bf16.msra.mxu2 %v5555_v10 }
 0x177   :  { %v7688_v59 = vpop.f32.mrf.mxu3 }
 0x178   :  { %v1534_v2 = vadd.f32 %v7688_v59, %v1520_v38 }
 0x179   :  { %2928 = vmatpush.bf16.msra.mxu3 %v5588_v12 }
 0x17a   :  { %2782 = vmatpush.bf16.msra.mxu2 %v5554_v40 }
 0x17e   :  { %3063 = vmatpush.bf16.msrb.mxu2 %v5601_v29 }
 0x184   :  { %v7690_v62 = vpop.f32.mrf.mxu0 }
 0x185   :  { %v7692_v6 = vpop.f32.mrf.mxu1  ;;  %v1886_v45 = vadd.f32 %v7690_v62, %v7670_v14  ;;  %v5594_v14 = vld [vmem:[%s8159_s6 + $0x140] sm:$0xff] }
 0x186   :  { %3049 = vmatpush.bf16.msra.mxu0 %v5594_v14 }
 0x187   :  { %v1900_v15 = vadd.f32 %v7692_v6, %v1886_v45  ;;  %v5581_v6 = vld [vmem:[%s8159_s6 + $0xd8] sm:$0xff]  ;;  %v5586_v45 = vld [vmem:[%s8159_s6 + $0x100] sm:$0xff] }
 0x188   :  { %2914 = vmatpush.bf16.msrb.mxu1 %v5581_v6 }
 0x18c   :  { %v7698_v3 = vpop.f32.mrf.mxu0 }
 0x18d   :  { %v7700_v53 = vpop.f32.mrf.mxu1  ;;  %v1888_v11 = vadd.f32 %v7698_v3, %v7672_v43  ;;  %v7855_v43 = vld [vmem:[%s8158_s5] sm:$0x3]  ;;  %v5580_v3 = vld [vmem:[%s8159_s6 + $0xd0] sm:$0xff] }
 0x18e   :  { %2915 = vmatpush.bf16.msrb.mxu1 %v5580_v3 }
 0x18f   :  { %v1902_v52 = vadd.f32 %v7700_v53, %v1888_v11  ;;  %v5579_v53 = vld [vmem:[%s8159_s6 + $0xc8] sm:$0xff] }
 0x192   :  { %2916 = vmatpush.bf16.msrb.mxu1 %v5579_v53 }
 0x194   :  { %v7712_v36 = vpop.f32.mrf.mxu0 }
 0x195   :  { %v7714_v41 = vpop.f32.mrf.mxu1  ;;  %v1942_v56 = vadd.f32 %v7712_v36, %v1532_v26  ;;  %v5593_v36 = vld [vmem:[%s8159_s6 + $0x138] sm:$0xff] }
 0x196   :  { %3050 = vmatpush.bf16.msra.mxu0 %v5593_v36 }
 0x197   :  { %v1956_v7 = vadd.f32 %v7714_v41, %v1942_v56  ;;  %v5592_v41 = vld [vmem:[%s8159_s6 + $0x130] sm:$0xff] }
 0x19a   :  { %3051 = vmatpush.bf16.msra.mxu0 %v5592_v41 }
 0x19c   :  { %v7747_v48 = vpop.f32.mrf.mxu0 }
 0x19d   :  { %v7749_v17 = vpop.f32.mrf.mxu1  ;;  %v1944_v1 = vadd.f32 %v7747_v48, %v1534_v2  ;;  %v5591_v48 = vld [vmem:[%s8159_s6 + $0x128] sm:$0xff] }
 0x19e   :  { %3052 = vmatpush.bf16.msra.mxu0 %v5591_v48 }
 0x19f   :  { %v1958_v24 = vadd.f32 %v7749_v17, %v1944_v1  ;;  %v5590_v17 = vld [vmem:[%s8159_s6 + $0x120] sm:$0xff]  ;;  %v5625_v1 = vld [vmem:[%s8159_s6 + $0x238] sm:$0xff] }
 0x1a0   :  { %v7694_v30 = vpop.f32.mrf.mxu2 }
 0x1a1   :  { %v7696_v33 = vpop.f32.mrf.mxu3  ;;  %v1914_v19 = vadd.f32 %v7694_v30, %v1900_v15  ;;  %v5600_v30 = vld [vmem:[%s8159_s6 + $0x170] sm:$0xff] }
 0x1a2   :  { %3064 = vmatpush.bf16.msrb.mxu2 %v5600_v30  ;;  %3053 = vmatpush.bf16.msra.mxu0 %v5590_v17  ;;  %v5608_v17 = vld [vmem:[%s8159_s6 + $0x1b0] sm:$0xff] }
 0x1a4   :  { %v2398_v20 = vpop.f32.mrf.mxu0 }
 0x1a5   :  { %v2412_v0 = vpop.f32.mrf.mxu1 }
 0x1a6   :  { %v2413_v31 = vadd.f32 %v2412_v0, %v2398_v20  ;;  %v1928_v20 = vadd.f32 %v7696_v33, %v1914_v19  ;;  %v5587_v33 = vld [vmem:[%s8159_s6 + $0x108] sm:$0xff] }
 0x1a7   :  { %2929 = vmatpush.bf16.msra.mxu3 %v5587_v33  ;;  %v5609_v33 = vld [vmem:[%s8159_s6 + $0x1b8] sm:$0xff] }
 0x1a8   :  { %v7708_v37 = vpop.f32.mrf.mxu2 }
 0x1a9   :  { %v7710_v16 = vpop.f32.mrf.mxu3  ;;  %v1916_v63 = vadd.f32 %v7708_v37, %v1902_v52  ;;  %v5598_v37 = vld [vmem:[%s8159_s6 + $0x160] sm:$0xff]  ;;  %v5613_v52 = vld [vmem:[%s8159_s6 + $0x1d8] sm:$0xff] }
 0x1ab   :  { %v1930_v10 = vadd.f32 %v7710_v16, %v1916_v63  ;;  %2930 = vmatpush.bf16.msra.mxu3 %v5586_v45 }
 0x1ac   :  { %v2400_v5 = vpop.f32.mrf.mxu0 }
 0x1ad   :  { %v2414_v21 = vpop.f32.mrf.mxu1 }
 0x1ae   :  { %v2415_v0 = vadd.f32 %v2414_v21, %v2400_v5  ;;  %v2507_v21 = vperm.slane %v7855_v43, 1 }
 0x1b0   :  { %v7734_v9 = vpop.f32.mrf.mxu2 }
 0x1b1   :  { %v7736_v25 = vpop.f32.mrf.mxu3  ;;  %v1970_v59 = vadd.f32 %v7734_v9, %v1956_v7  ;;  %v5599_v9 = vld [vmem:[%s8159_s6 + $0x168] sm:$0xff] }
 0x1b2   :  { %3065 = vmatpush.bf16.msrb.mxu2 %v5599_v9  ;;  %v5621_v9 = vld [vmem:[%s8159_s6 + $0x218] sm:$0xff] }
 0x1b3   :  { %v1984_v34 = vadd.f32 %v7736_v25, %v1970_v59  ;;  %v5578_v25 = vld [vmem:[%s8159_s6 + $0xc0] sm:$0xff] }
 0x1b4   :  { %2917 = vmatpush.bf16.msrb.mxu1 %v5578_v25 }
 0x1b6   :  { %3066 = vmatpush.bf16.msrb.mxu2 %v5598_v37 }
 0x1b8   :  { %v7757_v55 = vpop.f32.mrf.mxu2 }
 0x1b9   :  { %v7759_v8 = vpop.f32.mrf.mxu3  ;;  %v1972_v18 = vadd.f32 %v7757_v55, %v1958_v24  ;;  %v5612_v24 = vld [vmem:[%s8159_s6 + $0x1d0] sm:$0xff] }
 0x1bb   :  { %v1986_v15 = vadd.f32 %v7759_v8, %v1972_v18 }
 0x1c0   :  { %v2426_v39 = vpop.f32.mrf.mxu2 }
 0x1c1   :  { %v2440_v32 = vpop.f32.mrf.mxu3  ;;  %v2427_v44 = vadd.f32 %v2426_v39, %v2413_v31 }
 0x1c3   :  { %v2441_v47 = vadd.f32 %v2440_v32, %v2427_v44  ;;  %v2506_v32 = vperm.slane %v7855_v43, 0 }
 0x1c4   :  { %v2454_v58 = vpop.f32.mrf.mxu0 }
 0x1c5   :  { %v2468_v61 = vpop.f32.mrf.mxu1  ;;  %v2501_v39 = vadd.f32 %v2441_v47, %v1928_v20 }
 0x1c6   :  { %v2469_v27 = vadd.f32 %v2468_v61, %v2454_v58 }
 0x1c7   :  { %v2510_v35 = vadd.f32 %v2506_v32, %v2501_v39 }
 0x1c8   :  { %v2428_v57 = vpop.f32.mrf.mxu2 }
 0x1c9   :  { %v2442_v62 = vpop.f32.mrf.mxu3  ;;  %v2429_v51 = vadd.f32 %v2428_v57, %v2415_v0  ;;  %v2514_v14 = vmax.f32 %v2510_v35, 0.0 }
 0x1cb   :  { %v2443_v54 = vadd.f32 %v2442_v62, %v2429_v51 }
 0x1cc   :  { %v2456_v4 = vpop.f32.mrf.mxu0 }
 0x1cd   :  { %v2470_v60 = vpop.f32.mrf.mxu1  ;;  %v2503_v57 = vadd.f32 %v2443_v54, %v1930_v10  ;;  %v5620_v10 = vld [vmem:[%s8159_s6 + $0x210] sm:$0xff] }
 0x1ce   :  { %v2471_v26 = vadd.f32 %v2470_v60, %v2456_v4  ;;  %v5624_v4 = vld [vmem:[%s8159_s6 + $0x230] sm:$0xff] }
 0x1cf   :  { %v2512_v50 = vadd.f32 %v2506_v32, %v2503_v57 }
 0x1d1   :  { %v2516_v58 = vmax.f32 %v2512_v50, 0.0 }
 0x1e0   :  { %v2482_v13 = vpop.f32.mrf.mxu2 }
 0x1e1   :  { %v2496_v28 = vpop.f32.mrf.mxu3  ;;  %v2483_v23 = vadd.f32 %v2482_v13, %v2469_v27 }
 0x1e3   :  { %v2497_v5 = vadd.f32 %v2496_v28, %v2483_v23 }
 0x1e5   :  { %v2502_v49 = vadd.f32 %v2497_v5, %v1984_v34 }
 0x1e7   :  { %v2511_v31 = vadd.f32 %v2507_v21, %v2502_v49 }
 0x1e8   :  { %v2484_v42 = vpop.f32.mrf.mxu2 }
 0x1e9   :  { %v2515_v62 = vmax.f32 %v2511_v31, 0.0  ;;  %v2485_v40 = vadd.f32 %v2484_v42, %v2471_v26  ;;  %v2498_v22 = vpop.f32.mrf.mxu3 }
 0x1eb   :  { %v2518_v56 = vpack.c.bf16 %v2515_v62, %v2514_v14  ;;  %v2499_v44 = vadd.f32 %v2498_v22, %v2485_v40  ;;  %v5611_v22 = vld [vmem:[%s8159_s6 + $0x1c8] sm:$0xff] }
 0x1ed   :  { %v2504_v16 = vadd.f32 %v2499_v44, %v1986_v15  ;;  %v2571_v29 = vunpack.c.l.b16 %v2518_v56  ;;  %v2572_v55 = vunpack.c.h.b16 %v2518_v56  ;;  %v5623_v15 = vld [vmem:[%s8159_s6 + $0x228] sm:$0xff] }
 0x1ef   :  { %v2513_v46 = vadd.f32 %v2507_v21, %v2504_v16  ;;  %v7899_v6 = vunpack.i.l.s16 %v2571_v29  ;;  %v7901_v36 = vunpack.i.l.s16 %v2572_v55 }
 0x1f1   :  { %v2517_v61 = vmax.f32 %v2513_v46, 0.0  ;;  %v2583_v7 = vrot.slane %v7899_v6, 1  ;;  %v2586_v12 = vrot.slane %v7901_v36, 1  ;;  %v2826_v30 = vrot.slane %v7899_v6, 2 }
 0x1f2   :  { %v2962_v2 = vrot.slane %v7899_v6, 3  ;;  %v2829_v43 = vrot.slane %v7901_v36, 2  ;;  %v2965_v3 = vrot.slane %v7901_v36, 3  ;;  %v3101_v41 = vrot.slane %v7901_v36, 4 }
 0x1f3   :  { %v2519_v19 = vpack.c.bf16 %v2517_v61, %v2516_v58  ;;  %v3237_v54 = vrot.slane %v7901_v36, 5  ;;  %v3098_v37 = vrot.slane %v7899_v6, 4  ;;  %v3234_v31 = vrot.slane %v7899_v6, 5  ;;  %v5607_v58 = vld [vmem:[%s8159_s6 + $0x1a8] sm:$0xff] }
 0x1f4   :  { %v3370_v57 = vrot.slane %v7899_v6, 6  ;;  %v3506_v40 = vrot.slane %v7899_v6, 7  ;;  %v3373_v50 = vrot.slane %v7901_v36, 6  ;;  %v3509_v55 = vrot.slane %v7901_v36, 7  ;;  %v5619_v61 = vld [vmem:[%s8159_s6 + $0x208] sm:$0xff] }
 0x1f5   :  { %v2573_v38 = vunpack.c.l.b16 %v2519_v19  ;;  %v2574_v11 = vunpack.c.h.b16 %v2519_v19 }
 0x1f7   :  { %v7904_v8 = vunpack.i.l.s16 %v2573_v38  ;;  %v7906_v47 = vunpack.i.l.s16 %v2574_v11  ;;  %v5610_v38 = vld [vmem:[%s8159_s6 + $0x1c0] sm:$0xff] }
 0x1f8   :  { %v5622_v11 = vld [vmem:[%s8159_s6 + $0x220] sm:$0xff] }
 0x1f9   :  { %v2585_v20 = vsel %vm2584_vm3, %v7904_v8, %v2583_v7  ;;  %v2587_v0 = vsel %vm2584_vm3, %v7906_v47, %v2586_v12  ;;  %v2693_v59 = vrot.slane %v7904_v8, 7  ;;  %v2695_v27 = vrot.slane %v7906_v47, 7  ;;  %v5606_v7 = vld [vmem:[%s8159_s6 + $0x1a0] sm:$0xff]  ;;  %v5645_v12 = vld [vmem:[%s8159_s6 + $0x2d8] sm:$0xff] }
 0x1fa   :  { %v2588_v13 = vpack.c.b16 %v2585_v20, %v2585_v20  ;;  %v2589_v28 = vpack.c.b16 %v2587_v0, %v2587_v0  ;;  %v2827_v39 = vrot.slane %v7904_v8, 1  ;;  %v2963_v32 = vrot.slane %v7904_v8, 2  ;;  %v5632_v0 = vld [vmem:[%s8159_s6 + $0x270] sm:$0xff] }
 0x1fb   :  { %v2694_v51 = vsel %vm2584_vm3, %v2693_v59, %v7899_v6  ;;  %v2696_v23 = vsel %vm2584_vm3, %v2695_v27, %v7901_v36  ;;  %v2830_v53 = vrot.slane %v7906_v47, 1  ;;  %v2966_v48 = vrot.slane %v7906_v47, 2  ;;  %v5644_v59 = vld [vmem:[%s8159_s6 + $0x2d0] sm:$0xff] }
 0x1fc   :  { %2675 = vmatmul.bf16.vlgmr.msrb.gmra.mxu0 %v2588_v13  ;;  %4832 = vmatmul.msk.bf16.vlgmr.msra.gmra.mxu1 %vm2663_vm4, %v2589_v28  ;;  %v2697_v63 = vpack.c.b16 %v2694_v51, %v2694_v51  ;;  %v2698_v34 = vpack.c.b16 %v2696_v23, %v2696_v23  ;;  %v7942_v5 = vsel %vm2584_vm3, %v2827_v39, %v2826_v30  ;;  %v3102_v21 = vrot.slane %v7906_v47, 3  ;;  %v5604_v27 = vld [vmem:[%s8159_s6 + $0x190] sm:$0xff]  ;;  %v5643_v13 = vld [vmem:[%s8159_s6 + $0x2c8] sm:$0xff]  ;;  %v5642_v51 = vld [vmem:[%s8159_s6 + $0x2c0] sm:$0xff] }
 0x1fd   :  { %3199 = vmatpush.bf16.msra.mxu1 %v5613_v52  ;;  %3335 = vmatpush.bf16.msrb.mxu0 %v5625_v1  ;;  %v2964_v60 = vsel %vm2584_vm3, %v2963_v32, %v2962_v2  ;;  %v7953_v35 = vsel %vm2584_vm3, %v2830_v53, %v2829_v43  ;;  %v3238_v49 = vrot.slane %v7906_v47, 4  ;;  %v2967_v45 = vsel %vm2584_vm3, %v2966_v48, %v2965_v3  ;;  %v5605_v43 = vld [vmem:[%s8159_s6 + $0x198] sm:$0xff]  ;;  %v5616_v52 = vld [vmem:[%s8159_s6 + $0x1f0] sm:$0xff]  ;;  %v5631_v1 = vld [vmem:[%s8159_s6 + $0x268] sm:$0xff] }
 0x1fe   :  { %2783 = vmatmul.bf16.vlgmr.msra.gmra.mxu2 %v2697_v63  ;;  %4881 = vmatmul.msk.bf16.vlgmr.msrb.gmra.mxu3 %vm2663_vm4, %v2698_v34  ;;  %v3099_v25 = vrot.slane %v7904_v8, 3  ;;  %v7968_v18 = vsel %vm2584_vm3, %v3102_v21, %v3101_v41  ;;  %v3235_v42 = vrot.slane %v7904_v8, 4  ;;  %v3371_v62 = vrot.slane %v7904_v8, 5  ;;  %v5617_v3 = vld [vmem:[%s8159_s6 + $0x1f8] sm:$0xff]  ;;  %v5603_v28 = vld [vmem:[%s8159_s6 + $0x188] sm:$0xff]  ;;  %v5630_v32 = vld [vmem:[%s8159_s6 + $0x260] sm:$0xff] }
 0x1ff   :  { %3182 = vmatpush.bf16.msrb.mxu3 %v5609_v33  ;;  %3318 = vmatpush.bf16.msra.mxu2 %v5621_v9  ;;  %v7971_v26 = vsel %vm2584_vm3, %v3238_v49, %v3237_v54  ;;  %v3507_v44 = vrot.slane %v7904_v8, 6  ;;  %v3374_v16 = vrot.slane %v7906_v47, 5  ;;  %v3510_v46 = vrot.slane %v7906_v47, 6  ;;  %v5618_v8 = vld [vmem:[%s8159_s6 + $0x200] sm:$0xff]  ;;  %v5633_v47 = vld [vmem:[%s8159_s6 + $0x278] sm:$0xff]  ;;  %v5615_v39 = vld [vmem:[%s8159_s6 + $0x1e8] sm:$0xff] }
 0x200   :  { %v7976_v14 = vsel %vm2584_vm3, %v3099_v25, %v3098_v37  ;;  %v7988_v56 = vsel %vm2584_vm3, %v3235_v42, %v3234_v31  ;;  %v7994_v29 = vsel %vm2584_vm3, %v3371_v62, %v3370_v57  ;;  %v2832_v30 = vpack.c.b16 %v7942_v5, %v7942_v5  ;;  %v5602_v23 = vld [vmem:[%s8159_s6 + $0x180] sm:$0xff]  ;;  %v5629_v9 = vld [vmem:[%s8159_s6 + $0x258] sm:$0xff]  ;;  %v5648_v54 = vld [vmem:[%s8159_s6 + $0x2f0] sm:$0xff] }
 0x201   :  { %3200 = vmatpush.bf16.msra.mxu1 %v5612_v24  ;;  %3336 = vmatpush.bf16.msrb.mxu0 %v5624_v4  ;;  %v8005_v6 = vsel %vm2584_vm3, %v3507_v44, %v3506_v40  ;;  %v8008_v19 = vsel %vm2584_vm3, %v3374_v16, %v3373_v50  ;;  %v8011_v36 = vsel %vm2584_vm3, %v3510_v46, %v3509_v55  ;;  %v5614_v33 = vld [vmem:[%s8159_s6 + $0x1e0] sm:$0xff]  ;;  %v5641_v53 = vld [vmem:[%s8159_s6 + $0x2b8] sm:$0xff]  ;;  %v5628_v4 = vld [vmem:[%s8159_s6 + $0x250] sm:$0xff] }
 0x202   :  { %v2968_v2 = vpack.c.b16 %v2964_v60, %v2964_v60  ;;  %v2833_v41 = vpack.c.b16 %v7953_v35, %v7953_v35  ;;  %v2969_v20 = vpack.c.b16 %v2967_v45, %v2967_v45  ;;  %v3105_v48 = vpack.c.b16 %v7968_v18, %v7968_v18  ;;  %v5637_v34 = vld [vmem:[%s8159_s6 + $0x298] sm:$0xff]  ;;  %v5640_v60 = vld [vmem:[%s8159_s6 + $0x2b0] sm:$0xff]  ;;  %v5627_v49 = vld [vmem:[%s8159_s6 + $0x248] sm:$0xff] }
 0x203   :  { %3183 = vmatpush.bf16.msrb.mxu3 %v5608_v17  ;;  %3319 = vmatpush.bf16.msra.mxu2 %v5620_v10  ;;  %v3241_v63 = vpack.c.b16 %v7971_v26, %v7971_v26  ;;  %v5649_v5 = vld [vmem:[%s8159_s6 + $0x2f8] sm:$0xff]  ;;  %v3104_v21 = vpack.c.b16 %v7976_v14, %v7976_v14  ;;  %v3240_v24 = vpack.c.b16 %v7988_v56, %v7988_v56  ;;  %v5636_v35 = vld [vmem:[%s8159_s6 + $0x290] sm:$0xff]  ;;  %v5639_v45 = vld [vmem:[%s8159_s6 + $0x2a8] sm:$0xff] }
 0x204   :  { %v5635_v37 = vld [vmem:[%s8159_s6 + $0x288] sm:$0xff]  ;;  %v5626_v17 = vld [vmem:[%s8159_s6 + $0x240] sm:$0xff]  ;;  %v3376_v31 = vpack.c.b16 %v7994_v29, %v7994_v29  ;;  %v3512_v42 = vpack.c.b16 %v8005_v6, %v8005_v6  ;;  %v3377_v14 = vpack.c.b16 %v8008_v19, %v8008_v19  ;;  %v3513_v57 = vpack.c.b16 %v8011_v36, %v8011_v36 }
 0x205   :  { %3201 = vmatpush.bf16.msra.mxu1 %v5611_v22  ;;  %3337 = vmatpush.bf16.msrb.mxu0 %v5623_v15  ;;  %v5647_v25 = vld [vmem:[%s8159_s6 + $0x2e8] sm:$0xff]  ;;  %v5638_v10 = vld [vmem:[%s8159_s6 + $0x2a0] sm:$0xff] }
 0x206   :  { %v5634_v18 = vld [vmem:[%s8159_s6 + $0x280] sm:$0xff] }
 0x207   :  { %3184 = vmatpush.bf16.msrb.mxu3 %v5607_v58  ;;  %3320 = vmatpush.bf16.msra.mxu2 %v5619_v61  ;;  %v5646_v26 = vld [vmem:[%s8159_s6 + $0x2e0] sm:$0xff] }
 0x209   :  { %3202 = vmatpush.bf16.msra.mxu1 %v5610_v38  ;;  %3338 = vmatpush.bf16.msrb.mxu0 %v5622_v11 }
 0x20b   :  { %3185 = vmatpush.bf16.msrb.mxu3 %v5606_v7  ;;  %3321 = vmatpush.bf16.msra.mxu2 %v5618_v8 }
 0x20c   :  { %2918 = vmatmul.bf16.vlgmr.msrb.gmra.mxu1 %v2832_v30  ;;  %3054 = vmatmul.bf16.vlgmr.msra.gmra.mxu0 %v2968_v2 }
 0x20d   :  { %3454 = vmatpush.bf16.msrb.mxu1 %v5633_v47  ;;  %3590 = vmatpush.bf16.msra.mxu0 %v5645_v12 }
 0x20e   :  { %4954 = vmatmul.msk.bf16.vlgmr.msra.gmra.mxu3 %vm2663_vm4, %v2833_v41  ;;  %5027 = vmatmul.msk.bf16.vlgmr.msrb.gmra.mxu2 %vm2663_vm4, %v2969_v20 }
 0x20f   :  { %3186 = vmatpush.bf16.msrb.mxu3 %v5605_v43  ;;  %3322 = vmatpush.bf16.msra.mxu2 %v5617_v3 }
 0x211   :  { %3455 = vmatpush.bf16.msrb.mxu1 %v5632_v0  ;;  %3591 = vmatpush.bf16.msra.mxu0 %v5644_v59 }
 0x213   :  { %3187 = vmatpush.bf16.msrb.mxu3 %v5604_v27  ;;  %3323 = vmatpush.bf16.msra.mxu2 %v5616_v52 }
 0x215   :  { %3456 = vmatpush.bf16.msrb.mxu1 %v5631_v1  ;;  %3592 = vmatpush.bf16.msra.mxu0 %v5643_v13 }
 0x217   :  { %3188 = vmatpush.bf16.msrb.mxu3 %v5603_v28  ;;  %3324 = vmatpush.bf16.msra.mxu2 %v5615_v39 }
 0x219   :  { %3457 = vmatpush.bf16.msrb.mxu1 %v5630_v32  ;;  %3593 = vmatpush.bf16.msra.mxu0 %v5642_v51 }
 0x21b   :  { %3189 = vmatpush.bf16.msrb.mxu3 %v5602_v23  ;;  %3325 = vmatpush.bf16.msra.mxu2 %v5614_v33 }
 0x21c   :  { %5100 = vmatmul.msk.bf16.vlgmr.msra.gmra.mxu1 %vm2663_vm4, %v3105_v48  ;;  %5173 = vmatmul.msk.bf16.vlgmr.msrb.gmra.mxu0 %vm2663_vm4, %v3241_v63 }
 0x21d   :  { %3458 = vmatpush.bf16.msrb.mxu1 %v5629_v9  ;;  %3594 = vmatpush.bf16.msra.mxu0 %v5641_v53 }
 0x21e   :  { %3190 = vmatmul.bf16.vlgmr.msrb.gmra.mxu3 %v3104_v21  ;;  %3326 = vmatmul.bf16.vlgmr.msra.gmra.mxu2 %v3240_v24 }
 0x21f   :  { %3471 = vmatpush.bf16.msra.mxu3 %v5637_v34  ;;  %3607 = vmatpush.bf16.msrb.mxu2 %v5649_v5  ;;  %v5651_v34 = vld [vmem:[%s8160_s7] ss:$0 sm:$0xff] }
 0x221   :  { %3459 = vmatpush.bf16.msrb.mxu1 %v5628_v4  ;;  %3595 = vmatpush.bf16.msra.mxu0 %v5640_v60 }
 0x223   :  { %3472 = vmatpush.bf16.msra.mxu3 %v5636_v35  ;;  %3608 = vmatpush.bf16.msrb.mxu2 %v5648_v54 }
 0x225   :  { %3460 = vmatpush.bf16.msrb.mxu1 %v5627_v49  ;;  %3596 = vmatpush.bf16.msra.mxu0 %v5639_v45 }
 0x227   :  { %3473 = vmatpush.bf16.msra.mxu3 %v5635_v37  ;;  %3609 = vmatpush.bf16.msrb.mxu2 %v5647_v25 }
 0x229   :  { %3461 = vmatpush.bf16.msrb.mxu1 %v5626_v17  ;;  %3597 = vmatpush.bf16.msra.mxu0 %v5638_v10 }
 0x22b   :  { %3474 = vmatpush.bf16.msra.mxu3 %v5634_v18  ;;  %3610 = vmatpush.bf16.msrb.mxu2 %v5646_v26 }
 0x22c   :  { %3462 = vmatmul.bf16.vlgmr.msrb.gmra.mxu1 %v3376_v31  ;;  %3598 = vmatmul.bf16.vlgmr.msra.gmra.mxu0 %v3512_v42 }
 0x22e   :  { %5246 = vmatmul.msk.bf16.vlgmr.msra.gmra.mxu3 %vm2663_vm4, %v3377_v14  ;;  %5319 = vmatmul.msk.bf16.vlgmr.msrb.gmra.mxu2 %vm2663_vm4, %v3513_v57 }
 0x279   :  { %v2676_v62 = vpop.f32.mrf.mxu0  ;;  %v2689_v40 = vpop.f32.mrf.mxu1 }
 0x27a   :  { %v2690_v7 = vadd.f32 %v2689_v40, %v2676_v62 }
 0x281   :  { %v2678_v22 = vpop.f32.mrf.mxu0  ;;  %v2691_v15 = vpop.f32.mrf.mxu1 }
 0x282   :  { %v2784_v56 = vpop.f32.mrf.mxu2  ;;  %v2797_v44 = vpop.f32.mrf.mxu3 }
 0x283   :  { %v2785_v2 = vadd.f32 %v2784_v56, %v2690_v7 }
 0x285   :  { %v2798_v3 = vadd.f32 %v2797_v44, %v2785_v2 }
 0x289   :  { %v2919_v50 = vpop.f32.mrf.mxu1  ;;  %v3055_v16 = vpop.f32.mrf.mxu0 }
 0x28a   :  { %v2786_v29 = vpop.f32.mrf.mxu2  ;;  %v2799_v55 = vpop.f32.mrf.mxu3 }
 0x291   :  { %v2921_v46 = vpop.f32.mrf.mxu1  ;;  %v3057_v58 = vpop.f32.mrf.mxu0 }
 0x292   :  { %v2932_v61 = vpop.f32.mrf.mxu3  ;;  %v3068_v6 = vpop.f32.mrf.mxu2 }
 0x293   :  { %v2933_v43 = vadd.f32 %v2932_v61, %v2919_v50  ;;  %v3069_v52 = vadd.f32 %v3068_v6, %v3055_v16 }
 0x295   :  { %v2936_v41 = vadd.f32 %v2933_v43, %v2798_v3 }
 0x297   :  { %v3072_v13 = vadd.f32 %v3069_v52, %v2936_v41 }
 0x299   :  { %v3204_v19 = vpop.f32.mrf.mxu1  ;;  %v3340_v36 = vpop.f32.mrf.mxu0 }
 0x29a   :  { %v2934_v38 = vpop.f32.mrf.mxu3  ;;  %v3070_v11 = vpop.f32.mrf.mxu2 }
 0x2a1   :  { %v3206_v8 = vpop.f32.mrf.mxu1  ;;  %v3342_v47 = vpop.f32.mrf.mxu0 }
 0x2a2   :  { %v3191_v12 = vpop.f32.mrf.mxu3  ;;  %v3327_v30 = vpop.f32.mrf.mxu2 }
 0x2a3   :  { %v3205_v1 = vadd.f32 %v3204_v19, %v3191_v12  ;;  %v3341_v39 = vadd.f32 %v3340_v36, %v3327_v30 }
 0x2a5   :  { %v3208_v28 = vadd.f32 %v3205_v1, %v3072_v13 }
 0x2a7   :  { %v3344_v9 = vadd.f32 %v3341_v39, %v3208_v28 }
 0x2a9   :  { %v3463_v20 = vpop.f32.mrf.mxu1  ;;  %v3599_v0 = vpop.f32.mrf.mxu0 }
 0x2aa   :  { %v3193_v59 = vpop.f32.mrf.mxu3  ;;  %v3329_v27 = vpop.f32.mrf.mxu2 }
 0x2b1   :  { %v3465_v32 = vpop.f32.mrf.mxu1  ;;  %v3601_v51 = vpop.f32.mrf.mxu0 }
 0x2b2   :  { %v3476_v23 = vpop.f32.mrf.mxu3  ;;  %v3612_v33 = vpop.f32.mrf.mxu2 }
 0x2b3   :  { %v3477_v53 = vadd.f32 %v3476_v23, %v3463_v20  ;;  %v3613_v63 = vadd.f32 %v3612_v33, %v3599_v0 }
 0x2b5   :  { %v3480_v48 = vadd.f32 %v3477_v53, %v3344_v9 }
 0x2b7   :  { %v3616_v5 = vadd.f32 %v3613_v63, %v3480_v48 }
 0x2b9   :  { %v3621_v21 = vadd.f32 %v5651_v34, %v3616_v5 }
 0x2ba   :  { %v3478_v24 = vpop.f32.mrf.mxu3  ;;  %v3614_v4 = vpop.f32.mrf.mxu2 }
 0x2bb   :  { %3623 = vst.msk [vmem:[#allocation3] sm:$0x3] %vm3622_vm5, %v3621_v21 }
 0x2bc   :  { %3634 = dma.vmem_to_hbm [thread:$0]  %s3630_s26, 32, %s3632_s28, [#allocation4]  }
 0x2bd   :  { %5676 = dma.done.wait [#allocation4], 32  }
 0x2be   :  { %5677 = vsyncadd [#allocation4], 4294967264 }
 0x2bf   :  { %3639 = vsyncpa [#allocation4], 1 }

</bundles_post_ra>
